<compile_context>
chip_gen: v7x
topology: tpu7x:2x2x1
jax: 0.10.0
libtpu: 0.0.40
codegen_flags: <defaults>
</compile_context>

<pallas_src>
import functools

import jax
import jax.numpy as jnp
from jax import lax
from jax.experimental import pallas as pl
from jax.experimental.pallas import tpu as pltpu

LEAK = 0.2
EPS = 1e-5  # PyTorch BatchNorm1d default


def _lrelu(v):
    # one mul + one max (cheaper than compare+select)
    return jnp.maximum(v, LEAK * v)


def _flatten_block(x_ref, G):
    """(G, C, L) block ref -> (C, G*L) value via lane-axis concat (in VMEM)."""
    if G == 1:
        return x_ref[0]
    return jnp.concatenate([x_ref[g] for g in range(G)], axis=1)


def _tiled_pos(G, L):
    """(1, G*L) int32 with values 0..L-1 repeating per sequence."""
    pos1 = lax.broadcasted_iota(jnp.int32, (1, L), 1)
    if G == 1:
        return pos1
    return jnp.concatenate([pos1] * G, axis=1)


def _conv_stack(xf, w1, w2f, w3, pos, L, P, cdt):
    """conv1(1x1)->lrelu->conv2(k=3,pad=1,taps fused)->lrelu->conv3(1x1).

    xf : (Cin, G*L) f32 -- G sequences flattened on the lane axis.
    w1 (P,Cin), w2f (3P,P), w3 (Cout,P) already in compute dtype `cdt`.
    pos: (1, G*L) int32, per-sequence lane index in [0, L).
    Returns the pre-BN conv3 output, (Cout, G*L) f32.
    """
    GL = xf.shape[1]
    y1 = _lrelu(jnp.dot(w1, xf.astype(cdt),
                        preferred_element_type=jnp.float32))          # (P, GL)
    z = jnp.dot(w2f, y1.astype(cdt),
                preferred_element_type=jnp.float32)                   # (3P, GL)
    a, b, c = z[0:P], z[P:2 * P], z[2 * P:3 * P]
    # tap k=0 reads y1[l-1] -> shift right one lane; each sequence's first
    # column is the conv zero padding (also kills cross-sequence leakage).
    a_sh = jnp.where(pos == 0, 0.0, pltpu.roll(a, shift=1, axis=1))
    # tap k=2 reads y1[l+1] -> shift left one lane; last column is padding.
    c_sh = jnp.where(pos == L - 1, 0.0, pltpu.roll(c, shift=GL - 1, axis=1))
    y2 = _lrelu(a_sh + b + c_sh)                                      # (P, GL)
    return jnp.dot(w3, y2.astype(cdt),
                   preferred_element_type=jnp.float32)                # (Cout, GL)


# --------------------------------------------------------------------------
# Kernels
# --------------------------------------------------------------------------

def _make_stats_kernel(G, P, Cout, L, cdt):
    def kernel(x_ref, w1_ref, w2f_ref, w3_ref, stats_ref):
        pos = _tiled_pos(G, L)
        xf = _flatten_block(x_ref, G)                                 # (Cin, GL)
        y3 = _conv_stack(xf, w1_ref[...], w2f_ref[...], w3_ref[...],
                         pos, L, P, cdt)                              # (Cout, GL)
        s = jnp.sum(y3, axis=1, keepdims=True)                        # (Cout, 1)
        q = jnp.sum(y3 * y3, axis=1, keepdims=True)                   # (Cout, 1)
        # lane-dense partials: pad to 8 columns and transpose -> (8, Cout),
        # rows 0/1 are sum / sum-of-squares, rest are zero.
        pad = jnp.zeros((Cout, 6), jnp.float32)
        stats_ref[0] = jnp.concatenate([s, q, pad], axis=1).T
    return kernel


def _make_apply_kernel(G, P, Cout, L, cdt):
    def kernel(x_ref, w1_ref, w2f_ref, w3s_ref, bias_ref, o_ref):
        pos = _tiled_pos(G, L)
        xf = _flatten_block(x_ref, G)                                 # (Cin, GL)
        # BN scale is pre-folded into w3s -> only the bias add remains.
        y = _conv_stack(xf, w1_ref[...], w2f_ref[...], w3s_ref[...],
                        pos, L, P, cdt)                               # (Cout, GL)
        o = _lrelu(y + bias_ref[...] + xf)          # BN bias + residual + lrelu
        for g in range(G):                          # lane-dense (Cout, L) stores
            o_ref[g] = o[:, g * L:(g + 1) * L]
    return kernel


def _make_fused_kernel(N, P, Cout, L, cdt):
    """Whole batch resident in VMEM: stats + BN fold + apply in one kernel."""
    def kernel(x_ref, w1_ref, w2f_ref, w3_ref, gamma_ref, beta_ref, o_ref):
        pos = _tiled_pos(N, L)
        xf = _flatten_block(x_ref, N)                                 # (Cin, N*L)
        y3 = _conv_stack(xf, w1_ref[...], w2f_ref[...], w3_ref[...],
                         pos, L, P, cdt)                              # (Cout, N*L)
        cnt = jnp.float32(N * L)
        mean = jnp.sum(y3, axis=1, keepdims=True) / cnt               # (Cout, 1)
        var = jnp.maximum(
            jnp.sum(y3 * y3, axis=1, keepdims=True) / cnt - mean * mean, 0.0)
        scale = gamma_ref[...] * lax.rsqrt(var + EPS)                 # (Cout, 1)
        bias = beta_ref[...] - mean * scale
        o = _lrelu(y3 * scale + bias + xf)
        for g in range(N):
            o_ref[g] = o[:, g * L:(g + 1) * L]
    return kernel


# --------------------------------------------------------------------------
# VMEM budgeting (generation-aware)
# --------------------------------------------------------------------------

def _vmem_limits():
    cap = 64 * 1024 * 1024            # conservative fallback (v7x-sized VMEM)
    try:
        info = pltpu.get_tpu_info()
        cap = int(getattr(info, "vmem_capacity_bytes", cap)) or cap
    except Exception:
        pass
    vmem_limit = min((cap * 3) // 4, 100 * 1024 * 1024)   # headroom under physical
    block_budget = vmem_limit // 4                         # per-block target
    return vmem_limit, block_budget


def _bytes_per_seq(Cin, P, Cout, L):
    io = 2 * (Cin + Cout) * L * 4                # double-buffered x / out blocks
    interm = (Cin + 5 * P + 2 * Cout) * L * 4    # xf, y1, z, y2, y3/o (f32)
    return io + interm


def _fused_resident_bytes(N, Cin, P, Cout, L):
    return N * (2 * Cin + 5 * P + 3 * Cout) * L * 4


def _pick_seqs_per_block(N, bytes_per_seq, budget):
    # keep >=2 grid steps (ideally >=4) so v7x megacore + pipelining have work
    if N >= 4:
        g_cap = max(1, N // 4)
    elif N >= 2:
        g_cap = max(1, N // 2)
    else:
        g_cap = 1
    g = max(1, min(g_cap, budget // max(bytes_per_seq, 1)))
    while N % g:
        g -= 1
    return g


# --------------------------------------------------------------------------
# Wrapper
# --------------------------------------------------------------------------

def bottleneck_forward(x_ncl, w1_pt, w2_pt, w3_pt, gamma, beta, *,
                       compute_dtype=jnp.float32, seq_per_block=None,
                       force_two_pass=False):
    """x_ncl: (N, Cin, L) f32, PyTorch NCL layout. Returns (N, Cout, L) f32.

    Conv weights use the PyTorch Conv1d layout (out_ch, in_ch, kernel).
    compute_dtype: dtype fed to the MXU (f32 for exact parity, bf16 on v6e/v7x
    for ~2-4x faster matmuls with f32 accumulation).
    """
    N, Cin, L = x_ncl.shape
    P = w1_pt.shape[0]
    Cout = w3_pt.shape[0]
    assert Cin == Cout, "identity residual requires inplanes == planes*expansion"
    cdt = compute_dtype

    # Weight prep (tiny, once): 1x1 convs as (out,in) matrices; k=3 taps stacked
    # along M so the three tap matmuls fuse into a single MXU push.
    w1 = w1_pt[:, :, 0].astype(cdt)                                   # (P, Cin)
    w2f = jnp.concatenate([w2_pt[:, :, 0], w2_pt[:, :, 1], w2_pt[:, :, 2]],
                          axis=0).astype(cdt)                         # (3P, P)
    w3 = w3_pt[:, :, 0].astype(cdt)                                   # (Cout, P)

    vmem_limit, block_budget = _vmem_limits()

    w_specs = [
        pl.BlockSpec((P, Cin), lambda i: (0, 0)),
        pl.BlockSpec((3 * P, P), lambda i: (0, 0)),
        pl.BlockSpec((Cout, P), lambda i: (0, 0)),
    ]

    # ---------------- fused single-call fast path ----------------
    if (not force_two_pass and seq_per_block is None
            and _fused_resident_bytes(N, Cin, P, Cout, L) <= vmem_limit // 3):
        return pl.pallas_call(
            _make_fused_kernel(N, P, Cout, L, cdt),
            grid=(1,),
            in_specs=[pl.BlockSpec((N, Cin, L), lambda i: (0, 0, 0))] + w_specs
            + [pl.BlockSpec((Cout, 1), lambda i: (0, 0)),
               pl.BlockSpec((Cout, 1), lambda i: (0, 0))],
            out_specs=pl.BlockSpec((N, Cout, L), lambda i: (0, 0, 0)),
            out_shape=jax.ShapeDtypeStruct((N, Cout, L), jnp.float32),
            compiler_params=pltpu.CompilerParams(
                dimension_semantics=("arbitrary",),
                vmem_limit_bytes=vmem_limit),
        )(x_ncl, w1, w2f, w3,
          gamma.astype(jnp.float32).reshape(Cout, 1),
          beta.astype(jnp.float32).reshape(Cout, 1))

    # ---------------- gridded two-pass path ----------------
    if seq_per_block is None:
        seq_per_block = _pick_seqs_per_block(
            N, _bytes_per_seq(Cin, P, Cout, L), block_budget)
    G = seq_per_block
    assert N % G == 0, "seq_per_block must divide the batch size"
    n_blocks = N // G

    x_spec = pl.BlockSpec((G, Cin, L), lambda i: (i, 0, 0))
    cparams = pltpu.CompilerParams(
        dimension_semantics=("parallel",),       # lets v7x split across its 2 TCs
        vmem_limit_bytes=vmem_limit)

    # Pass 1: per-block per-channel sum / sum-of-squares of the pre-BN conv3
    # output (lane-dense (8, Cout) partials; rows 0/1 used).
    stats = pl.pallas_call(
        _make_stats_kernel(G, P, Cout, L, cdt),
        grid=(n_blocks,),
        in_specs=[x_spec] + w_specs,
        out_specs=pl.BlockSpec((1, 8, Cout), lambda i: (i, 0, 0)),
        out_shape=jax.ShapeDtypeStruct((n_blocks, 8, Cout), jnp.float32),
        compiler_params=cparams,
    )(x_ncl, w1, w2f, w3)

    # Combine partials (tiny (Cout,)-sized math), fold the BN scale into the
    # conv3 weights so the apply kernel only adds a bias.
    cnt = jnp.float32(N * L)
    mean = jnp.sum(stats[:, 0, :], axis=0) / cnt
    var = jnp.maximum(jnp.sum(stats[:, 1, :], axis=0) / cnt - mean * mean, 0.0)
    scale = gamma * lax.rsqrt(var + EPS)
    bias = beta - mean * scale
    w3s = (scale[:, None] * w3_pt[:, :, 0]).astype(cdt)               # (Cout, P)

    # Pass 2: recompute the cheap conv stack with the scaled conv3 weights,
    # add folded bias + residual, LeakyReLU; writes NCL output directly.
    out = pl.pallas_call(
        _make_apply_kernel(G, P, Cout, L, cdt),
        grid=(n_blocks,),
        in_specs=[x_spec] + w_specs[:2] + [
            pl.BlockSpec((Cout, P), lambda i: (0, 0)),
            pl.BlockSpec((Cout, 1), lambda i: (0, 0)),
        ],
        out_specs=pl.BlockSpec((G, Cout, L), lambda i: (i, 0, 0)),
        out_shape=jax.ShapeDtypeStruct((N, Cout, L), jnp.float32),
        compiler_params=cparams,
    )(x_ncl, w1, w2f, w3s, bias.astype(jnp.float32).reshape(Cout, 1))
    return out


# --------------------------------------------------------------------------
# Pure-JAX reference + demo
# --------------------------------------------------------------------------

def bottleneck_reference(x_ncl, w1_pt, w2_pt, w3_pt, gamma, beta):
    """Pure-JAX reference matching the PyTorch forward (NCL layout)."""
    def conv1d(x, w, pad):
        return lax.conv_general_dilated(
            x, w, window_strides=(1,), padding=[(pad, pad)],
            dimension_numbers=("NCH", "OIH", "NCH"))

    y = _lrelu(conv1d(x_ncl, w1_pt, 0))
    y = _lrelu(conv1d(y, w2_pt, 1))
    y = conv1d(y, w3_pt, 0)
    mean = jnp.mean(y, axis=(0, 2), keepdims=True)
    var = jnp.mean((y - mean) ** 2, axis=(0, 2), keepdims=True)
    y = (y - mean) / jnp.sqrt(var + EPS) * gamma[None, :, None] + beta[None, :, None]
    return _lrelu(y + x_ncl)


if __name__ == "__main__":
    # Bottleneck(inplanes=128, planes=32) -> expansion 4 -> out channels 128,
    # stride=1, downsample=None (identity residual).
    N, L = 8, 128
    planes = 32
    inplanes = planes * 4        # 128
    outplanes = planes * 4       # 128

    key = jax.random.PRNGKey(0)
    kx, k1, k2, k3, kg, kb = jax.random.split(key, 6)

    x = jax.random.normal(kx, (N, inplanes, L), dtype=jnp.float32)
    # PyTorch Conv1d weight shapes: (out_ch, in_ch, kernel)
    w1_pt = 0.1 * jax.random.normal(k1, (planes, inplanes, 1), dtype=jnp.float32)
    w2_pt = 0.1 * jax.random.normal(k2, (planes, planes, 3), dtype=jnp.float32)
    w3_pt = 0.1 * jax.random.normal(k3, (outplanes, planes, 1), dtype=jnp.float32)
    gamma = 1.0 + 0.1 * jax.random.normal(kg, (outplanes,), dtype=jnp.float32)
    beta = 0.1 * jax.random.normal(kb, (outplanes,), dtype=jnp.float32)

    ref = jax.block_until_ready(
        bottleneck_reference(x, w1_pt, w2_pt, w3_pt, gamma, beta))

    # 1) fused single-call fast path (whole batch resident in VMEM), f32 MXU.
    fused_fn = jax.jit(bottleneck_forward)
    out_fused = jax.block_until_ready(
        fused_fn(x, w1_pt, w2_pt, w3_pt, gamma, beta))
    assert out_fused.shape == (N, outplanes, L)
    assert jnp.allclose(out_fused, ref, atol=1e-3, rtol=1e-3), float(
        jnp.max(jnp.abs(out_fused - ref)))

    # 2) gridded two-pass path (stats + folded-BN apply), f32 MXU.
    two_pass_fn = jax.jit(functools.partial(bottleneck_forward,
                                            force_two_pass=True))
    out_tp = jax.block_until_ready(
        two_pass_fn(x, w1_pt, w2_pt, w3_pt, gamma, beta))
    assert jnp.allclose(out_tp, ref, atol=1e-3, rtol=1e-3), float(
        jnp.max(jnp.abs(out_tp - ref)))

    # 3) bf16 MXU operands (f32 accumulation) -- loose parity vs f32 reference.
    bf16_fn = jax.jit(functools.partial(bottleneck_forward,
                                        compute_dtype=jnp.bfloat16,
                                        force_two_pass=True))
    out_bf = jax.block_until_ready(
        bf16_fn(x, w1_pt, w2_pt, w3_pt, gamma, beta))
    err_bf = float(jnp.max(jnp.abs(out_bf - ref)))
    assert err_bf < 0.15, err_bf

    print("KERNEL_OK")
</pallas_src>

<mosaic_0001>
module attributes {stable_mosaic.version = 11 : i64} {
  func.func @kernel(%arg0: i32, %arg1: memref<8x128x128xf32, #tpu.memory_space<vmem>>, %arg2: memref<32x128xf32, #tpu.memory_space<vmem>>, %arg3: memref<96x32xf32, #tpu.memory_space<vmem>>, %arg4: memref<128x32xf32, #tpu.memory_space<vmem>>, %arg5: memref<128x1xf32, #tpu.memory_space<vmem>>, %arg6: memref<128x1xf32, #tpu.memory_space<vmem>>, %arg7: memref<8x128x128xf32, #tpu.memory_space<vmem>>) attributes {dimension_semantics = [#tpu.dimension_semantics<arbitrary>], iteration_bounds = array<i64: 1>, scalar_prefetch = 0 : i64, scratch_operands = 0 : i64, tpu.core_type = #tpu.core_type<tc>, window_params = [{pipeline_mode = #tpu.pipeline_mode<synchronous>, transform_indices = @transform_0, window_bounds = array<i64: 8, 128, 128>}, {pipeline_mode = #tpu.pipeline_mode<synchronous>, transform_indices = @transform_1, window_bounds = array<i64: 32, 128>}, {pipeline_mode = #tpu.pipeline_mode<synchronous>, transform_indices = @transform_2, window_bounds = array<i64: 96, 32>}, {pipeline_mode = #tpu.pipeline_mode<synchronous>, transform_indices = @transform_3, window_bounds = array<i64: 128, 32>}, {pipeline_mode = #tpu.pipeline_mode<synchronous>, transform_indices = @transform_4, window_bounds = array<i64: 128, 1>}, {pipeline_mode = #tpu.pipeline_mode<synchronous>, transform_indices = @transform_5, window_bounds = array<i64: 128, 1>}, {pipeline_mode = #tpu.pipeline_mode<synchronous>, transform_indices = @transform_6, window_bounds = array<i64: 8, 128, 128>}]} {
    %0 = tpu.iota {dimensions = array<i32: 1>} : vector<1x128xi32>
    %1 = tpu.concatenate %0, %0, %0, %0, %0, %0, %0, %0 in 1 : vector<1x128xi32>, vector<1x128xi32>, vector<1x128xi32>, vector<1x128xi32>, vector<1x128xi32>, vector<1x128xi32>, vector<1x128xi32>, vector<1x128xi32> -> vector<1x1024xi32>
    %c0 = arith.constant 0 : index
    %c0_0 = arith.constant 0 : index
    %c0_1 = arith.constant 0 : index
    %2 = vector.load %arg1[%c0, %c0_0, %c0_1] : memref<8x128x128xf32, #tpu.memory_space<vmem>>, vector<1x128x128xf32>
    %3 = vector.shape_cast %2 : vector<1x128x128xf32> to vector<128x128xf32>
    %c1 = arith.constant 1 : index
    %c0_2 = arith.constant 0 : index
    %c0_3 = arith.constant 0 : index
    %4 = vector.load %arg1[%c1, %c0_2, %c0_3] : memref<8x128x128xf32, #tpu.memory_space<vmem>>, vector<1x128x128xf32>
    %5 = vector.shape_cast %4 : vector<1x128x128xf32> to vector<128x128xf32>
    %c2 = arith.constant 2 : index
    %c0_4 = arith.constant 0 : index
    %c0_5 = arith.constant 0 : index
    %6 = vector.load %arg1[%c2, %c0_4, %c0_5] : memref<8x128x128xf32, #tpu.memory_space<vmem>>, vector<1x128x128xf32>
    %7 = vector.shape_cast %6 : vector<1x128x128xf32> to vector<128x128xf32>
    %c3 = arith.constant 3 : index
    %c0_6 = arith.constant 0 : index
    %c0_7 = arith.constant 0 : index
    %8 = vector.load %arg1[%c3, %c0_6, %c0_7] : memref<8x128x128xf32, #tpu.memory_space<vmem>>, vector<1x128x128xf32>
    %9 = vector.shape_cast %8 : vector<1x128x128xf32> to vector<128x128xf32>
    %c4 = arith.constant 4 : index
    %c0_8 = arith.constant 0 : index
    %c0_9 = arith.constant 0 : index
    %10 = vector.load %arg1[%c4, %c0_8, %c0_9] : memref<8x128x128xf32, #tpu.memory_space<vmem>>, vector<1x128x128xf32>
    %11 = vector.shape_cast %10 : vector<1x128x128xf32> to vector<128x128xf32>
    %c5 = arith.constant 5 : index
    %c0_10 = arith.constant 0 : index
    %c0_11 = arith.constant 0 : index
    %12 = vector.load %arg1[%c5, %c0_10, %c0_11] : memref<8x128x128xf32, #tpu.memory_space<vmem>>, vector<1x128x128xf32>
    %13 = vector.shape_cast %12 : vector<1x128x128xf32> to vector<128x128xf32>
    %c6 = arith.constant 6 : index
    %c0_12 = arith.constant 0 : index
    %c0_13 = arith.constant 0 : index
    %14 = vector.load %arg1[%c6, %c0_12, %c0_13] : memref<8x128x128xf32, #tpu.memory_space<vmem>>, vector<1x128x128xf32>
    %15 = vector.shape_cast %14 : vector<1x128x128xf32> to vector<128x128xf32>
    %c7 = arith.constant 7 : index
    %c0_14 = arith.constant 0 : index
    %c0_15 = arith.constant 0 : index
    %16 = vector.load %arg1[%c7, %c0_14, %c0_15] : memref<8x128x128xf32, #tpu.memory_space<vmem>>, vector<1x128x128xf32>
    %17 = vector.shape_cast %16 : vector<1x128x128xf32> to vector<128x128xf32>
    %18 = tpu.concatenate %3, %5, %7, %9, %11, %13, %15, %17 in 1 : vector<128x128xf32>, vector<128x128xf32>, vector<128x128xf32>, vector<128x128xf32>, vector<128x128xf32>, vector<128x128xf32>, vector<128x128xf32>, vector<128x128xf32> -> vector<128x1024xf32>
    %c0_16 = arith.constant 0 : index
    %c0_17 = arith.constant 0 : index
    %19 = vector.load %arg2[%c0_16, %c0_17] : memref<32x128xf32, #tpu.memory_space<vmem>>, vector<32x128xf32>
    %c0_18 = arith.constant 0 : index
    %c0_19 = arith.constant 0 : index
    %20 = vector.load %arg3[%c0_18, %c0_19] : memref<96x32xf32, #tpu.memory_space<vmem>>, vector<96x32xf32>
    %c0_20 = arith.constant 0 : index
    %c0_21 = arith.constant 0 : index
    %21 = vector.load %arg4[%c0_20, %c0_21] : memref<128x32xf32, #tpu.memory_space<vmem>>, vector<128x32xf32>
    %cst = arith.constant dense<0.000000e+00> : vector<32x1024xf32>
    %22 = tpu.matmul %19, %18, %cst {dimension_numbers = #tpu.dot_dimension_numbers<[1], [0], [0], [1], [0, 0, 1, 1], [], []>} : vector<32x128xf32>, vector<128x1024xf32>, vector<32x1024xf32> -> vector<32x1024xf32>
    %cst_22 = arith.constant 2.000000e-01 : f32
    %23 = vector.broadcast %cst_22 : f32 to vector<32x1024xf32>
    %24 = arith.mulf %23, %22 : vector<32x1024xf32>
    %25 = arith.maximumf %22, %24 : vector<32x1024xf32>
    %cst_23 = arith.constant dense<0.000000e+00> : vector<96x1024xf32>
    %26 = tpu.matmul %20, %25, %cst_23 {dimension_numbers = #tpu.dot_dimension_numbers<[1], [0], [0], [1], [0, 0, 1, 1], [], []>} : vector<96x32xf32>, vector<32x1024xf32>, vector<96x1024xf32> -> vector<96x1024xf32>
    %27 = vector.extract_strided_slice %26 {offsets = [0, 0], sizes = [32, 1024], strides = [1, 1]} : vector<96x1024xf32> to vector<32x1024xf32>
    %28 = vector.extract_strided_slice %26 {offsets = [32, 0], sizes = [32, 1024], strides = [1, 1]} : vector<96x1024xf32> to vector<32x1024xf32>
    %29 = vector.extract_strided_slice %26 {offsets = [64, 0], sizes = [32, 1024], strides = [1, 1]} : vector<96x1024xf32> to vector<32x1024xf32>
    %c0_i32 = arith.constant 0 : i32
    %30 = vector.broadcast %c0_i32 : i32 to vector<1x1024xi32>
    %31 = arith.cmpi eq, %1, %30 : vector<1x1024xi32>
    %c1_i32 = arith.constant 1 : i32
    %32 = tpu.dynamic_rotate %27 by %c1_i32 dim 1 : vector<32x1024xf32>, i32 -> vector<32x1024xf32>
    %cst_24 = arith.constant 0.000000e+00 : f32
    %33 = vector.shape_cast %31 : vector<1x1024xi1> to vector<1x1024xi1>
    %34 = vector.broadcast %33 : vector<1x1024xi1> to vector<32x1024xi1>
    %35 = vector.broadcast %cst_24 : f32 to vector<32x1024xf32>
    %36 = arith.select %34, %35, %32 : vector<32x1024xi1>, vector<32x1024xf32>
    %c127_i32 = arith.constant 127 : i32
    %37 = vector.broadcast %c127_i32 : i32 to vector<1x1024xi32>
    %38 = arith.cmpi eq, %1, %37 : vector<1x1024xi32>
    %c1023_i32 = arith.constant 1023 : i32
    %39 = tpu.dynamic_rotate %29 by %c1023_i32 dim 1 : vector<32x1024xf32>, i32 -> vector<32x1024xf32>
    %cst_25 = arith.constant 0.000000e+00 : f32
    %40 = vector.shape_cast %38 : vector<1x1024xi1> to vector<1x1024xi1>
    %41 = vector.broadcast %40 : vector<1x1024xi1> to vector<32x1024xi1>
    %42 = vector.broadcast %cst_25 : f32 to vector<32x1024xf32>
    %43 = arith.select %41, %42, %39 : vector<32x1024xi1>, vector<32x1024xf32>
    %44 = arith.addf %36, %28 : vector<32x1024xf32>
    %45 = arith.addf %44, %43 : vector<32x1024xf32>
    %cst_26 = arith.constant 2.000000e-01 : f32
    %46 = vector.broadcast %cst_26 : f32 to vector<32x1024xf32>
    %47 = arith.mulf %46, %45 : vector<32x1024xf32>
    %48 = arith.maximumf %45, %47 : vector<32x1024xf32>
    %cst_27 = arith.constant dense<0.000000e+00> : vector<128x1024xf32>
    %49 = tpu.matmul %21, %48, %cst_27 {dimension_numbers = #tpu.dot_dimension_numbers<[1], [0], [0], [1], [0, 0, 1, 1], [], []>} : vector<128x32xf32>, vector<32x1024xf32>, vector<128x1024xf32> -> vector<128x1024xf32>
    %cst_28 = arith.constant dense<0.000000e+00> : vector<128xf32>
    %50 = vector.multi_reduction <add>, %49, %cst_28 [1] : vector<128x1024xf32> to vector<128xf32>
    %51 = vector.shape_cast %50 : vector<128xf32> to vector<128x1xf32>
    %cst_29 = arith.constant 1.024000e+03 : f32
    %52 = vector.broadcast %cst_29 : f32 to vector<128x1xf32>
    %53 = arith.divf %51, %52 : vector<128x1xf32>
    %54 = arith.mulf %49, %49 : vector<128x1024xf32>
    %cst_30 = arith.constant dense<0.000000e+00> : vector<128xf32>
    %55 = vector.multi_reduction <add>, %54, %cst_30 [1] : vector<128x1024xf32> to vector<128xf32>
    %56 = vector.shape_cast %55 : vector<128xf32> to vector<128x1xf32>
    %cst_31 = arith.constant 1.024000e+03 : f32
    %57 = vector.broadcast %cst_31 : f32 to vector<128x1xf32>
    %58 = arith.divf %56, %57 : vector<128x1xf32>
    %59 = arith.mulf %53, %53 : vector<128x1xf32>
    %60 = arith.subf %58, %59 : vector<128x1xf32>
    %cst_32 = arith.constant 0.000000e+00 : f32
    %61 = vector.broadcast %cst_32 : f32 to vector<128x1xf32>
    %62 = arith.maximumf %60, %61 : vector<128x1xf32>
    %c0_33 = arith.constant 0 : index
    %c0_34 = arith.constant 0 : index
    %63 = vector.load %arg5[%c0_33, %c0_34] : memref<128x1xf32, #tpu.memory_space<vmem>>, vector<128x1xf32>
    %cst_35 = arith.constant 9.99999974E-6 : f32
    %64 = vector.broadcast %cst_35 : f32 to vector<128x1xf32>
    %65 = arith.addf %62, %64 : vector<128x1xf32>
    %66 = math.rsqrt %65 : vector<128x1xf32>
    %67 = arith.mulf %63, %66 : vector<128x1xf32>
    %c0_36 = arith.constant 0 : index
    %c0_37 = arith.constant 0 : index
    %68 = vector.load %arg6[%c0_36, %c0_37] : memref<128x1xf32, #tpu.memory_space<vmem>>, vector<128x1xf32>
    %69 = arith.mulf %53, %67 : vector<128x1xf32>
    %70 = arith.subf %68, %69 : vector<128x1xf32>
    %71 = vector.broadcast %67 : vector<128x1xf32> to vector<128x1024xf32>
    %72 = arith.mulf %49, %71 : vector<128x1024xf32>
    %73 = vector.broadcast %70 : vector<128x1xf32> to vector<128x1024xf32>
    %74 = arith.addf %72, %73 : vector<128x1024xf32>
    %75 = arith.addf %74, %18 : vector<128x1024xf32>
    %cst_38 = arith.constant 2.000000e-01 : f32
    %76 = vector.broadcast %cst_38 : f32 to vector<128x1024xf32>
    %77 = arith.mulf %76, %75 : vector<128x1024xf32>
    %78 = arith.maximumf %75, %77 : vector<128x1024xf32>
    %79 = vector.extract_strided_slice %78 {offsets = [0, 0], sizes = [128, 128], strides = [1, 1]} : vector<128x1024xf32> to vector<128x128xf32>
    %c0_39 = arith.constant 0 : index
    %c0_40 = arith.constant 0 : index
    %c0_41 = arith.constant 0 : index
    %80 = vector.load %arg7[%c0_39, %c0_40, %c0_41] : memref<8x128x128xf32, #tpu.memory_space<vmem>>, vector<1x128x128xf32>
    %81 = vector.shape_cast %80 : vector<1x128x128xf32> to vector<128x128xf32>
    %82 = vector.shape_cast %79 : vector<128x128xf32> to vector<1x128x128xf32>
    tpu.vector_store %arg7[%c0_39, %c0_40, %c0_41], %82 {strides = array<i32>} : memref<8x128x128xf32, #tpu.memory_space<vmem>>, vector<1x128x128xf32>,
    %83 = vector.extract_strided_slice %78 {offsets = [0, 128], sizes = [128, 128], strides = [1, 1]} : vector<128x1024xf32> to vector<128x128xf32>
    %c1_42 = arith.constant 1 : index
    %c0_43 = arith.constant 0 : index
    %c0_44 = arith.constant 0 : index
    %84 = vector.load %arg7[%c1_42, %c0_43, %c0_44] : memref<8x128x128xf32, #tpu.memory_space<vmem>>, vector<1x128x128xf32>
    %85 = vector.shape_cast %84 : vector<1x128x128xf32> to vector<128x128xf32>
    %86 = vector.shape_cast %83 : vector<128x128xf32> to vector<1x128x128xf32>
    tpu.vector_store %arg7[%c1_42, %c0_43, %c0_44], %86 {strides = array<i32>} : memref<8x128x128xf32, #tpu.memory_space<vmem>>, vector<1x128x128xf32>,
    %87 = vector.extract_strided_slice %78 {offsets = [0, 256], sizes = [128, 128], strides = [1, 1]} : vector<128x1024xf32> to vector<128x128xf32>
    %c2_45 = arith.constant 2 : index
    %c0_46 = arith.constant 0 : index
    %c0_47 = arith.constant 0 : index
    %88 = vector.load %arg7[%c2_45, %c0_46, %c0_47] : memref<8x128x128xf32, #tpu.memory_space<vmem>>, vector<1x128x128xf32>
    %89 = vector.shape_cast %88 : vector<1x128x128xf32> to vector<128x128xf32>
    %90 = vector.shape_cast %87 : vector<128x128xf32> to vector<1x128x128xf32>
    tpu.vector_store %arg7[%c2_45, %c0_46, %c0_47], %90 {strides = array<i32>} : memref<8x128x128xf32, #tpu.memory_space<vmem>>, vector<1x128x128xf32>,
    %91 = vector.extract_strided_slice %78 {offsets = [0, 384], sizes = [128, 128], strides = [1, 1]} : vector<128x1024xf32> to vector<128x128xf32>
    %c3_48 = arith.constant 3 : index
    %c0_49 = arith.constant 0 : index
    %c0_50 = arith.constant 0 : index
    %92 = vector.load %arg7[%c3_48, %c0_49, %c0_50] : memref<8x128x128xf32, #tpu.memory_space<vmem>>, vector<1x128x128xf32>
    %93 = vector.shape_cast %92 : vector<1x128x128xf32> to vector<128x128xf32>
    %94 = vector.shape_cast %91 : vector<128x128xf32> to vector<1x128x128xf32>
    tpu.vector_store %arg7[%c3_48, %c0_49, %c0_50], %94 {strides = array<i32>} : memref<8x128x128xf32, #tpu.memory_space<vmem>>, vector<1x128x128xf32>,
    %95 = vector.extract_strided_slice %78 {offsets = [0, 512], sizes = [128, 128], strides = [1, 1]} : vector<128x1024xf32> to vector<128x128xf32>
    %c4_51 = arith.constant 4 : index
    %c0_52 = arith.constant 0 : index
    %c0_53 = arith.constant 0 : index
    %96 = vector.load %arg7[%c4_51, %c0_52, %c0_53] : memref<8x128x128xf32, #tpu.memory_space<vmem>>, vector<1x128x128xf32>
    %97 = vector.shape_cast %96 : vector<1x128x128xf32> to vector<128x128xf32>
    %98 = vector.shape_cast %95 : vector<128x128xf32> to vector<1x128x128xf32>
    tpu.vector_store %arg7[%c4_51, %c0_52, %c0_53], %98 {strides = array<i32>} : memref<8x128x128xf32, #tpu.memory_space<vmem>>, vector<1x128x128xf32>,
    %99 = vector.extract_strided_slice %78 {offsets = [0, 640], sizes = [128, 128], strides = [1, 1]} : vector<128x1024xf32> to vector<128x128xf32>
    %c5_54 = arith.constant 5 : index
    %c0_55 = arith.constant 0 : index
    %c0_56 = arith.constant 0 : index
    %100 = vector.load %arg7[%c5_54, %c0_55, %c0_56] : memref<8x128x128xf32, #tpu.memory_space<vmem>>, vector<1x128x128xf32>
    %101 = vector.shape_cast %100 : vector<1x128x128xf32> to vector<128x128xf32>
    %102 = vector.shape_cast %99 : vector<128x128xf32> to vector<1x128x128xf32>
    tpu.vector_store %arg7[%c5_54, %c0_55, %c0_56], %102 {strides = array<i32>} : memref<8x128x128xf32, #tpu.memory_space<vmem>>, vector<1x128x128xf32>,
    %103 = vector.extract_strided_slice %78 {offsets = [0, 768], sizes = [128, 128], strides = [1, 1]} : vector<128x1024xf32> to vector<128x128xf32>
    %c6_57 = arith.constant 6 : index
    %c0_58 = arith.constant 0 : index
    %c0_59 = arith.constant 0 : index
    %104 = vector.load %arg7[%c6_57, %c0_58, %c0_59] : memref<8x128x128xf32, #tpu.memory_space<vmem>>, vector<1x128x128xf32>
    %105 = vector.shape_cast %104 : vector<1x128x128xf32> to vector<128x128xf32>
    %106 = vector.shape_cast %103 : vector<128x128xf32> to vector<1x128x128xf32>
    tpu.vector_store %arg7[%c6_57, %c0_58, %c0_59], %106 {strides = array<i32>} : memref<8x128x128xf32, #tpu.memory_space<vmem>>, vector<1x128x128xf32>,
    %107 = vector.extract_strided_slice %78 {offsets = [0, 896], sizes = [128, 128], strides = [1, 1]} : vector<128x1024xf32> to vector<128x128xf32>
    %c7_60 = arith.constant 7 : index
    %c0_61 = arith.constant 0 : index
    %c0_62 = arith.constant 0 : index
    %108 = vector.load %arg7[%c7_60, %c0_61, %c0_62] : memref<8x128x128xf32, #tpu.memory_space<vmem>>, vector<1x128x128xf32>
    %109 = vector.shape_cast %108 : vector<1x128x128xf32> to vector<128x128xf32>
    %110 = vector.shape_cast %107 : vector<128x128xf32> to vector<1x128x128xf32>
    tpu.vector_store %arg7[%c7_60, %c0_61, %c0_62], %110 {strides = array<i32>} : memref<8x128x128xf32, #tpu.memory_space<vmem>>, vector<1x128x128xf32>,
    return
  }
  func.func @transform_0(%arg0: i32) -> (i32, i32, i32) {
    %c0_i32 = arith.constant 0 : i32
    %c0_i32_0 = arith.constant 0 : i32
    %c0_i32_1 = arith.constant 0 : i32
    %c0_i32_2 = arith.constant 0 : i32
    return %c0_i32, %c0_i32_0, %c0_i32_1 : i32, i32, i32
  }
  func.func @transform_1(%arg0: i32) -> (i32, i32) {
    %c0_i32 = arith.constant 0 : i32
    %c0_i32_0 = arith.constant 0 : i32
    %c0_i32_1 = arith.constant 0 : i32
    return %c0_i32, %c0_i32_0 : i32, i32
  }
  func.func @transform_2(%arg0: i32) -> (i32, i32) {
    %c0_i32 = arith.constant 0 : i32
    %c0_i32_0 = arith.constant 0 : i32
    %c0_i32_1 = arith.constant 0 : i32
    return %c0_i32, %c0_i32_0 : i32, i32
  }
  func.func @transform_3(%arg0: i32) -> (i32, i32) {
    %c0_i32 = arith.constant 0 : i32
    %c0_i32_0 = arith.constant 0 : i32
    %c0_i32_1 = arith.constant 0 : i32
    return %c0_i32, %c0_i32_0 : i32, i32
  }
  func.func @transform_4(%arg0: i32) -> (i32, i32) {
    %c0_i32 = arith.constant 0 : i32
    %c0_i32_0 = arith.constant 0 : i32
    %c0_i32_1 = arith.constant 0 : i32
    return %c0_i32, %c0_i32_0 : i32, i32
  }
  func.func @transform_5(%arg0: i32) -> (i32, i32) {
    %c0_i32 = arith.constant 0 : i32
    %c0_i32_0 = arith.constant 0 : i32
    %c0_i32_1 = arith.constant 0 : i32
    return %c0_i32, %c0_i32_0 : i32, i32
  }
  func.func @transform_6(%arg0: i32) -> (i32, i32, i32) {
    %c0_i32 = arith.constant 0 : i32
    %c0_i32_0 = arith.constant 0 : i32
    %c0_i32_1 = arith.constant 0 : i32
    %c0_i32_2 = arith.constant 0 : i32
    return %c0_i32, %c0_i32_0, %c0_i32_1 : i32, i32, i32
  }
}

</mosaic_0001>

<bundles_post_ra>
// kernel: bottleneck_forward.1
= control target key start
LH: loop header
LB: loop body
LE: loop exit
PB: predicated region body
PF: predicated region fallthrough
CT: control target
= control target key end

     0   :  { %v7731_v7 = vmov 0.0   ;;  %s7724_s0 = inlined_call_operand.vmem [shape: f32[8,128,128], index: 0, kind: input, shape index: {}]   ;;  %s7725_s1 = inlined_call_operand.vmem [shape: f32[32,128], index: 1, kind: input, shape index: {}]   ;;  %s7726_s2 = inlined_call_operand.vmem [shape: f32[96,32], index: 2, kind: input, shape index: {}]   ;;  %s7727_s3 = inlined_call_operand.vmem [shape: f32[128,32], index: 3, kind: input, shape index: {}]   ;;  %s7728_s4 = inlined_call_operand.vmem [shape: f32[128,1], index: 4, kind: input, shape index: {}]   ;;  %s7729_s5 = inlined_call_operand.vmem [shape: f32[128,1], index: 5, kind: input, shape index: {}]   ;;  %s7730_s6 = inlined_call_operand.hbm [shape: f32[8,128,128], index: 6, kind: output, shape index: {}]  }
   0x1   :  { %v3850_v0 = vld [vmem:[%s7724_s0 + $0x80] sm:$0xff]  ;;  %v3851_v1 = vld [vmem:[%s7724_s0 + $0x88] sm:$0xff]  ;;  %257 = vmatprep.mubr.f32.mxu0 %v7731_v7  ;;  %346 = vmatprep.mubr.f32.mxu1 %v7731_v7  ;;  %v3852_v12 = vld [vmem:[%s7724_s0 + $0x90] sm:$0xff] }
   0x2   :  { %v3882_v2 = vld [vmem:[%s7724_s0 + $0x180] sm:$0xff]  ;;  %v4074_v3 = vpack.c.bf16 %v3851_v1, %v3850_v0  ;;  %v3883_v4 = vld [vmem:[%s7724_s0 + $0x188] sm:$0xff]  ;;  %v3853_v14 = vld [vmem:[%s7724_s0 + $0x98] sm:$0xff] }
   0x3   :  { %v26_v5 = vld [vmem:[%s7724_s0] sm:$0xff]  ;;  %v27_v6 = vld [vmem:[%s7724_s0 + $0x8] sm:$0xff]  ;;  %v4106_v8 = vpack.c.bf16 %v3883_v4, %v3882_v2  ;;  %v3884_v15 = vld [vmem:[%s7724_s0 + $0x190] sm:$0xff]  ;;  %v4078_v17 = vpack.c.bf16 %v3853_v14, %v3852_v12 }
   0x4   :  { %v4076_v9 = vpack.c.bf16 %v27_v6, %v26_v5  ;;  %v3866_v10 = vld [vmem:[%s7724_s0 + $0x100] sm:$0xff]  ;;  %v3867_v11 = vld [vmem:[%s7724_s0 + $0x108] sm:$0xff]  ;;  %4075 = vmatprep.subr.bf16.mxu0 %v4074_v3  ;;  %v3885_v16 = vld [vmem:[%s7724_s0 + $0x198] sm:$0xff] }
   0x5   :  { %v4108_v13 = vpack.c.bf16 %v3867_v11, %v3866_v10  ;;  %4107 = vmatprep.subr.bf16.mxu1 %v4106_v8  ;;  %v4110_v18 = vpack.c.bf16 %v3885_v16, %v3884_v15  ;;  %v28_v19 = vld [vmem:[%s7724_s0 + $0x10] sm:$0xff]  ;;  %v29_v20 = vld [vmem:[%s7724_s0 + $0x18] sm:$0xff]  ;;  %v3854_v24 = vld [vmem:[%s7724_s0 + $0xa0] sm:$0xff] }
   0x6   :  { %4077 = vmatpush1.bf16.msra.mxu0 %v4076_v9  ;;  %v3868_v21 = vld [vmem:[%s7724_s0 + $0x110] sm:$0xff]  ;;  %v4080_v22 = vpack.c.bf16 %v29_v20, %v28_v19  ;;  %v3869_v23 = vld [vmem:[%s7724_s0 + $0x118] sm:$0xff]  ;;  %v3855_v25 = vld [vmem:[%s7724_s0 + $0xa8] sm:$0xff] }
   0x7   :  { %4109 = vmatpush1.bf16.msra.mxu1 %v4108_v13  ;;  %4079 = vmatprep.subr.bf16.mxu0 %v4078_v17  ;;  %v4112_v26 = vpack.c.bf16 %v3869_v23, %v3868_v21  ;;  %v4082_v27 = vpack.c.bf16 %v3855_v25, %v3854_v24  ;;  %v3886_v28 = vld [vmem:[%s7724_s0 + $0x1a0] sm:$0xff]  ;;  %v3887_v29 = vld [vmem:[%s7724_s0 + $0x1a8] sm:$0xff]  ;;  %v3856_v36 = vld [vmem:[%s7724_s0 + $0xb0] sm:$0xff] }
   0x8   :  { %4111 = vmatprep.subr.bf16.mxu1 %v4110_v18  ;;  %v30_v30 = vld [vmem:[%s7724_s0 + $0x20] sm:$0xff]  ;;  %v4114_v31 = vpack.c.bf16 %v3887_v29, %v3886_v28  ;;  %v31_v32 = vld [vmem:[%s7724_s0 + $0x28] sm:$0xff]  ;;  %v3857_v37 = vld [vmem:[%s7724_s0 + $0xb8] sm:$0xff] }
   0x9   :  { %v3870_v33 = vld [vmem:[%s7724_s0 + $0x120] sm:$0xff]  ;;  %v3871_v34 = vld [vmem:[%s7724_s0 + $0x128] sm:$0xff]  ;;  %v4084_v35 = vpack.c.bf16 %v31_v32, %v30_v30  ;;  %v3888_v38 = vld [vmem:[%s7724_s0 + $0x1b0] sm:$0xff]  ;;  %v4086_v40 = vpack.c.bf16 %v3857_v37, %v3856_v36 }
   0xa   :  { %4081 = vmatpush1.bf16.msra.mxu0 %v4080_v22  ;;  %v4116_v39 = vpack.c.bf16 %v3871_v34, %v3870_v33  ;;  %v3889_v41 = vld [vmem:[%s7724_s0 + $0x1b8] sm:$0xff]  ;;  %v32_v42 = vld [vmem:[%s7724_s0 + $0x30] sm:$0xff]  ;;  %v3858_v47 = vld [vmem:[%s7724_s0 + $0xc0] sm:$0xff] }
   0xb   :  { %4113 = vmatpush1.bf16.msra.mxu1 %v4112_v26  ;;  %4083 = vmatprep.subr.bf16.mxu0 %v4082_v27  ;;  %v33_v43 = vld [vmem:[%s7724_s0 + $0x38] sm:$0xff]  ;;  %v4118_v44 = vpack.c.bf16 %v3889_v41, %v3888_v38  ;;  %v3872_v45 = vld [vmem:[%s7724_s0 + $0x130] sm:$0xff]  ;;  %v3859_v48 = vld [vmem:[%s7724_s0 + $0xc8] sm:$0xff] }
   0xc   :  { %4115 = vmatprep.subr.bf16.mxu1 %v4114_v31  ;;  %v3873_v46 = vld [vmem:[%s7724_s0 + $0x138] sm:$0xff]  ;;  %v3890_v49 = vld [vmem:[%s7724_s0 + $0x1c0] sm:$0xff]  ;;  %v3891_v50 = vld [vmem:[%s7724_s0 + $0x1c8] sm:$0xff]  ;;  %v4088_v51 = vpack.c.bf16 %v33_v43, %v32_v42  ;;  %v4090_v53 = vpack.c.bf16 %v3859_v48, %v3858_v47 }
   0xd   :  { %v4120_v52 = vpack.c.bf16 %v3873_v46, %v3872_v45  ;;  %v34_v54 = vld [vmem:[%s7724_s0 + $0x40] sm:$0xff]  ;;  %v35_v55 = vld [vmem:[%s7724_s0 + $0x48] sm:$0xff]  ;;  %v4122_v57 = vpack.c.bf16 %v3891_v50, %v3890_v49  ;;  %v3860_v59 = vld [vmem:[%s7724_s0 + $0xd0] sm:$0xff] }
   0xe   :  { %4085 = vmatpush1.bf16.msra.mxu0 %v4084_v35  ;;  %v3874_v56 = vld [vmem:[%s7724_s0 + $0x140] sm:$0xff]  ;;  %v3875_v58 = vld [vmem:[%s7724_s0 + $0x148] sm:$0xff]  ;;  %v3861_v60 = vld [vmem:[%s7724_s0 + $0xd8] sm:$0xff]  ;;  %v4092_v63 = vpack.c.bf16 %v35_v55, %v34_v54 }
   0xf   :  { %4117 = vmatpush1.bf16.msra.mxu1 %v4116_v39  ;;  %4087 = vmatprep.subr.bf16.mxu0 %v4086_v40  ;;  %v3892_v61 = vld [vmem:[%s7724_s0 + $0x1d0] sm:$0xff]  ;;  %v3893_v62 = vld [vmem:[%s7724_s0 + $0x1d8] sm:$0xff]  ;;  %v4124_v0 = vpack.c.bf16 %v3875_v58, %v3874_v56  ;;  %v4094_v1 = vpack.c.bf16 %v3861_v60, %v3860_v59  ;;  %v3862_v8 = vld [vmem:[%s7724_s0 + $0xe0] sm:$0xff] }
  0x10   :  { %4119 = vmatprep.subr.bf16.mxu1 %v4118_v44  ;;  %v36_v2 = vld [vmem:[%s7724_s0 + $0x50] sm:$0xff]  ;;  %v37_v3 = vld [vmem:[%s7724_s0 + $0x58] sm:$0xff]  ;;  %v4126_v5 = vpack.c.bf16 %v3893_v62, %v3892_v61  ;;  %v3863_v9 = vld [vmem:[%s7724_s0 + $0xe8] sm:$0xff] }
  0x11   :  { %v3876_v4 = vld [vmem:[%s7724_s0 + $0x150] sm:$0xff]  ;;  %v3877_v6 = vld [vmem:[%s7724_s0 + $0x158] sm:$0xff]  ;;  %v3894_v10 = vld [vmem:[%s7724_s0 + $0x1e0] sm:$0xff]  ;;  %v4096_v12 = vpack.c.bf16 %v37_v3, %v36_v2  ;;  %v4098_v14 = vpack.c.bf16 %v3863_v9, %v3862_v8 }
  0x12   :  { %4089 = vmatpush1.bf16.msra.mxu0 %v4088_v51  ;;  %v3895_v11 = vld [vmem:[%s7724_s0 + $0x1e8] sm:$0xff]  ;;  %v4128_v13 = vpack.c.bf16 %v3877_v6, %v3876_v4  ;;  %v38_v15 = vld [vmem:[%s7724_s0 + $0x60] sm:$0xff]  ;;  %v3864_v20 = vld [vmem:[%s7724_s0 + $0xf0] sm:$0xff] }
  0x13   :  { %4121 = vmatpush1.bf16.msra.mxu1 %v4120_v52  ;;  %4091 = vmatprep.subr.bf16.mxu0 %v4090_v53  ;;  %v39_v16 = vld [vmem:[%s7724_s0 + $0x68] sm:$0xff]  ;;  %v3878_v17 = vld [vmem:[%s7724_s0 + $0x160] sm:$0xff]  ;;  %v4130_v18 = vpack.c.bf16 %v3895_v11, %v3894_v10  ;;  %v3865_v21 = vld [vmem:[%s7724_s0 + $0xf8] sm:$0xff] }
  0x14   :  { %4123 = vmatprep.subr.bf16.mxu1 %v4122_v57  ;;  %v3879_v19 = vld [vmem:[%s7724_s0 + $0x168] sm:$0xff]  ;;  %v3896_v22 = vld [vmem:[%s7724_s0 + $0x1f0] sm:$0xff]  ;;  %v3897_v23 = vld [vmem:[%s7724_s0 + $0x1f8] sm:$0xff]  ;;  %v4100_v24 = vpack.c.bf16 %v39_v16, %v38_v15  ;;  %v4102_v26 = vpack.c.bf16 %v3865_v21, %v3864_v20 }
  0x15   :  { %v4132_v25 = vpack.c.bf16 %v3879_v19, %v3878_v17  ;;  %v40_v27 = vld [vmem:[%s7724_s0 + $0x70] sm:$0xff]  ;;  %v41_v28 = vld [vmem:[%s7724_s0 + $0x78] sm:$0xff]  ;;  %v4134_v30 = vpack.c.bf16 %v3897_v23, %v3896_v22  ;;  %v3914_v32 = vld [vmem:[%s7724_s0 + $0x280] sm:$0xff] }
  0x16   :  { %4093 = vmatpush1.bf16.msra.mxu0 %v4092_v63  ;;  %v3880_v29 = vld [vmem:[%s7724_s0 + $0x170] sm:$0xff]  ;;  %v3881_v31 = vld [vmem:[%s7724_s0 + $0x178] sm:$0xff]  ;;  %v3915_v33 = vld [vmem:[%s7724_s0 + $0x288] sm:$0xff]  ;;  %v4104_v34 = vpack.c.bf16 %v41_v28, %v40_v27 }
  0x17   :  { %4125 = vmatpush1.bf16.msra.mxu1 %v4124_v0  ;;  %4095 = vmatprep.subr.bf16.mxu0 %v4094_v1  ;;  %v4136_v35 = vpack.c.bf16 %v3881_v31, %v3880_v29  ;;  %v4138_v36 = vpack.c.bf16 %v3915_v33, %v3914_v32  ;;  %v3946_v37 = vld [vmem:[%s7724_s0 + $0x380] sm:$0xff]  ;;  %v3947_v38 = vld [vmem:[%s7724_s0 + $0x388] sm:$0xff]  ;;  %v3916_v41 = vld [vmem:[%s7724_s0 + $0x290] sm:$0xff] }
  0x18   :  { %4127 = vmatprep.subr.bf16.mxu1 %v4126_v5  ;;  %v3898_v39 = vld [vmem:[%s7724_s0 + $0x200] sm:$0xff]  ;;  %v3899_v40 = vld [vmem:[%s7724_s0 + $0x208] sm:$0xff]  ;;  %v4170_v42 = vpack.c.bf16 %v3947_v38, %v3946_v37  ;;  %v3917_v43 = vld [vmem:[%s7724_s0 + $0x298] sm:$0xff] }
  0x19   :  { %v3930_v44 = vld [vmem:[%s7724_s0 + $0x300] sm:$0xff]  ;;  %v3931_v45 = vld [vmem:[%s7724_s0 + $0x308] sm:$0xff]  ;;  %v3948_v47 = vld [vmem:[%s7724_s0 + $0x390] sm:$0xff]  ;;  %v4140_v49 = vpack.c.bf16 %v3899_v40, %v3898_v39  ;;  %v4142_v50 = vpack.c.bf16 %v3917_v43, %v3916_v41 }
  0x1a   :  { %4097 = vmatpush1.bf16.msra.mxu0 %v4096_v12  ;;  %v4728_v46 = vld [vmem:[%s7725_s1] sm:$0xff]  ;;  %v3949_v48 = vld [vmem:[%s7724_s0 + $0x398] sm:$0xff]  ;;  %v3900_v51 = vld [vmem:[%s7724_s0 + $0x210] sm:$0xff]  ;;  %v4172_v54 = vpack.c.bf16 %v3931_v45, %v3930_v44 }
  0x1b   :  { %4129 = vmatpush1.bf16.msra.mxu1 %v4128_v13  ;;  %4099 = vmatprep.subr.bf16.mxu0 %v4098_v14  ;;  %v3901_v52 = vld [vmem:[%s7724_s0 + $0x218] sm:$0xff]  ;;  %v3918_v53 = vld [vmem:[%s7724_s0 + $0x2a0] sm:$0xff]  ;;  %v3919_v55 = vld [vmem:[%s7724_s0 + $0x2a8] sm:$0xff]  ;;  %v4174_v56 = vpack.c.bf16 %v3949_v48, %v3948_v47 }
  0x1c   :  { %4131 = vmatprep.subr.bf16.mxu1 %v4130_v18  ;;  %v3932_v57 = vld [vmem:[%s7724_s0 + $0x310] sm:$0xff]  ;;  %v3933_v58 = vld [vmem:[%s7724_s0 + $0x318] sm:$0xff]  ;;  %v4760_v59 = vld [vmem:[%s7725_s1 + $0x8] sm:$0xff]  ;;  %v4144_v62 = vpack.c.bf16 %v3901_v52, %v3900_v51  ;;  %v4146_v63 = vpack.c.bf16 %v3919_v55, %v3918_v53 }
  0x1d   :  { %v3950_v60 = vld [vmem:[%s7724_s0 + $0x3a0] sm:$0xff]  ;;  %v3951_v61 = vld [vmem:[%s7724_s0 + $0x3a8] sm:$0xff]  ;;  %v3920_v2 = vld [vmem:[%s7724_s0 + $0x2b0] sm:$0xff]  ;;  %v4176_v3 = vpack.c.bf16 %v3933_v58, %v3932_v57 }
  0x1e   :  { %4101 = vmatpush1.bf16.msra.mxu0 %v4100_v24  ;;  %v3902_v0 = vld [vmem:[%s7724_s0 + $0x220] sm:$0xff]  ;;  %v3903_v1 = vld [vmem:[%s7724_s0 + $0x228] sm:$0xff]  ;;  %v3921_v4 = vld [vmem:[%s7724_s0 + $0x2b8] sm:$0xff]  ;;  %v4178_v5 = vpack.c.bf16 %v3951_v61, %v3950_v60 }
  0x1f   :  { %4133 = vmatpush1.bf16.msra.mxu1 %v4132_v25  ;;  %4103 = vmatprep.subr.bf16.mxu0 %v4102_v26  ;;  %v3934_v6 = vld [vmem:[%s7724_s0 + $0x320] sm:$0xff]  ;;  %v3935_v8 = vld [vmem:[%s7724_s0 + $0x328] sm:$0xff]  ;;  %v4793_v9 = vld [vmem:[%s7725_s1 + $0x10] sm:$0xff]  ;;  %v4148_v12 = vpack.c.bf16 %v3903_v1, %v3902_v0  ;;  %v4150_v14 = vpack.c.bf16 %v3921_v4, %v3920_v2 }
  0x20   :  { %4135 = vmatprep.subr.bf16.mxu1 %v4134_v30  ;;  %v3952_v10 = vld [vmem:[%s7724_s0 + $0x3b0] sm:$0xff]  ;;  %v3953_v11 = vld [vmem:[%s7724_s0 + $0x3b8] sm:$0xff]  ;;  %v3922_v17 = vld [vmem:[%s7724_s0 + $0x2c0] sm:$0xff]  ;;  %v4180_v18 = vpack.c.bf16 %v3935_v8, %v3934_v6 }
  0x21   :  { %v4805_v13 = vld [vmem:[%s7725_s1 + $0x18] sm:$0xff]  ;;  %v3904_v15 = vld [vmem:[%s7724_s0 + $0x230] sm:$0xff]  ;;  %v3923_v19 = vld [vmem:[%s7724_s0 + $0x2c8] sm:$0xff]  ;;  %v4182_v20 = vpack.c.bf16 %v3953_v11, %v3952_v10 }
  0x22   :  { %4105 = vmatpush1.bf16.msra.mxu0 %v4104_v34  ;;  %v3905_v16 = vld [vmem:[%s7724_s0 + $0x238] sm:$0xff]  ;;  %v3936_v21 = vld [vmem:[%s7724_s0 + $0x330] sm:$0xff]  ;;  %v3954_v23 = vld [vmem:[%s7724_s0 + $0x3c0] sm:$0xff] }
  0x23   :  { %4137 = vmatpush1.bf16.msra.mxu1 %v4136_v35  ;;  %4139 = vmatprep.subr.bf16.mxu0 %v4138_v36  ;;  %v3937_v22 = vld [vmem:[%s7724_s0 + $0x338] sm:$0xff]  ;;  %v3955_v24 = vld [vmem:[%s7724_s0 + $0x3c8] sm:$0xff] }
  0x24   :  { %4171 = vmatprep.subr.bf16.mxu1 %v4170_v42 }
  0x25   :  { %258 = vmatmul.mubr.f32.vlgmr.msra.gmra.mrb[0].mxu0 %v4728_v46 }
  0x26   :  { %347 = vmatmul.mubr.f32.vlgmr.msra.gmra.mrb[0].mxu1 %v4728_v46  ;;  %263 = vmatprep.mubr.f32.mxu0 %v7731_v7 }
  0x27   :  { %352 = vmatprep.mubr.f32.mxu1 %v7731_v7  ;;  %4141 = vmatpush1.bf16.msra.mxu0 %v4140_v49 }
  0x28   :  { %4143 = vmatprep.subr.bf16.mxu0 %v4142_v50  ;;  %4173 = vmatpush1.bf16.msra.mxu1 %v4172_v54 }
  0x29   :  { %264 = vmatmul.mubr.f32.gmra.mrb[2].mxu0 %v4760_v59  ;;  %4175 = vmatprep.subr.bf16.mxu1 %v4174_v56 }
  0x2a   :  { %353 = vmatmul.mubr.f32.gmra.mrb[2].mxu1 %v4760_v59  ;;  %269 = vmatprep.mubr.f32.mxu0 %v7731_v7 }
  0x2b   :  { %358 = vmatprep.mubr.f32.mxu1 %v7731_v7  ;;  %4145 = vmatpush1.bf16.msra.mxu0 %v4144_v62 }
  0x2c   :  { %4147 = vmatprep.subr.bf16.mxu0 %v4146_v63  ;;  %4177 = vmatpush1.bf16.msra.mxu1 %v4176_v3 }
  0x2d   :  { %270 = vmatmul.mubr.f32.gmra.mrb[4].mxu0 %v4793_v9  ;;  %4179 = vmatprep.subr.bf16.mxu1 %v4178_v5 }
  0x2e   :  { %359 = vmatmul.mubr.f32.gmra.mrb[4].mxu1 %v4793_v9  ;;  %275 = vmatprep.mubr.f32.mxu0 %v7731_v7 }
  0x2f   :  { %11 = vsyncpa [#allocation3], 0  ;;  %364 = vmatprep.mubr.f32.mxu1 %v7731_v7  ;;  %4149 = vmatpush1.bf16.msra.mxu0 %v4148_v12  ;;  %v4152_v25 = vpack.c.bf16 %v3905_v16, %v3904_v15  ;;  %v4154_v26 = vpack.c.bf16 %v3923_v19, %v3922_v17  ;;  %v3906_v27 = vld [vmem:[%s7724_s0 + $0x240] sm:$0xff]  ;;  %v3907_v28 = vld [vmem:[%s7724_s0 + $0x248] sm:$0xff]  ;;  %v4184_v30 = vpack.c.bf16 %v3937_v22, %v3936_v21  ;;  %vm613_vm0 = vcmask 261120   ;;  %s4462_s17 = smov 127  }
  0x30   :  { %4151 = vmatprep.subr.bf16.mxu0 %v4150_v14  ;;  %v3924_v29 = vld [vmem:[%s7724_s0 + $0x2d0] sm:$0xff]  ;;  %4181 = vmatpush1.bf16.msra.mxu1 %v4180_v18  ;;  %v3925_v31 = vld [vmem:[%s7724_s0 + $0x2d8] sm:$0xff]  ;;  %v4186_v32 = vpack.c.bf16 %v3955_v24, %v3954_v23  ;;  %v3938_v33 = vld [vmem:[%s7724_s0 + $0x340] sm:$0xff]  ;;  %v4156_v37 = vpack.c.bf16 %v3907_v28, %v3906_v27  ;;  %s4463_s27 = smov [#allocation2]  }
  0x31   :  { %276 = vmatmul.mubr.f32.gmra.mrb[6].mxu0 %v4805_v13  ;;  %4183 = vmatprep.subr.bf16.mxu1 %v4182_v20  ;;  %v3939_v34 = vld [vmem:[%s7724_s0 + $0x348] sm:$0xff]  ;;  %v3956_v35 = vld [vmem:[%s7724_s0 + $0x3d0] sm:$0xff]  ;;  %v3957_v36 = vld [vmem:[%s7724_s0 + $0x3d8] sm:$0xff]  ;;  %v4158_v38 = vpack.c.bf16 %v3925_v31, %v3924_v29  ;;  %s3839_s28 = sshll.u32 %s4463_s27, 4  ;;  %s3840_s28 = int_to_ptr.vmem [resolvable:$true] %s3839_s28 }
  0x32   :  { %365 = vmatmul.mubr.f32.gmra.mrb[6].mxu1 %v4805_v13  ;;  %435 = vmatprep.mubr.f32.mxu0 %v7731_v7  ;;  %v3908_v39 = vld [vmem:[%s7724_s0 + $0x250] sm:$0xff]  ;;  %v3909_v40 = vld [vmem:[%s7724_s0 + $0x258] sm:$0xff]  ;;  %v3926_v41 = vld [vmem:[%s7724_s0 + $0x2e0] sm:$0xff]  ;;  %v4188_v42 = vpack.c.bf16 %v3939_v34, %v3938_v33  ;;  %v4190_v44 = vpack.c.bf16 %v3957_v36, %v3956_v35  ;;  %p4440_p1 = scmp.lt.s32.totalorder %s3840_s28, %s3840_s28 }
  0x33   :  { %4153 = vmatpush1.bf16.msra.mxu0 %v4152_v25  ;;  %524 = vmatprep.mubr.f32.mxu1 %v7731_v7  ;;  %v3927_v43 = vld [vmem:[%s7724_s0 + $0x2e8] sm:$0xff]  ;;  %v3940_v45 = vld [vmem:[%s7724_s0 + $0x350] sm:$0xff]  ;;  %v3941_v47 = vld [vmem:[%s7724_s0 + $0x358] sm:$0xff]  ;;  %v4160_v50 = vpack.c.bf16 %v3909_v40, %v3908_v39 }
  0x34   :  { %4155 = vmatprep.subr.bf16.mxu0 %v4154_v26  ;;  %4185 = vmatpush1.bf16.msra.mxu1 %v4184_v30  ;;  %v3958_v48 = vld [vmem:[%s7724_s0 + $0x3e0] sm:$0xff]  ;;  %v3959_v49 = vld [vmem:[%s7724_s0 + $0x3e8] sm:$0xff]  ;;  %v4162_v51 = vpack.c.bf16 %v3927_v43, %v3926_v41  ;;  %v3928_v54 = vld [vmem:[%s7724_s0 + $0x2f0] sm:$0xff]  ;;  %v4192_v55 = vpack.c.bf16 %v3941_v47, %v3940_v45 }
  0x35   :  { %4187 = vmatprep.subr.bf16.mxu1 %v4186_v32  ;;  %v3910_v52 = vld [vmem:[%s7724_s0 + $0x260] sm:$0xff]  ;;  %v3911_v53 = vld [vmem:[%s7724_s0 + $0x268] sm:$0xff]  ;;  %v3929_v56 = vld [vmem:[%s7724_s0 + $0x2f8] sm:$0xff]  ;;  %v4194_v57 = vpack.c.bf16 %v3959_v49, %v3958_v48 }
  0x36   :  { %v3942_v58 = vld [vmem:[%s7724_s0 + $0x360] sm:$0xff]  ;;  %v3943_v60 = vld [vmem:[%s7724_s0 + $0x368] sm:$0xff]  ;;  %v3960_v61 = vld [vmem:[%s7724_s0 + $0x3f0] sm:$0xff]  ;;  %v4164_v63 = vpack.c.bf16 %v3911_v53, %v3910_v52  ;;  %v4166_v0 = vpack.c.bf16 %v3929_v56, %v3928_v54 }
  0x37   :  { %4157 = vmatpush1.bf16.msra.mxu0 %v4156_v37  ;;  %v3961_v62 = vld [vmem:[%s7724_s0 + $0x3f8] sm:$0xff]  ;;  %v3912_v1 = vld [vmem:[%s7724_s0 + $0x270] sm:$0xff]  ;;  %v4196_v3 = vpack.c.bf16 %v3943_v60, %v3942_v58 }
  0x38   :  { %4159 = vmatprep.subr.bf16.mxu0 %v4158_v38  ;;  %4189 = vmatpush1.bf16.msra.mxu1 %v4188_v42  ;;  %v3913_v2 = vld [vmem:[%s7724_s0 + $0x278] sm:$0xff]  ;;  %v4198_v4 = vpack.c.bf16 %v3961_v62, %v3960_v61  ;;  %v3944_v5 = vld [vmem:[%s7724_s0 + $0x370] sm:$0xff] }
  0x39   :  { %4191 = vmatprep.subr.bf16.mxu1 %v4190_v44  ;;  %v3945_v6 = vld [vmem:[%s7724_s0 + $0x378] sm:$0xff]  ;;  %v4168_v8 = vpack.c.bf16 %v3913_v2, %v3912_v1  ;;  %v4942_v2 = vld [vmem:[%s7726_s2] sm:$0xff] }
  0x3a   :  { %v4200_v10 = vpack.c.bf16 %v3945_v6, %v3944_v5  ;;  %v4974_v5 = vld [vmem:[%s7726_s2 + $0x18] sm:$0xff] }
  0x3b   :  { %4161 = vmatpush1.bf16.msra.mxu0 %v4160_v50 }
  0x3c   :  { %4163 = vmatprep.subr.bf16.mxu0 %v4162_v51  ;;  %4193 = vmatpush1.bf16.msra.mxu1 %v4192_v55 }
  0x3d   :  { %4195 = vmatprep.subr.bf16.mxu1 %v4194_v57 }
  0x3f   :  { %4165 = vmatpush1.bf16.msra.mxu0 %v4164_v63 }
  0x40   :  { %4167 = vmatprep.subr.bf16.mxu0 %v4166_v0  ;;  %4197 = vmatpush1.bf16.msra.mxu1 %v4196_v3  ;;  %v4952_v3 = vld [vmem:[%s7726_s2 + $0x8] sm:$0xff] }
  0x41   :  { %4199 = vmatprep.subr.bf16.mxu1 %v4198_v4  ;;  %v4963_v4 = vld [vmem:[%s7726_s2 + $0x10] sm:$0xff] }
  0x43   :  { %4169 = vmatpush1.bf16.msra.mxu0 %v4168_v8 }
  0x44   :  { %4201 = vmatpush1.bf16.msra.mxu1 %v4200_v10 }
  0x46   :  { %436 = vmatmul.mubr.f32.vlgmr.msra.gmra.mrb[8].mxu0 %v4728_v46 }
  0x47   :  { %441 = vmatprep.mubr.f32.mxu0 %v7731_v7  ;;  %525 = vmatmul.mubr.f32.vlgmr.msra.gmra.mrb[8].mxu1 %v4728_v46 }
  0x48   :  { %530 = vmatprep.mubr.f32.mxu1 %v7731_v7 }
  0x4a   :  { %442 = vmatmul.mubr.f32.gmra.mrb[10].mxu0 %v4760_v59 }
  0x4b   :  { %447 = vmatprep.mubr.f32.mxu0 %v7731_v7  ;;  %531 = vmatmul.mubr.f32.gmra.mrb[10].mxu1 %v4760_v59 }
  0x4c   :  { %536 = vmatprep.mubr.f32.mxu1 %v7731_v7 }
  0x4e   :  { %448 = vmatmul.mubr.f32.gmra.mrb[12].mxu0 %v4793_v9 }
  0x4f   :  { %453 = vmatprep.mubr.f32.mxu0 %v7731_v7  ;;  %537 = vmatmul.mubr.f32.gmra.mrb[12].mxu1 %v4793_v9 }
  0x50   :  { %542 = vmatprep.mubr.f32.mxu1 %v7731_v7 }
  0x52   :  { %454 = vmatmul.mubr.f32.gmra.mrb[14].mxu0 %v4805_v13 }
  0x53   :  { %543 = vmatmul.mubr.f32.gmra.mrb[14].mxu1 %v4805_v13  ;;  %714 = vmatprep.mubr.f32.mxu0 %v7731_v7 }
  0x54   :  { %851 = vmatprep.mubr.f32.mxu1 %v7731_v7 }
  0xf8   :  { %v259_v46 = vpop.f32.mrb[0].mxu0 }
  0xf9   :  { %v261_v59 = vpop.f32.mrb[1].mxu0  ;;  %v348_v11 = vpop.f32.mrb[0].mxu1  ;;  %v549_v15 = vmul.f32 0.2, %v259_v46 }
  0xfa   :  { %v551_v12 = vmul.f32 0.2, %v348_v11  ;;  %v350_v14 = vpop.f32.mrb[1].mxu1  ;;  %v550_v17 = vmul.f32 0.2, %v261_v59 }
  0xfb   :  { %v552_v16 = vmul.f32 0.2, %v350_v14  ;;  %v581_v24 = vmax.f32 %v259_v46, %v549_v15  ;;  %v4985_v15 = vld [vmem:[%s7726_s2 + $0x20] sm:$0xff] }
  0xfc   :  { %v265_v18 = vpop.f32.mrb[2].mxu0  ;;  %v583_v21 = vmax.f32 %v348_v11, %v551_v12  ;;  %v582_v28 = vmax.f32 %v261_v59, %v550_v17 }
  0xfd   :  { %v557_v9 = vmul.f32 0.2, %v265_v18  ;;  %v354_v19 = vpop.f32.mrb[2].mxu1  ;;  %v267_v20 = vpop.f32.mrb[3].mxu0  ;;  %v584_v25 = vmax.f32 %v350_v14, %v552_v16 }
  0xfe   :  { %v559_v22 = vmul.f32 0.2, %v354_v19  ;;  %v558_v23 = vmul.f32 0.2, %v267_v20  ;;  %v356_v13 = vpop.f32.mrb[3].mxu1 }
  0xff   :  { %v589_v26 = vmax.f32 %v265_v18, %v557_v9  ;;  %v560_v27 = vmul.f32 0.2, %v356_v13 }
 0x100   :  { %v591_v29 = vmax.f32 %v354_v19, %v559_v22  ;;  %v590_v30 = vmax.f32 %v267_v20, %v558_v23  ;;  %v271_v31 = vpop.f32.mrb[4].mxu0 }
 0x101   :  { %v4204_v32 = vpack.c.bf16 %v589_v26, %v581_v24  ;;  %v592_v33 = vmax.f32 %v356_v13, %v560_v27  ;;  %v273_v34 = vpop.f32.mrb[5].mxu0  ;;  %v360_v35 = vpop.f32.mrb[4].mxu1  ;;  %v565_v41 = vmul.f32 0.2, %v271_v31  ;;  %v4996_v27 = vld [vmem:[%s7726_s2 + $0x28] sm:$0xff] }
 0x102   :  { %v4212_v36 = vpack.c.bf16 %v591_v29, %v583_v21  ;;  %v4202_v37 = vpack.c.bf16 %v590_v30, %v582_v28  ;;  %v567_v38 = vmul.f32 0.2, %v360_v35  ;;  %v362_v39 = vpop.f32.mrb[5].mxu1  ;;  %v566_v43 = vmul.f32 0.2, %v273_v34 }
 0x103   :  { %v4210_v40 = vpack.c.bf16 %v592_v33, %v584_v25  ;;  %v568_v42 = vmul.f32 0.2, %v362_v39  ;;  %v597_v53 = vmax.f32 %v271_v31, %v565_v41 }
 0x104   :  { %v277_v44 = vpop.f32.mrb[6].mxu0  ;;  %4203 = vmatprep.subr.bf16.mxu0 %v4202_v37  ;;  %v599_v49 = vmax.f32 %v360_v35, %v567_v38  ;;  %v598_v57 = vmax.f32 %v273_v34, %v566_v43  ;;  %v5007_v43 = vld [vmem:[%s7726_s2 + $0x30] sm:$0xff] }
 0x105   :  { %v573_v45 = vmul.f32 0.2, %v277_v44  ;;  %v366_v47 = vpop.f32.mrb[6].mxu1  ;;  %4211 = vmatprep.subr.bf16.mxu1 %v4210_v40  ;;  %v279_v48 = vpop.f32.mrb[7].mxu0  ;;  %4205 = vmatpush1.bf16.msra.mxu0 %v4204_v32  ;;  %v600_v54 = vmax.f32 %v362_v39, %v568_v42 }
 0x106   :  { %v575_v50 = vmul.f32 0.2, %v366_v47  ;;  %v574_v51 = vmul.f32 0.2, %v279_v48  ;;  %v368_v52 = vpop.f32.mrb[7].mxu1  ;;  %4213 = vmatpush1.bf16.msra.mxu1 %v4212_v36 }
 0x107   :  { %v605_v55 = vmax.f32 %v277_v44, %v573_v45  ;;  %v576_v56 = vmul.f32 0.2, %v368_v52 }
 0x108   :  { %v607_v58 = vmax.f32 %v366_v47, %v575_v50  ;;  %v606_v60 = vmax.f32 %v279_v48, %v574_v51 }
 0x109   :  { %v4208_v61 = vpack.c.bf16 %v605_v55, %v597_v53  ;;  %v608_v62 = vmax.f32 %v368_v52, %v576_v56 }
 0x10a   :  { %v4216_v63 = vpack.c.bf16 %v607_v58, %v599_v49  ;;  %v4206_v0 = vpack.c.bf16 %v606_v60, %v598_v57  ;;  %v5018_v58 = vld [vmem:[%s7726_s2 + $0x38] sm:$0xff] }
 0x10b   :  { %v4214_v1 = vpack.c.bf16 %v608_v62, %v600_v54 }
 0x10c   :  { %4207 = vmatprep.subr.bf16.mxu0 %v4206_v0 }
 0x10d   :  { %4215 = vmatprep.subr.bf16.mxu1 %v4214_v1  ;;  %4209 = vmatpush1.bf16.msra.mxu0 %v4208_v61 }
 0x10e   :  { %4217 = vmatpush1.bf16.msra.mxu1 %v4216_v63 }
 0x110   :  { %3962 = vmatmul.mubr.msk.f32.vlgmr.msra.gmra.mrb[16].mxu0 %vm613_vm0, %v4942_v2 }
 0x111   :  { %3974 = vmatmul.mubr.msk.f32.vlgmr.msra.gmra.mrb[16].mxu1 %vm613_vm0, %v4942_v2  ;;  %720 = vmatprep.mubr.f32.mxu0 %v7731_v7 }
 0x112   :  { %857 = vmatprep.mubr.f32.mxu1 %v7731_v7 }
 0x114   :  { %3963 = vmatmul.mubr.msk.f32.gmra.mrb[18].mxu0 %vm613_vm0, %v4952_v3 }
 0x115   :  { %3975 = vmatmul.mubr.msk.f32.gmra.mrb[18].mxu1 %vm613_vm0, %v4952_v3  ;;  %726 = vmatprep.mubr.f32.mxu0 %v7731_v7 }
 0x116   :  { %863 = vmatprep.mubr.f32.mxu1 %v7731_v7 }
 0x118   :  { %3964 = vmatmul.mubr.msk.f32.gmra.mrb[20].mxu0 %vm613_vm0, %v4963_v4 }
 0x119   :  { %3976 = vmatmul.mubr.msk.f32.gmra.mrb[20].mxu1 %vm613_vm0, %v4963_v4  ;;  %732 = vmatprep.mubr.f32.mxu0 %v7731_v7  ;;  %v437_v6 = vpop.f32.mrb[8].mxu0 }
 0x11a   :  { %869 = vmatprep.mubr.f32.mxu1 %v7731_v7  ;;  %v553_v8 = vmul.f32 0.2, %v437_v6  ;;  %v439_v10 = vpop.f32.mrb[9].mxu0  ;;  %v526_v46 = vpop.f32.mrb[8].mxu1 }
 0x11b   :  { %v554_v59 = vmul.f32 0.2, %v439_v10  ;;  %v555_v11 = vmul.f32 0.2, %v526_v46  ;;  %v528_v12 = vpop.f32.mrb[9].mxu1 }
 0x11c   :  { %3965 = vmatmul.mubr.msk.f32.gmra.mrb[22].mxu0 %vm613_vm0, %v4974_v5  ;;  %v556_v14 = vmul.f32 0.2, %v528_v12  ;;  %v585_v17 = vmax.f32 %v437_v6, %v553_v8  ;;  %v173_v8 = vld [vmem:[%s7726_s2 + $0x40] sm:$0xff] }
 0x11d   :  { %3977 = vmatmul.mubr.msk.f32.gmra.mrb[22].mxu1 %vm613_vm0, %v4974_v5  ;;  %738 = vmatprep.mubr.f32.mxu0 %v7731_v7  ;;  %v443_v16 = vpop.f32.mrb[10].mxu0  ;;  %v586_v20 = vmax.f32 %v439_v10, %v554_v59  ;;  %v587_v22 = vmax.f32 %v526_v46, %v555_v11  ;;  %v174_v10 = vld [vmem:[%s7726_s2 + $0x48] sm:$0xff]  ;;  %v175_v46 = vld [vmem:[%s7726_s2 + $0x50] sm:$0xff]  ;;  %v176_v59 = vld [vmem:[%s7726_s2 + $0x58] sm:$0xff]  ;;  %s4461_s2 = smov 1  }
 0x11e   :  { %875 = vmatprep.mubr.f32.mxu1 %v7731_v7  ;;  %v561_v18 = vmul.f32 0.2, %v443_v16  ;;  %v445_v9 = vpop.f32.mrb[11].mxu0  ;;  %v532_v19 = vpop.f32.mrb[10].mxu1  ;;  %v588_v25 = vmax.f32 %v528_v12, %v556_v14 }
 0x11f   :  { %v562_v21 = vmul.f32 0.2, %v445_v9  ;;  %v563_v23 = vmul.f32 0.2, %v532_v19  ;;  %v534_v13 = vpop.f32.mrb[11].mxu1 }
 0x120   :  { %3966 = vmatmul.mubr.msk.f32.gmra.mrb[24].mxu0 %vm613_vm0, %v4985_v15  ;;  %v593_v24 = vmax.f32 %v443_v16, %v561_v18  ;;  %v564_v26 = vmul.f32 0.2, %v534_v13 }
 0x121   :  { %3978 = vmatmul.mubr.msk.f32.gmra.mrb[24].mxu1 %vm613_vm0, %v4985_v15  ;;  %744 = vmatprep.mubr.f32.mxu0 %v7731_v7  ;;  %v594_v28 = vmax.f32 %v445_v9, %v562_v21  ;;  %v449_v29 = vpop.f32.mrb[12].mxu0  ;;  %v595_v30 = vmax.f32 %v532_v19, %v563_v23 }
 0x122   :  { %881 = vmatprep.mubr.f32.mxu1 %v7731_v7  ;;  %v4220_v31 = vpack.c.bf16 %v593_v24, %v585_v17  ;;  %v569_v32 = vmul.f32 0.2, %v449_v29  ;;  %v451_v33 = vpop.f32.mrb[13].mxu0  ;;  %v596_v34 = vmax.f32 %v534_v13, %v564_v26  ;;  %v538_v35 = vpop.f32.mrb[12].mxu1 }
 0x123   :  { %v4218_v36 = vpack.c.bf16 %v594_v28, %v586_v20  ;;  %v570_v37 = vmul.f32 0.2, %v451_v33  ;;  %v4228_v38 = vpack.c.bf16 %v595_v30, %v587_v22  ;;  %v571_v39 = vmul.f32 0.2, %v538_v35  ;;  %v540_v40 = vpop.f32.mrb[13].mxu1 }
 0x124   :  { %3967 = vmatmul.mubr.msk.f32.gmra.mrb[26].mxu0 %vm613_vm0, %v4996_v27  ;;  %v4226_v41 = vpack.c.bf16 %v596_v34, %v588_v25  ;;  %v572_v42 = vmul.f32 0.2, %v540_v40  ;;  %v601_v45 = vmax.f32 %v449_v29, %v569_v32 }
 0x125   :  { %3979 = vmatmul.mubr.msk.f32.gmra.mrb[26].mxu1 %vm613_vm0, %v4996_v27  ;;  %750 = vmatprep.mubr.f32.mxu0 %v7731_v7  ;;  %v455_v44 = vpop.f32.mrb[14].mxu0  ;;  %v602_v50 = vmax.f32 %v451_v33, %v570_v37  ;;  %v603_v52 = vmax.f32 %v538_v35, %v571_v39 }
 0x126   :  { %887 = vmatprep.mubr.f32.mxu1 %v7731_v7  ;;  %v577_v47 = vmul.f32 0.2, %v455_v44  ;;  %4219 = vmatprep.subr.bf16.mxu0 %v4218_v36  ;;  %v457_v48 = vpop.f32.mrb[15].mxu0  ;;  %v544_v49 = vpop.f32.mrb[14].mxu1  ;;  %v604_v56 = vmax.f32 %v540_v40, %v572_v42 }
 0x127   :  { %v578_v51 = vmul.f32 0.2, %v457_v48  ;;  %4221 = vmatpush1.bf16.msra.mxu0 %v4220_v31  ;;  %v579_v53 = vmul.f32 0.2, %v544_v49  ;;  %4227 = vmatprep.subr.bf16.mxu1 %v4226_v41  ;;  %v546_v54 = vpop.f32.mrb[15].mxu1 }
 0x128   :  { %3968 = vmatmul.mubr.msk.f32.gmra.mrb[28].mxu0 %vm613_vm0, %v5007_v43  ;;  %v609_v55 = vmax.f32 %v455_v44, %v577_v47  ;;  %v580_v57 = vmul.f32 0.2, %v546_v54  ;;  %4229 = vmatpush1.bf16.msra.mxu1 %v4228_v38 }
 0x129   :  { %3980 = vmatmul.mubr.msk.f32.gmra.mrb[28].mxu1 %vm613_vm0, %v5007_v43  ;;  %756 = vmatprep.mubr.f32.mxu0 %v7731_v7  ;;  %v610_v60 = vmax.f32 %v457_v48, %v578_v51  ;;  %v611_v61 = vmax.f32 %v544_v49, %v579_v53 }
 0x12a   :  { %893 = vmatprep.mubr.f32.mxu1 %v7731_v7  ;;  %v4224_v62 = vpack.c.bf16 %v609_v55, %v601_v45  ;;  %v612_v63 = vmax.f32 %v546_v54, %v580_v57 }
 0x12b   :  { %v4222_v0 = vpack.c.bf16 %v610_v60, %v602_v50  ;;  %v4232_v1 = vpack.c.bf16 %v611_v61, %v603_v52 }
 0x12c   :  { %3969 = vmatmul.mubr.msk.f32.gmra.mrb[30].mxu0 %vm613_vm0, %v5018_v58  ;;  %v4230_v6 = vpack.c.bf16 %v612_v63, %v604_v56 }
 0x12d   :  { %3981 = vmatmul.mubr.msk.f32.gmra.mrb[30].mxu1 %vm613_vm0, %v5018_v58  ;;  %762 = vmatprep.mubr.f32.mxu0 %v7731_v7 }
 0x12e   :  { %899 = vmatprep.mubr.f32.mxu1 %v7731_v7  ;;  %4223 = vmatprep.subr.bf16.mxu0 %v4222_v0 }
 0x12f   :  { %4225 = vmatpush1.bf16.msra.mxu0 %v4224_v62  ;;  %4231 = vmatprep.subr.bf16.mxu1 %v4230_v6 }
 0x130   :  { %3970 = vmatmul.mubr.msk.f32.gmra.mrb[32].mxu0 %vm613_vm0, %v173_v8  ;;  %4233 = vmatpush1.bf16.msra.mxu1 %v4232_v1 }
 0x131   :  { %3982 = vmatmul.mubr.msk.f32.gmra.mrb[32].mxu1 %vm613_vm0, %v173_v8  ;;  %768 = vmatprep.mubr.f32.mxu0 %v7731_v7 }
 0x132   :  { %905 = vmatprep.mubr.f32.mxu1 %v7731_v7 }
 0x134   :  { %3971 = vmatmul.mubr.msk.f32.gmra.mrb[34].mxu0 %vm613_vm0, %v174_v10 }
 0x135   :  { %3983 = vmatmul.mubr.msk.f32.gmra.mrb[34].mxu1 %vm613_vm0, %v174_v10  ;;  %774 = vmatprep.mubr.f32.mxu0 %v7731_v7 }
 0x136   :  { %911 = vmatprep.mubr.f32.mxu1 %v7731_v7 }
 0x138   :  { %3972 = vmatmul.mubr.msk.f32.gmra.mrb[36].mxu0 %vm613_vm0, %v175_v46 }
 0x139   :  { %780 = vmatprep.mubr.f32.mxu0 %v7731_v7  ;;  %3984 = vmatmul.mubr.msk.f32.gmra.mrb[36].mxu1 %vm613_vm0, %v175_v46 }
 0x13a   :  { %917 = vmatprep.mubr.f32.mxu1 %v7731_v7 }
 0x13c   :  { %3973 = vmatmul.mubr.msk.f32.gmra.mrb[38].mxu0 %vm613_vm0, %v176_v59 }
 0x13d   :  { %988 = vmatprep.mubr.f32.mxu0 %v7731_v7  ;;  %3985 = vmatmul.mubr.msk.f32.gmra.mrb[38].mxu1 %vm613_vm0, %v176_v59 }
 0x13e   :  { %1125 = vmatprep.mubr.f32.mxu1 %v7731_v7 }
 0x140   :  { %3986 = vmatmul.mubr.msk.f32.vlgmr.msra.gmra.mrb[40].mxu0 %vm613_vm0, %v4942_v2 }
 0x141   :  { %994 = vmatprep.mubr.f32.mxu0 %v7731_v7  ;;  %3998 = vmatmul.mubr.msk.f32.vlgmr.msra.gmra.mrb[40].mxu1 %vm613_vm0, %v4942_v2  ;;  %v4460_v2 = vmov 0  }
 0x142   :  { %1131 = vmatprep.mubr.f32.mxu1 %v7731_v7  ;;  %4273 = vset.pattern.permute.xlu1 %v4460_v2 }
 0x143   :  { %4274 = vset.pattern.permute.xlu0 %v4460_v2 }
 0x144   :  { %3987 = vmatmul.mubr.msk.f32.gmra.mrb[42].mxu0 %vm613_vm0, %v4952_v3 }
 0x145   :  { %1000 = vmatprep.mubr.f32.mxu0 %v7731_v7  ;;  %3999 = vmatmul.mubr.msk.f32.gmra.mrb[42].mxu1 %vm613_vm0, %v4952_v3 }
 0x146   :  { %1137 = vmatprep.mubr.f32.mxu1 %v7731_v7 }
 0x148   :  { %3988 = vmatmul.mubr.msk.f32.gmra.mrb[44].mxu0 %vm613_vm0, %v4963_v4 }
 0x149   :  { %1006 = vmatprep.mubr.f32.mxu0 %v7731_v7  ;;  %4000 = vmatmul.mubr.msk.f32.gmra.mrb[44].mxu1 %vm613_vm0, %v4963_v4 }
 0x14a   :  { %1143 = vmatprep.mubr.f32.mxu1 %v7731_v7 }
 0x14c   :  { %3989 = vmatmul.mubr.msk.f32.gmra.mrb[46].mxu0 %vm613_vm0, %v4974_v5 }
 0x14d   :  { %1012 = vmatprep.mubr.f32.mxu0 %v7731_v7  ;;  %4001 = vmatmul.mubr.msk.f32.gmra.mrb[46].mxu1 %vm613_vm0, %v4974_v5 }
 0x14e   :  { %1149 = vmatprep.mubr.f32.mxu1 %v7731_v7 }
 0x150   :  { %3990 = vmatmul.mubr.msk.f32.gmra.mrb[48].mxu0 %vm613_vm0, %v4985_v15 }
 0x151   :  { %1018 = vmatprep.mubr.f32.mxu0 %v7731_v7  ;;  %4002 = vmatmul.mubr.msk.f32.gmra.mrb[48].mxu1 %vm613_vm0, %v4985_v15 }
 0x152   :  { %1155 = vmatprep.mubr.f32.mxu1 %v7731_v7 }
 0x154   :  { %3991 = vmatmul.mubr.msk.f32.gmra.mrb[50].mxu0 %vm613_vm0, %v4996_v27 }
 0x155   :  { %1024 = vmatprep.mubr.f32.mxu0 %v7731_v7  ;;  %4003 = vmatmul.mubr.msk.f32.gmra.mrb[50].mxu1 %vm613_vm0, %v4996_v27 }
 0x156   :  { %1161 = vmatprep.mubr.f32.mxu1 %v7731_v7 }
 0x158   :  { %3992 = vmatmul.mubr.msk.f32.gmra.mrb[52].mxu0 %vm613_vm0, %v5007_v43 }
 0x159   :  { %1030 = vmatprep.mubr.f32.mxu0 %v7731_v7  ;;  %4004 = vmatmul.mubr.msk.f32.gmra.mrb[52].mxu1 %vm613_vm0, %v5007_v43 }
 0x15a   :  { %1167 = vmatprep.mubr.f32.mxu1 %v7731_v7 }
 0x15c   :  { %3993 = vmatmul.mubr.msk.f32.gmra.mrb[54].mxu0 %vm613_vm0, %v5018_v58 }
 0x15d   :  { %1036 = vmatprep.mubr.f32.mxu0 %v7731_v7  ;;  %4005 = vmatmul.mubr.msk.f32.gmra.mrb[54].mxu1 %vm613_vm0, %v5018_v58 }
 0x15e   :  { %1173 = vmatprep.mubr.f32.mxu1 %v7731_v7 }
 0x160   :  { %3994 = vmatmul.mubr.msk.f32.gmra.mrb[56].mxu0 %vm613_vm0, %v173_v8 }
 0x161   :  { %1042 = vmatprep.mubr.f32.mxu0 %v7731_v7  ;;  %4006 = vmatmul.mubr.msk.f32.gmra.mrb[56].mxu1 %vm613_vm0, %v173_v8 }
 0x162   :  { %1179 = vmatprep.mubr.f32.mxu1 %v7731_v7 }
 0x164   :  { %3995 = vmatmul.mubr.msk.f32.gmra.mrb[58].mxu0 %vm613_vm0, %v174_v10 }
 0x165   :  { %1048 = vmatprep.mubr.f32.mxu0 %v7731_v7  ;;  %4007 = vmatmul.mubr.msk.f32.gmra.mrb[58].mxu1 %vm613_vm0, %v174_v10 }
 0x166   :  { %1185 = vmatprep.mubr.f32.mxu1 %v7731_v7 }
 0x168   :  { %3996 = vmatmul.mubr.msk.f32.gmra.mrb[60].mxu0 %vm613_vm0, %v175_v46 }
 0x169   :  { %1054 = vmatprep.mubr.f32.mxu0 %v7731_v7  ;;  %4008 = vmatmul.mubr.msk.f32.gmra.mrb[60].mxu1 %vm613_vm0, %v175_v46 }
 0x16a   :  { %1191 = vmatprep.mubr.f32.mxu1 %v7731_v7 }
 0x16c   :  { %3997 = vmatmul.mubr.msk.f32.gmra.mrb[62].mxu0 %vm613_vm0, %v176_v59 }
 0x16d   :  { %4009 = vmatmul.mubr.msk.f32.gmra.mrb[62].mxu1 %vm613_vm0, %v176_v59  ;;  %1710 = vmatprep.mubr.f32.mxu0 %v7731_v7 }
 0x16e   :  { %1871 = vmatprep.mubr.f32.mxu1 %v7731_v7 }
 0x1e3   :  { %v716_v3 = vpop.f32.mrb[16].mxu0 }
 0x1e4   :  { %1199 = vrot.lane.b32.xlu0 %v716_v3, %s4461_s2  ;;  %v718_v4 = vpop.f32.mrb[17].mxu0  ;;  %v853_v5 = vpop.f32.mrb[16].mxu1 }
 0x1e5   :  { %1207 = vrot.lane.b32.xlu1 %v718_v4, %s4461_s2  ;;  %v855_v11 = vpop.f32.mrb[17].mxu1 }
 0x1e7   :  { %v722_v12 = vpop.f32.mrb[18].mxu0 }
 0x1e8   :  { %v859_v14 = vpop.f32.mrb[18].mxu1  ;;  %1215 = vrot.lane.b32.xlu0 %v853_v5, %s4461_s2  ;;  %v724_v15 = vpop.f32.mrb[19].mxu0 }
 0x1e9   :  { %1217 = vrot.lane.b32.xlu1 %v859_v14, %s4461_s2  ;;  %v861_v16 = vpop.f32.mrb[19].mxu1 }
 0x1eb   :  { %v728_v17 = vpop.f32.mrb[20].mxu0 }
 0x1ec   :  { %1223 = vrot.lane.b32.xlu0 %v855_v11, %s4461_s2  ;;  %v730_v18 = vpop.f32.mrb[21].mxu0  ;;  %v865_v9 = vpop.f32.mrb[20].mxu1 }
 0x1ed   :  { %1209 = vrot.lane.b32.xlu1 %v724_v15, %s4461_s2  ;;  %v867_v19 = vpop.f32.mrb[21].mxu1 }
 0x1ef   :  { %v734_v20 = vpop.f32.mrb[22].mxu0 }
 0x1f0   :  { %1201 = vrot.lane.b32.xlu0 %v722_v12, %s4461_s2  ;;  %v736_v21 = vpop.f32.mrb[23].mxu0  ;;  %v871_v22 = vpop.f32.mrb[22].mxu1 }
 0x1f1   :  { %1225 = vrot.lane.b32.xlu1 %v861_v16, %s4461_s2  ;;  %v873_v23 = vpop.f32.mrb[23].mxu1 }
 0x1f3   :  { %v5129_v13 = vpop.f32.mrb[24].mxu0 }
 0x1f4   :  { %1203 = vrot.lane.b32.xlu0 %v728_v17, %s4461_s2  ;;  %v5132_v24 = vpop.f32.mrb[25].mxu0  ;;  %v5134_v25 = vpop.f32.mrb[24].mxu1 }
 0x1f5   :  { %1205 = vrot.lane.b32.xlu1 %v734_v20, %s4461_s2  ;;  %v5137_v26 = vpop.f32.mrb[25].mxu1 }
 0x1f7   :  { %v5139_v27 = vpop.f32.mrb[26].mxu0 }
 0x1f8   :  { %1219 = vrot.lane.b32.xlu0 %v865_v9, %s4461_s2  ;;  %v5142_v28 = vpop.f32.mrb[27].mxu0  ;;  %v5144_v29 = vpop.f32.mrb[26].mxu1 }
 0x1f9   :  { %1221 = vrot.lane.b32.xlu1 %v871_v22, %s4461_s2  ;;  %v5147_v30 = vpop.f32.mrb[27].mxu1 }
 0x1fb   :  { %v5149_v31 = vpop.f32.mrb[28].mxu0 }
 0x1fc   :  { %1211 = vrot.lane.b32.xlu0 %v730_v18, %s4461_s2  ;;  %v5152_v32 = vpop.f32.mrb[29].mxu0  ;;  %v5154_v33 = vpop.f32.mrb[28].mxu1 }
 0x1fd   :  { %1213 = vrot.lane.b32.xlu1 %v736_v21, %s4461_s2  ;;  %v5157_v34 = vpop.f32.mrb[29].mxu1 }
 0x1ff   :  { %v5159_v35 = vpop.f32.mrb[30].mxu0 }
 0x200   :  { %1227 = vrot.lane.b32.xlu0 %v867_v19, %s4461_s2  ;;  %v5162_v36 = vpop.f32.mrb[31].mxu0  ;;  %v5164_v37 = vpop.f32.mrb[30].mxu1 }
 0x201   :  { %1229 = vrot.lane.b32.xlu1 %v873_v23, %s4461_s2  ;;  %v5167_v38 = vpop.f32.mrb[31].mxu1 }
 0x203   :  { %v764_v39 = vpop.f32.mrb[32].mxu0 }
 0x204   :  { %v901_v40 = vpop.f32.mrb[32].mxu1  ;;  %v766_v41 = vpop.f32.mrb[33].mxu0 }
 0x205   :  { %1351 = vrot.lane.b32.xlu0 %v901_v40, %s4462_s17  ;;  %v903_v42 = vpop.f32.mrb[33].mxu1 }
 0x207   :  { %v770_v43 = vpop.f32.mrb[34].mxu0 }
 0x208   :  { %v907_v44 = vpop.f32.mrb[34].mxu1  ;;  %v772_v45 = vpop.f32.mrb[35].mxu0 }
 0x209   :  { %1353 = vrot.lane.b32.xlu1 %v907_v44, %s4462_s17  ;;  %1335 = vrot.lane.b32.xlu0 %v764_v39, %s4462_s17  ;;  %v909_v47 = vpop.f32.mrb[35].mxu1 }
 0x20b   :  { %v776_v48 = vpop.f32.mrb[36].mxu0 }
 0x20c   :  { %v778_v49 = vpop.f32.mrb[37].mxu0  ;;  %v913_v50 = vpop.f32.mrb[36].mxu1 }
 0x20d   :  { %1343 = vrot.lane.b32.xlu0 %v766_v41, %s4462_s17  ;;  %1337 = vrot.lane.b32.xlu1 %v770_v43, %s4462_s17  ;;  %v915_v51 = vpop.f32.mrb[37].mxu1 }
 0x20f   :  { %v782_v52 = vpop.f32.mrb[38].mxu0 }
 0x210   :  { %v784_v53 = vpop.f32.mrb[39].mxu0  ;;  %v919_v54 = vpop.f32.mrb[38].mxu1 }
 0x211   :  { %1359 = vrot.lane.b32.xlu0 %v903_v42, %s4462_s17  ;;  %1345 = vrot.lane.b32.xlu1 %v772_v45, %s4462_s17  ;;  %v921_v55 = vpop.f32.mrb[39].mxu1 }
 0x213   :  { %v990_v56 = vpop.f32.mrb[40].mxu0 }
 0x214   :  { %v5176_v57 = vpop.f32.mrb[41].mxu0  ;;  %v5178_v58 = vpop.f32.mrb[40].mxu1 }
 0x215   :  { %1355 = vrot.lane.b32.xlu0 %v913_v50, %s4462_s17  ;;  %1361 = vrot.lane.b32.xlu1 %v909_v47, %s4462_s17  ;;  %v1129_v60 = vpop.f32.mrb[41].mxu1 }
 0x217   :  { %v996_v61 = vpop.f32.mrb[42].mxu0 }
 0x218   :  { %v998_v62 = vpop.f32.mrb[43].mxu0  ;;  %v5182_v63 = vpop.f32.mrb[42].mxu1 }
 0x219   :  { %1357 = vrot.lane.b32.xlu1 %v919_v54, %s4462_s17  ;;  %1339 = vrot.lane.b32.xlu0 %v776_v48, %s4462_s17  ;;  %v1135_v0 = vpop.f32.mrb[43].mxu1 }
 0x21b   :  { %v1002_v1 = vpop.f32.mrb[44].mxu0 }
 0x21c   :  { %v1004_v6 = vpop.f32.mrb[45].mxu0  ;;  %v5186_v8 = vpop.f32.mrb[44].mxu1 }
 0x21d   :  { %1347 = vrot.lane.b32.xlu0 %v778_v49, %s4462_s17  ;;  %1341 = vrot.lane.b32.xlu1 %v782_v52, %s4462_s17  ;;  %v1141_v10 = vpop.f32.mrb[45].mxu1 }
 0x21f   :  { %v1008_v46 = vpop.f32.mrb[46].mxu0 }
 0x220   :  { %v1010_v59 = vpop.f32.mrb[47].mxu0  ;;  %v5190_v3 = vpop.f32.mrb[46].mxu1 }
 0x221   :  { %1363 = vrot.lane.b32.xlu0 %v915_v51, %s4462_s17  ;;  %1349 = vrot.lane.b32.xlu1 %v784_v53, %s4462_s17  ;;  %v1147_v4 = vpop.f32.mrb[47].mxu1 }
 0x223   :  { %v5194_v5 = vpop.f32.mrb[48].mxu0 }
 0x224   :  { %v5196_v11 = vpop.f32.mrb[49].mxu0  ;;  %v5198_v12 = vpop.f32.mrb[48].mxu1 }
 0x225   :  { %1255 = vrot.lane.b32.xlu0 %v1129_v60, %s4461_s2  ;;  %1365 = vrot.lane.b32.xlu1 %v921_v55, %s4462_s17  ;;  %v5202_v14 = vpop.f32.mrb[49].mxu1 }
 0x226   :  { %7827 = vst [vmem:[#allocation5_spill] sm:$0xff] %v5202_v14 }
 0x227   :  { %v5204_v15 = vpop.f32.mrb[50].mxu0 }
 0x228   :  { %v5206_v16 = vpop.f32.mrb[51].mxu0  ;;  %v5208_v17 = vpop.f32.mrb[50].mxu1 }
 0x229   :  { %1259 = vrot.lane.b32.xlu0 %v1141_v10, %s4461_s2  ;;  %1257 = vrot.lane.b32.xlu1 %v1135_v0, %s4461_s2  ;;  %v5212_v18 = vpop.f32.mrb[51].mxu1 }
 0x22b   :  { %v5214_v9 = vpop.f32.mrb[52].mxu0 }
 0x22c   :  { %v5216_v19 = vpop.f32.mrb[53].mxu0  ;;  %v5218_v20 = vpop.f32.mrb[52].mxu1 }
 0x22d   :  { %7828 = vst [vmem:[#allocation6_spill] sm:$0xff] %v5218_v20  ;;  %1261 = vrot.lane.b32.xlu1 %v1147_v4, %s4461_s2  ;;  %v5221_v21 = vpop.f32.mrb[53].mxu1 }
 0x22e   :  { %7829 = vst [vmem:[#allocation7_spill] sm:$0xff] %v5221_v21 }
 0x22f   :  { %v5223_v22 = vpop.f32.mrb[54].mxu0 }
 0x230   :  { %7830 = vst [vmem:[#allocation8_spill] sm:$0xff] %v5223_v22  ;;  %v5225_v23 = vpop.f32.mrb[55].mxu0  ;;  %v5227_v39 = vpop.f32.mrb[54].mxu1 }
 0x231   :  { %7831 = vst [vmem:[#allocation9_spill] sm:$0xff] %v5225_v23  ;;  %7832 = vst [vmem:[#allocation10_spill] sm:$0xff] %v5227_v39  ;;  %v5229_v40 = vpop.f32.mrb[55].mxu1 }
 0x232   :  { %7833 = vst [vmem:[#allocation11_spill] sm:$0xff] %v5229_v40 }
 0x233   :  { %v1038_v41 = vpop.f32.mrb[56].mxu0 }
 0x234   :  { %1367 = vrot.lane.b32.xlu0 %v1038_v41, %s4462_s17  ;;  %v1040_v42 = vpop.f32.mrb[57].mxu0  ;;  %v1175_v43 = vpop.f32.mrb[56].mxu1 }
 0x235   :  { %v1177_v44 = vpop.f32.mrb[57].mxu1 }
 0x237   :  { %v1044_v45 = vpop.f32.mrb[58].mxu0 }
 0x238   :  { %1369 = vrot.lane.b32.xlu1 %v1044_v45, %s4462_s17  ;;  %v1046_v47 = vpop.f32.mrb[59].mxu0  ;;  %v1181_v48 = vpop.f32.mrb[58].mxu1 }
 0x239   :  { %v1183_v49 = vpop.f32.mrb[59].mxu1 }
 0x23b   :  { %v1050_v50 = vpop.f32.mrb[60].mxu0 }
 0x23c   :  { %1371 = vrot.lane.b32.xlu0 %v1050_v50, %s4462_s17  ;;  %v1052_v51 = vpop.f32.mrb[61].mxu0  ;;  %v1187_v52 = vpop.f32.mrb[60].mxu1 }
 0x23d   :  { %v1189_v53 = vpop.f32.mrb[61].mxu1 }
 0x23f   :  { %v1056_v54 = vpop.f32.mrb[62].mxu0 }
 0x240   :  { %1231 = vrot.lane.b32.xlu0 %v990_v56, %s4461_s2  ;;  %1373 = vrot.lane.b32.xlu1 %v1056_v54, %s4462_s17  ;;  %v1058_v55 = vpop.f32.mrb[63].mxu0  ;;  %v1193_v60 = vpop.f32.mrb[62].mxu1 }
 0x241   :  { %v1195_v0 = vpop.f32.mrb[63].mxu1 }
 0x244   :  { %1239 = vrot.lane.b32.xlu0 %v5176_v57, %s4461_s2  ;;  %1233 = vrot.lane.b32.xlu1 %v996_v61, %s4461_s2 }
 0x248   :  { %1375 = vrot.lane.b32.xlu0 %v1040_v42, %s4462_s17  ;;  %1241 = vrot.lane.b32.xlu1 %v998_v62, %s4461_s2 }
 0x24c   :  { %1383 = vrot.lane.b32.xlu0 %v1175_v43, %s4462_s17  ;;  %1377 = vrot.lane.b32.xlu1 %v1046_v47, %s4462_s17 }
 0x250   :  { %1235 = vrot.lane.b32.xlu0 %v1002_v1, %s4461_s2  ;;  %1385 = vrot.lane.b32.xlu1 %v1181_v48, %s4462_s17 }
 0x254   :  { %1243 = vrot.lane.b32.xlu0 %v1004_v6, %s4461_s2  ;;  %1237 = vrot.lane.b32.xlu1 %v1008_v46, %s4461_s2 }
 0x256   :  { %v5247_v56 = vpop.permute.xlu0 %1199 }
 0x257   :  { %v1208_v57 = vpop.permute.xlu1 %1207 }
 0x258   :  { %1247 = vrot.lane.b32.xlu0 %v5178_v58, %s4461_s2  ;;  %1245 = vrot.lane.b32.xlu1 %v1010_v59, %s4461_s2 }
 0x25a   :  { %v5252_v61 = vpop.permute.xlu0 %1215 }
 0x25b   :  { %v5254_v62 = vpop.permute.xlu1 %1217 }
 0x25c   :  { %1379 = vrot.lane.b32.xlu0 %v1052_v51, %s4462_s17  ;;  %1249 = vrot.lane.b32.xlu1 %v5182_v63, %s4461_s2  ;;  %v24_v63 = vlaneseq }
 0x25e   :  { %v5259_v1 = vpop.permute.xlu0 %1223  ;;  %v5281_v42 = vand.u32 127, %v24_v63 }
 0x25f   :  { %v1210_v6 = vpop.permute.xlu1 %1209 }
 0x260   :  { %1387 = vrot.lane.b32.xlu0 %v1187_v52, %s4462_s17  ;;  %1393 = vrot.lane.b32.xlu1 %v1183_v49, %s4462_s17  ;;  %vm1198_vm1 = vcmp.eq.s32.totalorder %v5281_v42, 0  ;;  %vm1334_vm2 = vcmp.eq.s32.totalorder %v5281_v42, 127  ;;  %vm1263_vm3 = vcmp.lt.s32.totalorder %v5281_v42, 1  ;;  %vm1399_vm5 = vcmp.lt.s32.totalorder %v5281_v42, 127 }
 0x261   :  { %v1296_v47 = vsel %vm1198_vm1, 1, %v4460_v2  ;;  %v1432_v51 = vsel %vm1334_vm2, 1, %v4460_v2  ;;  %v1288_v52 = vsel %vm1263_vm3, %v5247_v56, %v1208_v57  ;;  %v1284_v2 = vsel %vm1263_vm3, %v1208_v57, %v5252_v61 }
 0x262   :  { %v5263_v10 = vpop.permute.xlu0 %1201  ;;  %v1285_v7 = vsel %vm1263_vm3, %v1210_v6, %v5254_v62 }
 0x263   :  { %v5265_v58 = vpop.permute.xlu1 %1225 }
 0x264   :  { %1391 = vrot.lane.b32.xlu0 %v1177_v44, %s4462_s17  ;;  %1253 = vrot.lane.b32.xlu1 %v5190_v3, %s4461_s2  ;;  %v1298_v3 = vshrl.u32 %v24_v63, 7 }
 0x266   :  { %v5270_v46 = vpop.permute.xlu0 %1203  ;;  %v1299_v44 = vsub.s32 0, %v1298_v3 }
 0x267   :  { %v5272_v59 = vpop.permute.xlu1 %1205 }
 0x268   :  { %1251 = vrot.lane.b32.xlu0 %v5186_v8, %s4461_s2  ;;  %1389 = vrot.lane.b32.xlu1 %v1193_v60, %s4462_s17  ;;  %v5295_v48 = vrot.slane %v1296_v47, %v1299_v44 }
 0x26a   :  { %v5277_v4 = vpop.permute.xlu0 %1219  ;;  %vm1301_vm4 = vcmp.eq.s32.totalorder %v5295_v48, 1 }
 0x26b   :  { %v5279_v41 = vpop.permute.xlu1 %1221  ;;  %v1303_v60 = vsel %vm1301_vm4, 0.0, %v1288_v52 }
 0x26c   :  { %1395 = vrot.lane.b32.xlu0 %v1189_v53, %s4462_s17  ;;  %1381 = vrot.lane.b32.xlu1 %v1058_v55, %s4462_s17  ;;  %v5305_v53 = vrot.slane %v1432_v51, %v1299_v44  ;;  %v1471_v44 = vadd.f32 %v1303_v60, %v5132_v24  ;;  %v1304_v51 = vsel %vm1301_vm4, 0.0, %v1284_v2 }
 0x26d   :  { %v1472_v60 = vadd.f32 %v1304_v51, %v5134_v25 }
 0x26e   :  { %v5285_v43 = vpop.permute.xlu0 %1211  ;;  %vm1437_vm6 = vcmp.eq.s32.totalorder %v5305_v53, 1 }
 0x26f   :  { %v5289_v8 = vpop.permute.xlu1 %1213 }
 0x270   :  { %1397 = vrot.lane.b32.xlu1 %v1195_v0, %s4462_s17  ;;  %v1289_v0 = vsel %vm1263_vm3, %v5263_v10, %v1210_v6  ;;  %v1312_v6 = vsel %vm1301_vm4, 0.0, %v1285_v7 }
 0x271   :  { %v1311_v57 = vsel %vm1301_vm4, 0.0, %v1289_v0 }
 0x272   :  { %v5291_v45 = vpop.permute.xlu0 %1227  ;;  %v1479_v20 = vadd.f32 %v1311_v57, %v5142_v28 }
 0x273   :  { %v5298_v49 = vpop.permute.xlu1 %1229 }
 0x277   :  { %v1352_v50 = vpop.permute.xlu0 %1351 }
 0x27b   :  { %v1354_v54 = vpop.permute.xlu1 %1353  ;;  %v5307_v55 = vpop.permute.xlu0 %1335 }
 0x27f   :  { %v5319_v63 = vpop.permute.xlu0 %1343  ;;  %v5321_v3 = vpop.permute.xlu1 %1337 }
 0x280   :  { %v1420_v47 = vsel %vm1399_vm5, %v5319_v63, %v1352_v50 }
 0x281   :  { %v1439_v52 = vsel %vm1437_vm6, 0.0, %v1420_v47 }
 0x282   :  { %v1503_v40 = vadd.f32 %v1471_v44, %v1439_v52 }
 0x283   :  { %v5336_v39 = vpop.permute.xlu0 %1359  ;;  %v5338_v24 = vpop.permute.xlu1 %1345 }
 0x284   :  { %v1416_v2 = vsel %vm1399_vm5, %v1352_v50, %v5336_v39  ;;  %v1421_v0 = vsel %vm1399_vm5, %v5338_v24, %v1354_v54  ;;  %v1535_v25 = vmul.f32 0.2, %v1503_v40  ;;  %v1480_v50 = vadd.f32 %v1312_v6, %v5144_v29 }
 0x285   :  { %v1440_v44 = vsel %vm1437_vm6, 0.0, %v1416_v2  ;;  %v1447_v47 = vsel %vm1437_vm6, 0.0, %v1421_v0 }
 0x286   :  { %v1504_v51 = vadd.f32 %v1472_v60, %v1440_v44  ;;  %v1511_v28 = vadd.f32 %v1479_v20, %v1447_v47  ;;  %v1567_v14 = vmax.f32 %v1503_v40, %v1535_v25  ;;  %v1290_v20 = vsel %vm1263_vm3, %v5270_v46, %v5285_v43 }
 0x287   :  { %v1356_v57 = vpop.permute.xlu0 %1355  ;;  %v5354_v52 = vpop.permute.xlu1 %1361  ;;  %v1286_v47 = vsel %vm1263_vm3, %v5285_v43, %v5277_v4  ;;  %v1287_v43 = vsel %vm1263_vm3, %v5289_v8, %v5279_v41 }
 0x288   :  { %v1543_v21 = vmul.f32 0.2, %v1511_v28  ;;  %v1417_v23 = vsel %vm1399_vm5, %v1354_v54, %v5354_v52  ;;  %v1536_v2 = vmul.f32 0.2, %v1504_v51  ;;  %v1319_v54 = vsel %vm1301_vm4, 0.0, %v1290_v20 }
 0x289   :  { %v1448_v7 = vsel %vm1437_vm6, 0.0, %v1417_v23  ;;  %v1291_v23 = vsel %vm1263_vm3, %v5272_v59, %v5289_v8 }
 0x28a   :  { %v1512_v22 = vadd.f32 %v1480_v50, %v1448_v7  ;;  %v1575_v0 = vmax.f32 %v1511_v28, %v1543_v21  ;;  %v1568_v40 = vmax.f32 %v1504_v51, %v1536_v2  ;;  %v1487_v7 = vadd.f32 %v1319_v54, %v5152_v32 }
 0x28b   :  { %v1358_v60 = vpop.permute.xlu1 %1357  ;;  %v5366_v44 = vpop.permute.xlu0 %1339  ;;  %v1327_v51 = vsel %vm1301_vm4, 0.0, %v1291_v23  ;;  %v1320_v2 = vsel %vm1301_vm4, 0.0, %v1286_v47 }
 0x28c   :  { %v1544_v29 = vmul.f32 0.2, %v1512_v22  ;;  %v4234_v6 = vpack.c.bf16 %v1575_v0, %v1567_v14  ;;  %v1495_v32 = vadd.f32 %v1327_v51, %v5162_v36  ;;  %v1488_v23 = vadd.f32 %v1320_v2, %v5154_v33 }
 0x28d   :  { %v1424_v36 = vsel %vm1399_vm5, %v5307_v55, %v5319_v63 }
 0x28e   :  { %v1576_v21 = vmax.f32 %v1512_v22, %v1544_v29  ;;  %4235 = vmatprep.subr.bf16.mxu0 %v4234_v6 }
 0x28f   :  { %v1348_v25 = vpop.permute.xlu0 %1347  ;;  %v5378_v28 = vpop.permute.xlu1 %1341 }
 0x290   :  { %v1422_v14 = vsel %vm1399_vm5, %v1348_v25, %v1356_v57  ;;  %v5382_v50 = vpack.c.bf16 %v1576_v21, %v1568_v40  ;;  %v1328_v40 = vsel %vm1301_vm4, 0.0, %v1287_v43 }
 0x291   :  { %v1455_v22 = vsel %vm1437_vm6, 0.0, %v1422_v14  ;;  %v1496_v51 = vadd.f32 %v1328_v40, %v5164_v37 }
 0x292   :  { %v1519_v0 = vadd.f32 %v1487_v7, %v1455_v22 }
 0x293   :  { %v5395_v20 = vpop.permute.xlu0 %1363  ;;  %v1350_v29 = vpop.permute.xlu1 %1349 }
 0x294   :  { %v1418_v6 = vsel %vm1399_vm5, %v1356_v57, %v5395_v20  ;;  %v1423_v54 = vsel %vm1399_vm5, %v1350_v29, %v1358_v60  ;;  %v1551_v57 = vmul.f32 0.2, %v1519_v0 }
 0x295   :  { %v1456_v8 = vsel %vm1437_vm6, 0.0, %v1418_v6  ;;  %v1463_v21 = vsel %vm1437_vm6, 0.0, %v1423_v54  ;;  %v1438_v6 = vsel %vm1437_vm6, 0.0, %v1424_v36 }
 0x296   :  { %v1527_v47 = vadd.f32 %v1495_v32, %v1463_v21  ;;  %v1520_v14 = vadd.f32 %v1488_v23, %v1456_v8  ;;  %v1583_v40 = vmax.f32 %v1519_v0, %v1551_v57  ;;  %v1280_v57 = vsel %vm1263_vm3, %v5252_v61, %v5259_v1 }
 0x297   :  { %v5414_v7 = vpop.permute.xlu0 %1255  ;;  %v5416_v33 = vpop.permute.xlu1 %1365 }
 0x298   :  { %v1559_v22 = vmul.f32 0.2, %v1527_v47  ;;  %v1292_v2 = vsel %vm1263_vm3, %v5414_v7, %v5247_v56  ;;  %v1419_v43 = vsel %vm1399_vm5, %v1358_v60, %v5416_v33  ;;  %v1425_v56 = vsel %vm1399_vm5, %v5321_v3, %v5338_v24 }
 0x299   :  { %v1302_v63 = vsel %vm1301_vm4, 0.0, %v1292_v2  ;;  %v1464_v32 = vsel %vm1437_vm6, 0.0, %v1419_v43  ;;  %v1426_v60 = vsel %vm1399_vm5, %v5366_v44, %v1348_v25  ;;  %v1552_v8 = vmul.f32 0.2, %v1520_v14 }
 0x29a   :  { %v1470_v37 = vadd.f32 %v1302_v63, %v5129_v13  ;;  %v1528_v54 = vadd.f32 %v1496_v51, %v1464_v32  ;;  %v1591_v23 = vmax.f32 %v1527_v47, %v1559_v22  ;;  %v1454_v63 = vsel %vm1437_vm6, 0.0, %v1426_v60 }
 0x29b   :  { %v5440_v21 = vpop.permute.xlu0 %1259  ;;  %v5442_v2 = vpop.permute.xlu1 %1257  ;;  %v1584_v32 = vmax.f32 %v1520_v14, %v1552_v8 }
 0x29c   :  { %v1502_v36 = vadd.f32 %v1470_v37, %v1438_v6  ;;  %v1560_v43 = vmul.f32 0.2, %v1528_v54  ;;  %v1294_v13 = vsel %vm1263_vm3, %v5440_v21, %v5270_v46  ;;  %v1293_v24 = vsel %vm1263_vm3, %v5442_v2, %v5263_v10 }
 0x29d   :  { %v1318_v25 = vsel %vm1301_vm4, 0.0, %v1294_v13  ;;  %v1310_v0 = vsel %vm1301_vm4, 0.0, %v1293_v24  ;;  %v4238_v47 = vpack.c.bf16 %v1591_v23, %v1583_v40  ;;  %v1446_v10 = vsel %vm1437_vm6, 0.0, %v1425_v56 }
 0x29e   :  { %v1592_v51 = vmax.f32 %v1528_v54, %v1560_v43  ;;  %v1486_v46 = vadd.f32 %v1318_v25, %v5149_v31  ;;  %v1478_v22 = vadd.f32 %v1310_v0, %v5139_v27  ;;  %v1427_v6 = vsel %vm1399_vm5, %v5378_v28, %v1350_v29 }
 0x29f   :  { %v5469_v37 = vpop.permute.xlu1 %1261  ;;  %v1534_v23 = vmul.f32 0.2, %v1502_v36  ;;  %v1305_v29 = vsel %vm1301_vm4, 0.0, %v1280_v57  ;;  %v1462_v40 = vsel %vm1437_vm6, 0.0, %v1427_v6 }
 0x2a0   :  { %v1518_v61 = vadd.f32 %v1486_v46, %v1454_v63  ;;  %v1510_v54 = vadd.f32 %v1478_v22, %v1446_v10  ;;  %v1295_v27 = vsel %vm1263_vm3, %v5469_v37, %v5272_v59  ;;  %v5477_v56 = vpack.c.bf16 %v1592_v51, %v1584_v32 }
 0x2a1   :  { %v1326_v31 = vsel %vm1301_vm4, 0.0, %v1295_v27  ;;  %v1566_v8 = vmax.f32 %v1502_v36, %v1534_v23  ;;  %v1281_v59 = vsel %vm1263_vm3, %v5254_v62, %v5265_v58  ;;  %v1282_v10 = vsel %vm1263_vm3, %v5277_v4, %v5291_v45  ;;  %v5517_v4 = vld [vmem:[%s7727_s3] sm:$0xff] }
 0x2a2   :  { %v1542_v14 = vmul.f32 0.2, %v1510_v54  ;;  %v1494_v60 = vadd.f32 %v1326_v31, %v5159_v35  ;;  %v1550_v43 = vmul.f32 0.2, %v1518_v61  ;;  %v1473_v35 = vadd.f32 %v1305_v29, %v5137_v26 }
 0x2a3   :  { %v1313_v36 = vsel %vm1301_vm4, 0.0, %v1281_v59  ;;  %v1321_v23 = vsel %vm1301_vm4, 0.0, %v1282_v10  ;;  %v7834_v29 = vmov 0.0  }
 0x2a4   :  { %v1526_v13 = vadd.f32 %v1494_v60, %v1462_v40  ;;  %v1574_v24 = vmax.f32 %v1510_v54, %v1542_v14  ;;  %v1582_v46 = vmax.f32 %v1518_v61, %v1550_v43  ;;  %v1489_v27 = vadd.f32 %v1321_v23, %v5157_v34  ;;  %v5540_v34 = vld [vmem:[%s7727_s3 + $0x8] sm:$0xff] }
 0x2a6   :  { %v1558_v25 = vmul.f32 0.2, %v1526_v13  ;;  %v5488_v0 = vpop.permute.xlu0 %1367  ;;  %v4236_v51 = vpack.c.bf16 %v1574_v24, %v1566_v8 }
 0x2a7   :  { %v1412_v57 = vsel %vm1399_vm5, %v5336_v39, %v5488_v0  ;;  %v1481_v39 = vadd.f32 %v1313_v36, %v5147_v30  ;;  %v1283_v30 = vsel %vm1263_vm3, %v5279_v41, %v5298_v49 }
 0x2a8   :  { %v1441_v22 = vsel %vm1437_vm6, 0.0, %v1412_v57  ;;  %4237 = vmatpush1.bf16.msra.mxu0 %v4236_v51  ;;  %v1590_v62 = vmax.f32 %v1526_v13, %v1558_v25  ;;  %v1329_v60 = vsel %vm1301_vm4, 0.0, %v1283_v30 }
 0x2a9   :  { %v1505_v26 = vadd.f32 %v1473_v35, %v1441_v22  ;;  %4239 = vmatprep.subr.bf16.mxu0 %v4238_v47  ;;  %v1497_v24 = vadd.f32 %v1329_v60, %v5167_v38  ;;  %v5557_v35 = vld [vmem:[%s7727_s3 + $0x10] sm:$0xff] }
 0x2aa   :  { %v5503_v63 = vpop.permute.xlu1 %1369  ;;  %v4240_v32 = vpack.c.bf16 %v1590_v62, %v1582_v46 }
 0x2ab   :  { %v1413_v6 = vsel %vm1399_vm5, %v5354_v52, %v5503_v63  ;;  %v1537_v47 = vmul.f32 0.2, %v1505_v26 }
 0x2ac   :  { %v1449_v61 = vsel %vm1437_vm6, 0.0, %v1413_v6  ;;  %4241 = vmatpush1.bf16.msra.mxu0 %v4240_v32 }
 0x2ad   :  { %v1513_v54 = vadd.f32 %v1481_v39, %v1449_v61  ;;  %v1569_v40 = vmax.f32 %v1505_v26, %v1537_v47 }
 0x2ae   :  { %v5523_v52 = vpop.permute.xlu0 %1371 }
 0x2af   :  { %v1545_v31 = vmul.f32 0.2, %v1513_v54  ;;  %v1414_v14 = vsel %vm1399_vm5, %v5395_v20, %v5523_v52  ;;  %4010 = vmatmul.mubr.msk.f32.vlgmr.msra.gmra.mrb[64].mxu0 %vm613_vm0, %v5517_v4 }
 0x2b0   :  { %v1457_v41 = vsel %vm1437_vm6, 0.0, %v1414_v14  ;;  %1716 = vmatprep.mubr.f32.mxu0 %v7834_v29 }
 0x2b1   :  { %v1577_v8 = vmax.f32 %v1513_v54, %v1545_v31  ;;  %v1521_v43 = vadd.f32 %v1489_v27, %v1457_v41 }
 0x2b2   :  { %v1232_v20 = vpop.permute.xlu0 %1231  ;;  %v5542_v13 = vpop.permute.xlu1 %1373 }
 0x2b3   :  { %v1415_v59 = vsel %vm1399_vm5, %v5416_v33, %v5542_v13  ;;  %4011 = vmatmul.mubr.msk.f32.gmra.mrb[66].mxu0 %vm613_vm0, %v5540_v34  ;;  %v4242_v25 = vpack.c.bf16 %v1577_v8, %v1569_v40  ;;  %v1553_v38 = vmul.f32 0.2, %v1521_v43  ;;  %v1276_v57 = vsel %vm1263_vm3, %v5259_v1, %v1232_v20  ;;  %v5573_v1 = vld [vmem:[%s7727_s3 + $0x18] sm:$0xff] }
 0x2b4   :  { %v1465_v51 = vsel %vm1437_vm6, 0.0, %v1415_v59  ;;  %1722 = vmatprep.mubr.f32.mxu0 %v7834_v29  ;;  %v1306_v62 = vsel %vm1301_vm4, 0.0, %v1276_v57 }
 0x2b5   :  { %v1529_v33 = vadd.f32 %v1497_v24, %v1465_v51  ;;  %4243 = vmatprep.subr.bf16.mxu1 %v4242_v25  ;;  %v1585_v10 = vmax.f32 %v1521_v43, %v1553_v38  ;;  %v1474_v23 = vadd.f32 %v1306_v62, %v5194_v5  ;;  %v5599_v5 = vld [vmem:[%s7727_s3 + $0x20] sm:$0xff] }
 0x2b6   :  { %v5562_v36 = vpop.permute.xlu0 %1239  ;;  %v1234_v46 = vpop.permute.xlu1 %1233  ;;  %4245 = vmatpush1.bf16.msra.mxu1 %v5382_v50 }
 0x2b7   :  { %v1561_v22 = vmul.f32 0.2, %v1529_v33  ;;  %4012 = vmatmul.mubr.msk.f32.gmra.mrb[68].mxu0 %vm613_vm0, %v5557_v35  ;;  %v1272_v50 = vsel %vm1263_vm3, %v1232_v20, %v5562_v36  ;;  %v1277_v32 = vsel %vm1263_vm3, %v5265_v58, %v1234_v46 }
 0x2b8   :  { %1728 = vmatprep.mubr.f32.mxu0 %v7834_v29  ;;  %v1307_v47 = vsel %vm1301_vm4, 0.0, %v1272_v50  ;;  %v1314_v54 = vsel %vm1301_vm4, 0.0, %v1277_v32 }
 0x2b9   :  { %v1593_v26 = vmax.f32 %v1529_v33, %v1561_v22  ;;  %v1475_v60 = vadd.f32 %v1307_v47, %v5196_v11  ;;  %v1482_v41 = vadd.f32 %v1314_v54, %v5204_v15  ;;  %v5627_v15 = vld [vmem:[%s7727_s3 + $0x28] sm:$0xff] }
 0x2ba   :  { %v1376_v39 = vpop.permute.xlu0 %1375  ;;  %v5581_v6 = vpop.permute.xlu1 %1241 }
 0x2bb   :  { %v1408_v61 = vsel %vm1399_vm5, %v5488_v0, %v1376_v39  ;;  %4013 = vmatmul.mubr.msk.f32.gmra.mrb[70].mxu0 %vm613_vm0, %v5573_v1  ;;  %v4246_v30 = vpack.c.bf16 %v1593_v26, %v1585_v10  ;;  %v1273_v27 = vsel %vm1263_vm3, %v1234_v46, %v5581_v6  ;;  %v5646_v46 = vld [vmem:[%s7727_s3 + $0x30] sm:$0xff] }
 0x2bc   :  { %v1442_v58 = vsel %vm1437_vm6, 0.0, %v1408_v61  ;;  %1734 = vmatprep.mubr.f32.mxu0 %v7834_v29  ;;  %v1315_v43 = vsel %vm1301_vm4, 0.0, %v1273_v27 }
 0x2bd   :  { %v1506_v0 = vadd.f32 %v1474_v23, %v1442_v58  ;;  %4247 = vmatprep.subr.bf16.mxu1 %v4246_v30  ;;  %v1483_v51 = vadd.f32 %v1315_v43, %v5206_v16  ;;  %v5659_v23 = vld [vmem:[%s7727_s3 + $0x38] sm:$0xff] }
 0x2be   :  { %v5604_v31 = vpop.permute.xlu0 %1383  ;;  %v1378_v14 = vpop.permute.xlu1 %1377  ;;  %4249 = vmatpush1.bf16.msra.mxu1 %v5477_v56 }
 0x2bf   :  { %v1404_v40 = vsel %vm1399_vm5, %v1376_v39, %v5604_v31  ;;  %v1409_v8 = vsel %vm1399_vm5, %v5503_v63, %v1378_v14  ;;  %4014 = vmatmul.mubr.msk.f32.gmra.mrb[72].mxu0 %vm613_vm0, %v5599_v5  ;;  %v1538_v63 = vmul.f32 0.2, %v1506_v0 }
 0x2c0   :  { %v1443_v56 = vsel %vm1437_vm6, 0.0, %v1404_v40  ;;  %v1450_v11 = vsel %vm1437_vm6, 0.0, %v1409_v8  ;;  %1740 = vmatprep.mubr.f32.mxu0 %v7834_v29 }
 0x2c1   :  { %v1507_v20 = vadd.f32 %v1475_v60, %v1443_v56  ;;  %v1514_v24 = vadd.f32 %v1482_v41, %v1450_v11  ;;  %4026 = vmatmul.mubr.msk.f32.vlgmr.msra.gmra.mrb[64].mxu1 %vm613_vm0, %v5517_v4  ;;  %v1570_v22 = vmax.f32 %v1506_v0, %v1538_v63 }
 0x2c2   :  { %v1236_v59 = vpop.permute.xlu0 %1235  ;;  %v5631_v25 = vpop.permute.xlu1 %1385  ;;  %1877 = vmatprep.mubr.f32.mxu1 %v7834_v29 }
 0x2c3   :  { %v1546_v38 = vmul.f32 0.2, %v1514_v24  ;;  %v1405_v57 = vsel %vm1399_vm5, %v1378_v14, %v5631_v25  ;;  %4015 = vmatmul.mubr.msk.f32.gmra.mrb[74].mxu0 %vm613_vm0, %v5627_v15  ;;  %v1539_v16 = vmul.f32 0.2, %v1507_v20  ;;  %v1278_v58 = vsel %vm1263_vm3, %v5291_v45, %v1236_v59  ;;  %v5678_v14 = vld [vmem:[%s7727_s3 + $0x40] sm:$0xff] }
 0x2c4   :  { %v1451_v33 = vsel %vm1437_vm6, 0.0, %v1405_v57  ;;  %1746 = vmatprep.mubr.f32.mxu0 %v7834_v29  ;;  %v1322_v45 = vsel %vm1301_vm4, 0.0, %v1278_v58 }
 0x2c5   :  { %v1578_v62 = vmax.f32 %v1514_v24, %v1546_v38  ;;  %v1515_v10 = vadd.f32 %v1483_v51, %v1451_v33  ;;  %4027 = vmatmul.mubr.msk.f32.gmra.mrb[66].mxu1 %vm613_vm0, %v5540_v34  ;;  %v1571_v61 = vmax.f32 %v1507_v20, %v1539_v16 }
 0x2c6   :  { %v5650_v26 = vpop.permute.xlu0 %1243  ;;  %v1238_v50 = vpop.permute.xlu1 %1237  ;;  %1883 = vmatprep.mubr.f32.mxu1 %v7834_v29 }
 0x2c7   :  { %v1547_v32 = vmul.f32 0.2, %v1515_v10  ;;  %4016 = vmatmul.mubr.msk.f32.gmra.mrb[76].mxu0 %vm613_vm0, %v5646_v46  ;;  %v4252_v39 = vpack.c.bf16 %v1578_v62, %v1570_v22  ;;  %v1274_v0 = vsel %vm1263_vm3, %v1236_v59, %v5650_v26  ;;  %v1279_v20 = vsel %vm1263_vm3, %v5298_v49, %v1238_v50 }
 0x2c8   :  { %1752 = vmatprep.mubr.f32.mxu0 %v7834_v29  ;;  %v1323_v60 = vsel %vm1301_vm4, 0.0, %v1274_v0 }
 0x2c9   :  { %v1579_v30 = vmax.f32 %v1515_v10, %v1547_v32  ;;  %4028 = vmatmul.mubr.msk.f32.gmra.mrb[68].mxu1 %vm613_vm0, %v5557_v35 }
 0x2ca   :  { %v1248_v47 = vpop.permute.xlu0 %1247  ;;  %v5663_v54 = vpop.permute.xlu1 %1245  ;;  %1889 = vmatprep.mubr.f32.mxu1 %v7834_v29 }
 0x2cb   :  { %4017 = vmatmul.mubr.msk.f32.gmra.mrb[78].mxu0 %vm613_vm0, %v5659_v23  ;;  %v4250_v27 = vpack.c.bf16 %v1579_v30, %v1571_v61  ;;  %v1264_v24 = vsel %vm1263_vm3, %v1248_v47, %v5414_v7  ;;  %v1268_v59 = vsel %vm1263_vm3, %v5562_v36, %v1248_v47 }
 0x2cc   :  { %1758 = vmatprep.mubr.f32.mxu0 %v7834_v29  ;;  %v1308_v22 = vsel %vm1301_vm4, 0.0, %v1268_v59  ;;  %v1309_v16 = vsel %vm1301_vm4, 0.0, %v1264_v24 }
 0x2cd   :  { %4029 = vmatmul.mubr.msk.f32.gmra.mrb[70].mxu1 %vm613_vm0, %v5573_v1  ;;  %4251 = vmatprep.subr.bf16.mxu0 %v4250_v27  ;;  %v1476_v0 = vadd.f32 %v1308_v22, %v5198_v12  ;;  %v7835_v27 = vld [vmem:[#allocation5_spill] sm:$0xff] }
 0x2ce   :  { %v1380_v41 = vpop.permute.xlu0 %1379  ;;  %v1250_v40 = vpop.permute.xlu1 %1249  ;;  %4253 = vmatpush1.bf16.msra.mxu0 %v4252_v39  ;;  %1895 = vmatprep.mubr.f32.mxu1 %v7834_v29 }
 0x2cf   :  { %v1410_v8 = vsel %vm1399_vm5, %v5523_v52, %v1380_v41  ;;  %v1265_v43 = vsel %vm1263_vm3, %v1250_v40, %v5442_v2  ;;  %v1269_v56 = vsel %vm1263_vm3, %v5581_v6, %v1250_v40  ;;  %4018 = vmatmul.mubr.msk.f32.gmra.mrb[80].mxu0 %vm613_vm0, %v5678_v14  ;;  %v5706_v52 = vld [vmem:[%s7727_s3 + $0x48] sm:$0xff]  ;;  %v1490_v2 = vadd.f32 %v1322_v45, %v5214_v9  ;;  %v7836_v40 = vld [vmem:[#allocation8_spill] sm:$0xff] }
 0x2d0   :  { %v1316_v11 = vsel %vm1301_vm4, 0.0, %v1269_v56  ;;  %v1317_v63 = vsel %vm1301_vm4, 0.0, %v1265_v43  ;;  %1764 = vmatprep.mubr.f32.mxu0 %v7834_v29  ;;  %v1491_v6 = vadd.f32 %v1323_v60, %v5216_v19  ;;  %v1458_v9 = vsel %vm1437_vm6, 0.0, %v1410_v8 }
 0x2d1   :  { %4030 = vmatmul.mubr.msk.f32.gmra.mrb[72].mxu1 %vm613_vm0, %v5599_v5  ;;  %v1484_v19 = vadd.f32 %v1316_v11, %v5208_v17  ;;  %v1485_v49 = vadd.f32 %v1317_v63, %v5212_v18  ;;  %v1275_v17 = vsel %vm1263_vm3, %v1238_v50, %v5663_v54  ;;  %v1330_v50 = vsel %vm1301_vm4, 0.0, %v1279_v20 }
 0x2d2   :  { %v5724_v51 = vpop.permute.xlu0 %1387  ;;  %v1394_v38 = vpop.permute.xlu1 %1393  ;;  %1901 = vmatprep.mubr.f32.mxu1 %v7834_v29  ;;  %v5766_v32 = vadd.f32 %v1490_v2, %v1458_v9  ;;  %v1331_v30 = vsel %vm1301_vm4, 0.0, %v1275_v17  ;;  %v1477_v45 = vadd.f32 %v1309_v16, %v7835_v27  ;;  %v1498_v8 = vadd.f32 %v1330_v50, %v7836_v40  ;;  %v7839_v50 = vld [vmem:[#allocation6_spill] sm:$0xff] }
 0x2d3   :  { %v1406_v7 = vsel %vm1399_vm5, %v1380_v41, %v5724_v51  ;;  %v1401_v36 = vsel %vm1399_vm5, %v5631_v25, %v1394_v38  ;;  %v1429_v57 = vsel %vm1399_vm5, %v1394_v38, %v5321_v3  ;;  %4019 = vmatmul.mubr.msk.f32.gmra.mrb[82].mxu0 %vm613_vm0, %v5706_v52  ;;  %v5752_v3 = vld [vmem:[%s7727_s3 + $0x50] sm:$0xff] }
 0x2d4   :  { %v1459_v18 = vsel %vm1437_vm6, 0.0, %v1406_v7  ;;  %v1452_v33 = vsel %vm1437_vm6, 0.0, %v1401_v36  ;;  %v1453_v25 = vsel %vm1437_vm6, 0.0, %v1429_v57  ;;  %1770 = vmatprep.mubr.f32.mxu0 %v7834_v29  ;;  %v5800_v63 = vmul.f32 0.2, %v5766_v32 }
 0x2d5   :  { %v5758_v62 = vadd.f32 %v1484_v19, %v1452_v33  ;;  %v5760_v10 = vadd.f32 %v1485_v49, %v1453_v25  ;;  %4031 = vmatmul.mubr.msk.f32.gmra.mrb[74].mxu1 %vm613_vm0, %v5627_v15  ;;  %v5771_v47 = vadd.f32 %v1491_v6, %v1459_v18  ;;  %v5820_v49 = vld [vmem:[%s7727_s3 + $0x60] sm:$0xff]  ;;  %v7838_v18 = vld [vmem:[#allocation7_spill] sm:$0xff] }
 0x2d6   :  { %v1392_v39 = vpop.permute.xlu0 %1391  ;;  %v1254_v61 = vpop.permute.xlu1 %1253  ;;  %1907 = vmatprep.mubr.f32.mxu1 %v7834_v29 }
 0x2d7   :  { %v1400_v58 = vsel %vm1399_vm5, %v5604_v31, %v1392_v39  ;;  %4020 = vmatmul.mubr.msk.f32.gmra.mrb[84].mxu0 %vm613_vm0, %v5752_v3  ;;  %v1428_v60 = vsel %vm1399_vm5, %v1392_v39, %v5307_v55  ;;  %v5789_v31 = vld [vmem:[%s7727_s3 + $0x58] sm:$0xff]  ;;  %v1548_v12 = vmul.f32 0.2, %v5758_v62  ;;  %v1549_v43 = vmul.f32 0.2, %v5760_v10  ;;  %v7837_v55 = vld [vmem:[#allocation9_spill] sm:$0xff] }
 0x2d8   :  { %v1444_v41 = vsel %vm1437_vm6, 0.0, %v1400_v58  ;;  %1776 = vmatprep.mubr.f32.mxu0 %v7834_v29  ;;  %v1445_v56 = vsel %vm1437_vm6, 0.0, %v1428_v60  ;;  %v1499_v11 = vadd.f32 %v1331_v30, %v7837_v55  ;;  %v5804_v59 = vmul.f32 0.2, %v5771_v47 }
 0x2d9   :  { %4032 = vmatmul.mubr.msk.f32.gmra.mrb[76].mxu1 %vm613_vm0, %v5646_v46  ;;  %v1508_v2 = vadd.f32 %v1476_v0, %v1444_v41  ;;  %v1509_v6 = vadd.f32 %v1477_v45, %v1445_v56  ;;  %v1271_v9 = vsel %vm1263_vm3, %v5663_v54, %v1254_v61  ;;  %v1581_v57 = vmax.f32 %v5760_v10, %v1549_v43 }
 0x2da   :  { %v1252_v20 = vpop.permute.xlu0 %1251  ;;  %v1390_v24 = vpop.permute.xlu1 %1389  ;;  %1913 = vmatprep.mubr.f32.mxu1 %v7834_v29  ;;  %v1267_v17 = vsel %vm1263_vm3, %v1254_v61, %v5469_v37  ;;  %v1332_v16 = vsel %vm1301_vm4, 0.0, %v1271_v9 }
 0x2db   :  { %v1266_v19 = vsel %vm1263_vm3, %v1252_v20, %v5440_v21  ;;  %v1270_v38 = vsel %vm1263_vm3, %v5650_v26, %v1252_v20  ;;  %4021 = vmatmul.mubr.msk.f32.gmra.mrb[86].mxu0 %vm613_vm0, %v5789_v31  ;;  %v1540_v7 = vmul.f32 0.2, %v1508_v2  ;;  %v1541_v36 = vmul.f32 0.2, %v1509_v6 }
 0x2dc   :  { %v1324_v54 = vsel %vm1301_vm4, 0.0, %v1270_v38  ;;  %v1325_v21 = vsel %vm1301_vm4, 0.0, %v1266_v19  ;;  %1782 = vmatprep.mubr.f32.mxu0 %v7834_v29  ;;  %v1580_v26 = vmax.f32 %v5758_v62, %v1548_v12  ;;  %v1333_v45 = vsel %vm1301_vm4, 0.0, %v1267_v17  ;;  %v5903_v17 = vld [vmem:[%s7727_s3 + $0x78] sm:$0xff] }
 0x2dd   :  { %v1493_v33 = vadd.f32 %v1325_v21, %v7838_v18  ;;  %4033 = vmatmul.mubr.msk.f32.gmra.mrb[78].mxu1 %vm613_vm0, %v5659_v23  ;;  %v1572_v25 = vmax.f32 %v1508_v2, %v1540_v7  ;;  %v1573_v22 = vmax.f32 %v1509_v6, %v1541_v36  ;;  %v1492_v39 = vadd.f32 %v1324_v54, %v7839_v50  ;;  %v7840_v6 = vld [vmem:[#allocation10_spill] sm:$0xff] }
 0x2de   :  { %v1396_v30 = vpop.permute.xlu0 %1395  ;;  %v1382_v62 = vpop.permute.xlu1 %1381  ;;  %1919 = vmatprep.mubr.f32.mxu1 %v7834_v29  ;;  %v1586_v2 = vmax.f32 %v5766_v32, %v5800_v63  ;;  %v1500_v20 = vadd.f32 %v1332_v16, %v7840_v6  ;;  %v5888_v63 = vld [vmem:[%s7727_s3 + $0x70] sm:$0xff] }
 0x2df   :  { %v1402_v37 = vsel %vm1399_vm5, %v5724_v51, %v1396_v30  ;;  %v1430_v10 = vsel %vm1399_vm5, %v1396_v30, %v5366_v44  ;;  %v1407_v61 = vsel %vm1399_vm5, %v1382_v62, %v1390_v24  ;;  %v1411_v58 = vsel %vm1399_vm5, %v5542_v13, %v1382_v62  ;;  %4022 = vmatmul.mubr.msk.f32.gmra.mrb[88].mxu0 %vm613_vm0, %v5820_v49  ;;  %v5864_v13 = vld [vmem:[%s7727_s3 + $0x68] sm:$0xff] }
 0x2e0   :  { %v1460_v0 = vsel %vm1437_vm6, 0.0, %v1402_v37  ;;  %v1461_v51 = vsel %vm1437_vm6, 0.0, %v1430_v10  ;;  %v1466_v27 = vsel %vm1437_vm6, 0.0, %v1411_v58  ;;  %v1467_v44 = vsel %vm1437_vm6, 0.0, %v1407_v61  ;;  %1788 = vmatprep.mubr.f32.mxu0 %v7834_v29 }
 0x2e1   :  { %v1524_v60 = vadd.f32 %v1492_v39, %v1460_v0  ;;  %v1530_v41 = vadd.f32 %v1498_v8, %v1466_v27  ;;  %v1531_v40 = vadd.f32 %v1499_v11, %v1467_v44  ;;  %4034 = vmatmul.mubr.msk.f32.gmra.mrb[80].mxu1 %vm613_vm0, %v5678_v14  ;;  %v1525_v12 = vadd.f32 %v1493_v33, %v1461_v51  ;;  %v7841_v8 = vld [vmem:[#allocation11_spill] sm:$0xff] }
 0x2e2   :  { %v4258_v43 = vpack.c.bf16 %v1581_v57, %v1573_v22  ;;  %v1398_v56 = vpop.permute.xlu1 %1397  ;;  %v4260_v55 = vpack.c.bf16 %v1580_v26, %v1572_v25  ;;  %1925 = vmatprep.mubr.f32.mxu1 %v7834_v29  ;;  %v1501_v11 = vadd.f32 %v1333_v45, %v7841_v8 }
 0x2e3   :  { %v1562_v9 = vmul.f32 0.2, %v1530_v41  ;;  %v1403_v48 = vsel %vm1399_vm5, %v1390_v24, %v1398_v56  ;;  %4023 = vmatmul.mubr.msk.f32.gmra.mrb[90].mxu0 %vm613_vm0, %v5864_v13  ;;  %v1563_v19 = vmul.f32 0.2, %v1531_v40  ;;  %v1431_v38 = vsel %vm1399_vm5, %v1398_v56, %v5378_v28 }
 0x2e4   :  { %4259 = vmatprep.subr.bf16.mxu1 %v4258_v43  ;;  %v1468_v32 = vsel %vm1437_vm6, 0.0, %v1403_v48  ;;  %1794 = vmatprep.mubr.f32.mxu0 %v7834_v29  ;;  %v1587_v24 = vmax.f32 %v5771_v47, %v5804_v59  ;;  %v1556_v7 = vmul.f32 0.2, %v1524_v60  ;;  %v1469_v54 = vsel %vm1437_vm6, 0.0, %v1431_v38 }
 0x2e5   :  { %v1594_v36 = vmax.f32 %v1530_v41, %v1562_v9  ;;  %4261 = vmatpush1.bf16.msra.mxu1 %v4260_v55  ;;  %v1557_v42 = vmul.f32 0.2, %v1525_v12  ;;  %v1595_v28 = vmax.f32 %v1531_v40, %v1563_v19  ;;  %v1532_v21 = vadd.f32 %v1500_v20, %v1468_v32 }
 0x2e6   :  { %v1533_v26 = vadd.f32 %v1501_v11, %v1469_v54  ;;  %4035 = vmatmul.mubr.msk.f32.gmra.mrb[82].mxu1 %vm613_vm0, %v5706_v52  ;;  %v1588_v18 = vmax.f32 %v1524_v60, %v1556_v7 }
 0x2e7   :  { %4024 = vmatmul.mubr.msk.f32.gmra.mrb[92].mxu0 %vm613_vm0, %v5888_v63  ;;  %1931 = vmatprep.mubr.f32.mxu1 %v7834_v29  ;;  %v4256_v57 = vpack.c.bf16 %v1594_v36, %v1586_v2  ;;  %v1564_v47 = vmul.f32 0.2, %v1532_v21  ;;  %v4254_v53 = vpack.c.bf16 %v1595_v28, %v1587_v24  ;;  %v1589_v33 = vmax.f32 %v1525_v12, %v1557_v42 }
 0x2e8   :  { %v1565_v59 = vmul.f32 0.2, %v1533_v26  ;;  %1800 = vmatprep.mubr.f32.mxu0 %v7834_v29 }
 0x2e9   :  { %v1596_v25 = vmax.f32 %v1532_v21, %v1564_v47  ;;  %4255 = vmatprep.subr.bf16.mxu0 %v4254_v53 }
 0x2ea   :  { %v1597_v22 = vmax.f32 %v1533_v26, %v1565_v59  ;;  %4036 = vmatmul.mubr.msk.f32.gmra.mrb[84].mxu1 %vm613_vm0, %v5752_v3  ;;  %4257 = vmatpush1.bf16.msra.mxu0 %v4256_v57 }
 0x2eb   :  { %4025 = vmatmul.mubr.msk.f32.gmra.mrb[94].mxu0 %vm613_vm0, %v5903_v17  ;;  %1937 = vmatprep.mubr.f32.mxu1 %v7834_v29  ;;  %v4264_v50 = vpack.c.bf16 %v1596_v25, %v1588_v18 }
 0x2ec   :  { %2032 = vmatprep.mubr.f32.mxu0 %v7834_v29  ;;  %v4262_v16 = vpack.c.bf16 %v1597_v22, %v1589_v33 }
 0x2ee   :  { %4037 = vmatmul.mubr.msk.f32.gmra.mrb[86].mxu1 %vm613_vm0, %v5789_v31  ;;  %4263 = vmatprep.subr.bf16.mxu1 %v4262_v16 }
 0x2ef   :  { %4042 = vmatmul.mubr.msk.f32.vlgmr.msra.gmra.mrb[96].mxu0 %vm613_vm0, %v5517_v4  ;;  %4265 = vmatpush1.bf16.msra.mxu1 %v4264_v50 }
 0x2f0   :  { %1943 = vmatprep.mubr.f32.mxu1 %v7834_v29  ;;  %2038 = vmatprep.mubr.f32.mxu0 %v7834_v29 }
 0x2f2   :  { %4038 = vmatmul.mubr.msk.f32.gmra.mrb[88].mxu1 %vm613_vm0, %v5820_v49 }
 0x2f3   :  { %4043 = vmatmul.mubr.msk.f32.gmra.mrb[98].mxu0 %vm613_vm0, %v5540_v34  ;;  %1949 = vmatprep.mubr.f32.mxu1 %v7834_v29 }
 0x2f4   :  { %2044 = vmatprep.mubr.f32.mxu0 %v7834_v29 }
 0x2f6   :  { %4039 = vmatmul.mubr.msk.f32.gmra.mrb[90].mxu1 %vm613_vm0, %v5864_v13 }
 0x2f7   :  { %4044 = vmatmul.mubr.msk.f32.gmra.mrb[100].mxu0 %vm613_vm0, %v5557_v35  ;;  %1955 = vmatprep.mubr.f32.mxu1 %v7834_v29 }
 0x2f8   :  { %2050 = vmatprep.mubr.f32.mxu0 %v7834_v29 }
 0x2fa   :  { %4040 = vmatmul.mubr.msk.f32.gmra.mrb[92].mxu1 %vm613_vm0, %v5888_v63 }
 0x2fb   :  { %4045 = vmatmul.mubr.msk.f32.gmra.mrb[102].mxu0 %vm613_vm0, %v5573_v1  ;;  %1961 = vmatprep.mubr.f32.mxu1 %v7834_v29 }
 0x2fc   :  { %2056 = vmatprep.mubr.f32.mxu0 %v7834_v29 }
 0x2fe   :  { %4041 = vmatmul.mubr.msk.f32.gmra.mrb[94].mxu1 %vm613_vm0, %v5903_v17 }
 0x2ff   :  { %4046 = vmatmul.mubr.msk.f32.gmra.mrb[104].mxu0 %vm613_vm0, %v5599_v5  ;;  %2193 = vmatprep.mubr.f32.mxu1 %v7834_v29 }
 0x300   :  { %2062 = vmatprep.mubr.f32.mxu0 %v7834_v29 }
 0x302   :  { %4058 = vmatmul.mubr.msk.f32.vlgmr.msra.gmra.mrb[96].mxu1 %vm613_vm0, %v5517_v4 }
 0x303   :  { %4047 = vmatmul.mubr.msk.f32.gmra.mrb[106].mxu0 %vm613_vm0, %v5627_v15  ;;  %2199 = vmatprep.mubr.f32.mxu1 %v7834_v29 }
 0x304   :  { %2068 = vmatprep.mubr.f32.mxu0 %v7834_v29 }
 0x306   :  { %4059 = vmatmul.mubr.msk.f32.gmra.mrb[98].mxu1 %vm613_vm0, %v5540_v34 }
 0x307   :  { %4048 = vmatmul.mubr.msk.f32.gmra.mrb[108].mxu0 %vm613_vm0, %v5646_v46  ;;  %2205 = vmatprep.mubr.f32.mxu1 %v7834_v29 }
 0x308   :  { %2074 = vmatprep.mubr.f32.mxu0 %v7834_v29 }
 0x30a   :  { %4060 = vmatmul.mubr.msk.f32.gmra.mrb[100].mxu1 %vm613_vm0, %v5557_v35 }
 0x30b   :  { %4049 = vmatmul.mubr.msk.f32.gmra.mrb[110].mxu0 %vm613_vm0, %v5659_v23  ;;  %2211 = vmatprep.mubr.f32.mxu1 %v7834_v29 }
 0x30c   :  { %2080 = vmatprep.mubr.f32.mxu0 %v7834_v29 }
 0x30e   :  { %4061 = vmatmul.mubr.msk.f32.gmra.mrb[102].mxu1 %vm613_vm0, %v5573_v1 }
 0x30f   :  { %4050 = vmatmul.mubr.msk.f32.gmra.mrb[112].mxu0 %vm613_vm0, %v5678_v14  ;;  %2217 = vmatprep.mubr.f32.mxu1 %v7834_v29 }
 0x310   :  { %2086 = vmatprep.mubr.f32.mxu0 %v7834_v29 }
 0x312   :  { %4062 = vmatmul.mubr.msk.f32.gmra.mrb[104].mxu1 %vm613_vm0, %v5599_v5 }
 0x313   :  { %4051 = vmatmul.mubr.msk.f32.gmra.mrb[114].mxu0 %vm613_vm0, %v5706_v52  ;;  %2223 = vmatprep.mubr.f32.mxu1 %v7834_v29 }
 0x314   :  { %2092 = vmatprep.mubr.f32.mxu0 %v7834_v29 }
 0x316   :  { %4063 = vmatmul.mubr.msk.f32.gmra.mrb[106].mxu1 %vm613_vm0, %v5627_v15 }
 0x317   :  { %4052 = vmatmul.mubr.msk.f32.gmra.mrb[116].mxu0 %vm613_vm0, %v5752_v3  ;;  %2229 = vmatprep.mubr.f32.mxu1 %v7834_v29 }
 0x318   :  { %2098 = vmatprep.mubr.f32.mxu0 %v7834_v29 }
 0x31a   :  { %4064 = vmatmul.mubr.msk.f32.gmra.mrb[108].mxu1 %vm613_vm0, %v5646_v46 }
 0x31b   :  { %4053 = vmatmul.mubr.msk.f32.gmra.mrb[118].mxu0 %vm613_vm0, %v5789_v31  ;;  %2235 = vmatprep.mubr.f32.mxu1 %v7834_v29 }
 0x31c   :  { %2104 = vmatprep.mubr.f32.mxu0 %v7834_v29 }
 0x31e   :  { %4065 = vmatmul.mubr.msk.f32.gmra.mrb[110].mxu1 %vm613_vm0, %v5659_v23 }
 0x31f   :  { %4054 = vmatmul.mubr.msk.f32.gmra.mrb[120].mxu0 %vm613_vm0, %v5820_v49  ;;  %2241 = vmatprep.mubr.f32.mxu1 %v7834_v29 }
 0x320   :  { %2110 = vmatprep.mubr.f32.mxu0 %v7834_v29 }
 0x322   :  { %4066 = vmatmul.mubr.msk.f32.gmra.mrb[112].mxu1 %vm613_vm0, %v5678_v14 }
 0x323   :  { %4055 = vmatmul.mubr.msk.f32.gmra.mrb[122].mxu0 %vm613_vm0, %v5864_v13  ;;  %2247 = vmatprep.mubr.f32.mxu1 %v7834_v29 }
 0x324   :  { %2116 = vmatprep.mubr.f32.mxu0 %v7834_v29 }
 0x326   :  { %4067 = vmatmul.mubr.msk.f32.gmra.mrb[114].mxu1 %vm613_vm0, %v5706_v52 }
 0x327   :  { %4056 = vmatmul.mubr.msk.f32.gmra.mrb[124].mxu0 %vm613_vm0, %v5888_v63  ;;  %2253 = vmatprep.mubr.f32.mxu1 %v7834_v29 }
 0x328   :  { %2122 = vmatprep.mubr.f32.mxu0 %v7834_v29 }
 0x32a   :  { %4068 = vmatmul.mubr.msk.f32.gmra.mrb[116].mxu1 %vm613_vm0, %v5752_v3 }
 0x32b   :  { %4057 = vmatmul.mubr.msk.f32.gmra.mrb[126].mxu0 %vm613_vm0, %v5903_v17  ;;  %2259 = vmatprep.mubr.f32.mxu1 %v7834_v29 }
 0x32e   :  { %4069 = vmatmul.mubr.msk.f32.gmra.mrb[118].mxu1 %vm613_vm0, %v5789_v31 }
 0x32f   :  { %2265 = vmatprep.mubr.f32.mxu1 %v7834_v29 }
 0x332   :  { %4070 = vmatmul.mubr.msk.f32.gmra.mrb[120].mxu1 %vm613_vm0, %v5820_v49 }
 0x333   :  { %2271 = vmatprep.mubr.f32.mxu1 %v7834_v29 }
 0x336   :  { %4071 = vmatmul.mubr.msk.f32.gmra.mrb[122].mxu1 %vm613_vm0, %v5864_v13 }
 0x337   :  { %2277 = vmatprep.mubr.f32.mxu1 %v7834_v29 }
 0x33a   :  { %4072 = vmatmul.mubr.msk.f32.gmra.mrb[124].mxu1 %vm613_vm0, %v5888_v63 }
 0x33b   :  { %2283 = vmatprep.mubr.f32.mxu1 %v7834_v29 }
 0x33e   :  { %4073 = vmatmul.mubr.msk.f32.gmra.mrb[126].mxu1 %vm613_vm0, %v5903_v17 }
 0x382   :  { %v6020_v4 = vpop.f32.mrb[64].mxu0 }
 0x383   :  { %v2451_v34 = vmul.f32 %v6020_v4, %v6020_v4  ;;  %v6024_v35 = vpop.f32.mrb[65].mxu0 }
 0x384   :  { %v2290_v1 = vadd.f32 %v6024_v35, %v6020_v4  ;;  %v2452_v5 = vmul.f32 %v6024_v35, %v6024_v35 }
 0x386   :  { %v2579_v15 = vadd.f32 %v2452_v5, %v2451_v34  ;;  %v6030_v46 = vpop.f32.mrb[66].mxu0 }
 0x387   :  { %v2459_v29 = vmul.f32 %v6030_v46, %v6030_v46  ;;  %v6034_v23 = vpop.f32.mrb[67].mxu0 }
 0x388   :  { %v2299_v14 = vadd.f32 %v6034_v23, %v6030_v46  ;;  %v2460_v52 = vmul.f32 %v6034_v23, %v6034_v23 }
 0x38a   :  { %v2588_v3 = vadd.f32 %v2460_v52, %v2459_v29  ;;  %v6040_v31 = vpop.f32.mrb[68].mxu0 }
 0x38b   :  { %v2467_v49 = vmul.f32 %v6040_v31, %v6040_v31  ;;  %v6044_v39 = vpop.f32.mrb[69].mxu0 }
 0x38c   :  { %v2308_v30 = vadd.f32 %v6044_v39, %v6040_v31  ;;  %v2468_v62 = vmul.f32 %v6044_v39, %v6044_v39 }
 0x38e   :  { %v2597_v37 = vadd.f32 %v2468_v62, %v2467_v49  ;;  %v6050_v10 = vpop.f32.mrb[70].mxu0 }
 0x38f   :  { %7842 = vst [vmem:[#allocation5_spill] sm:$0xff] %v6050_v10  ;;  %v2475_v61 = vmul.f32 %v6050_v10, %v6050_v10  ;;  %v6054_v58 = vpop.f32.mrb[71].mxu0 }
 0x390   :  { %7843 = vst [vmem:[#allocation8_spill] sm:$0xff] %v6054_v58  ;;  %v2317_v0 = vadd.f32 %v6054_v58, %v6050_v10  ;;  %v2476_v51 = vmul.f32 %v6054_v58, %v6054_v58 }
 0x392   :  { %v2606_v27 = vadd.f32 %v2476_v51, %v2475_v61  ;;  %v6060_v44 = vpop.f32.mrb[72].mxu0 }
 0x393   :  { %7844 = vst [vmem:[#allocation9_spill] sm:$0xff] %v6060_v44  ;;  %v2483_v13 = vmul.f32 %v6060_v44, %v6060_v44  ;;  %v6064_v45 = vpop.f32.mrb[73].mxu0 }
 0x394   :  { %7845 = vst [vmem:[#allocation7_spill] sm:$0xff] %v6064_v45  ;;  %v2326_v60 = vadd.f32 %v6064_v45, %v6060_v44  ;;  %v2484_v41 = vmul.f32 %v6064_v45, %v6064_v45  ;;  %v6070_v40 = vpop.f32.mrb[64].mxu1 }
 0x395   :  { %v2291_v12 = vadd.f32 %v2290_v1, %v6070_v40  ;;  %v2453_v43 = vmul.f32 %v6070_v40, %v6070_v40  ;;  %v6075_v56 = vpop.f32.mrb[65].mxu1 }
 0x396   :  { %v2615_v55 = vadd.f32 %v2484_v41, %v2483_v13  ;;  %v6077_v2 = vpop.f32.mrb[74].mxu0  ;;  %v2454_v6 = vmul.f32 %v6075_v56, %v6075_v56 }
 0x397   :  { %7846 = vst [vmem:[#allocation6_spill] sm:$0xff] %v6077_v2  ;;  %v2491_v20 = vmul.f32 %v6077_v2, %v6077_v2  ;;  %v6083_v9 = vpop.f32.mrb[75].mxu0  ;;  %v2580_v48 = vadd.f32 %v2579_v15, %v2453_v43  ;;  %v6086_v8 = vadd.f32 %v2291_v12, %v6075_v56 }
 0x398   :  { %7847 = vst [vmem:[#allocation10_spill] sm:$0xff] %v6083_v9  ;;  %v2335_v11 = vadd.f32 %v6083_v9, %v6077_v2  ;;  %v2492_v19 = vmul.f32 %v6083_v9, %v6083_v9  ;;  %v6092_v38 = vpop.f32.mrb[66].mxu1 }
 0x399   :  { %v6094_v32 = vadd.f32 %v2580_v48, %v2454_v6  ;;  %v2300_v63 = vadd.f32 %v2299_v14, %v6092_v38  ;;  %v2461_v24 = vmul.f32 %v6092_v38, %v6092_v38  ;;  %v6099_v7 = vpop.f32.mrb[67].mxu1 }
 0x39a   :  { %v2624_v36 = vadd.f32 %v2492_v19, %v2491_v20  ;;  %v6101_v54 = vpop.f32.mrb[76].mxu0  ;;  %v2462_v42 = vmul.f32 %v6099_v7, %v6099_v7 }
 0x39b   :  { %7848 = vst [vmem:[#allocation11_spill] sm:$0xff] %v6101_v54  ;;  %v2499_v28 = vmul.f32 %v6101_v54, %v6101_v54  ;;  %v6107_v21 = vpop.f32.mrb[77].mxu0  ;;  %v2589_v26 = vadd.f32 %v2588_v3, %v2461_v24  ;;  %v6110_v57 = vadd.f32 %v2300_v63, %v6099_v7 }
 0x39c   :  { %7849 = vst [vmem:[#allocation12_spill] sm:$0xff] %v6107_v21  ;;  %v2344_v47 = vadd.f32 %v6107_v21, %v6101_v54  ;;  %v2500_v59 = vmul.f32 %v6107_v21, %v6107_v21  ;;  %v6116_v53 = vpop.f32.mrb[68].mxu1 }
 0x39d   :  { %v6118_v17 = vadd.f32 %v2589_v26, %v2462_v42  ;;  %v2309_v18 = vadd.f32 %v2308_v30, %v6116_v53  ;;  %v2469_v33 = vmul.f32 %v6116_v53, %v6116_v53  ;;  %v6123_v25 = vpop.f32.mrb[69].mxu1 }
 0x39e   :  { %v2633_v22 = vadd.f32 %v2500_v59, %v2499_v28  ;;  %v6125_v16 = vpop.f32.mrb[78].mxu0  ;;  %v2470_v50 = vmul.f32 %v6123_v25, %v6123_v25 }
 0x39f   :  { %7850 = vst [vmem:[#allocation13_spill] sm:$0xff] %v6125_v16  ;;  %v2507_v34 = vmul.f32 %v6125_v16, %v6125_v16  ;;  %v6131_v1 = vpop.f32.mrb[79].mxu0  ;;  %v2598_v5 = vadd.f32 %v2597_v37, %v2469_v33  ;;  %v6134_v15 = vadd.f32 %v2309_v18, %v6123_v25 }
 0x3a0   :  { %7851 = vst [vmem:[#allocation14_spill] sm:$0xff] %v6131_v1  ;;  %v2353_v29 = vadd.f32 %v6131_v1, %v6125_v16  ;;  %v2508_v14 = vmul.f32 %v6131_v1, %v6131_v1  ;;  %v6140_v52 = vpop.f32.mrb[70].mxu1 }
 0x3a1   :  { %7852 = vst [vmem:[#allocation15_spill] sm:$0xff] %v6140_v52  ;;  %v6142_v3 = vadd.f32 %v2598_v5, %v2470_v50  ;;  %v2318_v49 = vadd.f32 %v2317_v0, %v6140_v52  ;;  %v2477_v30 = vmul.f32 %v6140_v52, %v6140_v52  ;;  %v6147_v62 = vpop.f32.mrb[71].mxu1 }
 0x3a2   :  { %7853 = vst [vmem:[#allocation16_spill] sm:$0xff] %v6147_v62  ;;  %v2642_v37 = vadd.f32 %v2508_v14, %v2507_v34  ;;  %v6149_v61 = vpop.f32.mrb[80].mxu0  ;;  %v2478_v51 = vmul.f32 %v6147_v62, %v6147_v62 }
 0x3a3   :  { %7854 = vst [vmem:[#allocation17_spill] sm:$0xff] %v6149_v61  ;;  %v2515_v13 = vmul.f32 %v6149_v61, %v6149_v61  ;;  %v6155_v41 = vpop.f32.mrb[81].mxu0  ;;  %v2607_v12 = vadd.f32 %v2606_v27, %v2477_v30  ;;  %v6158_v43 = vadd.f32 %v2318_v49, %v6147_v62 }
 0x3a4   :  { %7855 = vst [vmem:[#allocation18_spill] sm:$0xff] %v6155_v41  ;;  %v2362_v0 = vadd.f32 %v6155_v41, %v6149_v61  ;;  %v2516_v6 = vmul.f32 %v6155_v41, %v6155_v41  ;;  %v6164_v20 = vpop.f32.mrb[72].mxu1 }
 0x3a5   :  { %7856 = vst [vmem:[#allocation19_spill] sm:$0xff] %v6164_v20  ;;  %v6166_v48 = vadd.f32 %v2607_v12, %v2478_v51  ;;  %v2327_v19 = vadd.f32 %v2326_v60, %v6164_v20  ;;  %v2485_v63 = vmul.f32 %v6164_v20, %v6164_v20  ;;  %v6171_v24 = vpop.f32.mrb[73].mxu1 }
 0x3a6   :  { %7857 = vst [vmem:[#allocation20_spill] sm:$0xff] %v6171_v24  ;;  %v2651_v27 = vadd.f32 %v2516_v6, %v2515_v13  ;;  %v6173_v42 = vpop.f32.mrb[82].mxu0  ;;  %v2486_v28 = vmul.f32 %v6171_v24, %v6171_v24 }
 0x3a7   :  { %7858 = vst [vmem:[#allocation21_spill] sm:$0xff] %v6173_v42  ;;  %v2523_v26 = vmul.f32 %v6173_v42, %v6173_v42  ;;  %v6179_v59 = vpop.f32.mrb[83].mxu0  ;;  %v2616_v18 = vadd.f32 %v2615_v55, %v2485_v63  ;;  %v6182_v33 = vadd.f32 %v2327_v19, %v6171_v24 }
 0x3a8   :  { %7859 = vst [vmem:[#allocation22_spill] sm:$0xff] %v6179_v59  ;;  %v2371_v60 = vadd.f32 %v6179_v59, %v6173_v42  ;;  %v2524_v50 = vmul.f32 %v6179_v59, %v6179_v59  ;;  %v6188_v34 = vpop.f32.mrb[74].mxu1 }
 0x3a9   :  { %7860 = vst [vmem:[#allocation23_spill] sm:$0xff] %v6188_v34  ;;  %v6190_v5 = vadd.f32 %v2616_v18, %v2486_v28  ;;  %v2336_v14 = vadd.f32 %v2335_v11, %v6188_v34  ;;  %v2493_v49 = vmul.f32 %v6188_v34, %v6188_v34  ;;  %v6195_v30 = vpop.f32.mrb[75].mxu1 }
 0x3aa   :  { %7861 = vst [vmem:[#allocation24_spill] sm:$0xff] %v6195_v30  ;;  %v6197_v55 = vadd.f32 %v2524_v50, %v2523_v26  ;;  %v6199_v51 = vpop.f32.mrb[84].mxu0  ;;  %v2494_v13 = vmul.f32 %v6195_v30, %v6195_v30 }
 0x3ab   :  { %7862 = vst [vmem:[#allocation25_spill] sm:$0xff] %v6199_v51  ;;  %v2531_v12 = vmul.f32 %v6199_v51, %v6199_v51  ;;  %v6205_v6 = vpop.f32.mrb[85].mxu0  ;;  %v2625_v19 = vadd.f32 %v2624_v36, %v2493_v49  ;;  %v6208_v11 = vadd.f32 %v2336_v14, %v6195_v30 }
 0x3ac   :  { %7863 = vst [vmem:[#allocation26_spill] sm:$0xff] %v6205_v6  ;;  %v2380_v63 = vadd.f32 %v6205_v6, %v6199_v51  ;;  %v2532_v28 = vmul.f32 %v6205_v6, %v6205_v6  ;;  %v6214_v26 = vpop.f32.mrb[76].mxu1 }
 0x3ad   :  { %7864 = vst [vmem:[#allocation27_spill] sm:$0xff] %v6214_v26  ;;  %v6216_v18 = vadd.f32 %v2625_v19, %v2494_v13  ;;  %v2345_v50 = vadd.f32 %v2344_v47, %v6214_v26  ;;  %v2501_v59 = vmul.f32 %v6214_v26, %v6214_v26  ;;  %v6221_v42 = vpop.f32.mrb[77].mxu1 }
 0x3ae   :  { %7865 = vst [vmem:[#allocation28_spill] sm:$0xff] %v6221_v42  ;;  %v6223_v36 = vadd.f32 %v2532_v28, %v2531_v12  ;;  %v6225_v14 = vpop.f32.mrb[86].mxu0  ;;  %v2502_v49 = vmul.f32 %v6221_v42, %v6221_v42 }
 0x3af   :  { %7866 = vst [vmem:[#allocation29_spill] sm:$0xff] %v6225_v14  ;;  %v2539_v41 = vmul.f32 %v6225_v14, %v6225_v14  ;;  %v6231_v61 = vpop.f32.mrb[87].mxu0  ;;  %v2634_v13 = vadd.f32 %v2633_v22, %v2501_v59  ;;  %v6234_v47 = vadd.f32 %v2345_v50, %v6221_v42 }
 0x3b0   :  { %7867 = vst [vmem:[#allocation30_spill] sm:$0xff] %v6231_v61  ;;  %v2389_v19 = vadd.f32 %v6231_v61, %v6225_v14  ;;  %v2540_v12 = vmul.f32 %v6231_v61, %v6231_v61  ;;  %v6240_v28 = vpop.f32.mrb[78].mxu1 }
 0x3b1   :  { %7868 = vst [vmem:[#allocation31_spill] sm:$0xff] %v6240_v28  ;;  %v6242_v6 = vadd.f32 %v2634_v13, %v2502_v49  ;;  %v2354_v51 = vadd.f32 %v2353_v29, %v6240_v28  ;;  %v2509_v1 = vmul.f32 %v6240_v28, %v6240_v28  ;;  %v6247_v16 = vpop.f32.mrb[79].mxu1 }
 0x3b2   :  { %7869 = vst [vmem:[#allocation32_spill] sm:$0xff] %v6247_v16  ;;  %v6249_v22 = vadd.f32 %v2540_v12, %v2539_v41  ;;  %v6251_v59 = vpop.f32.mrb[88].mxu0  ;;  %v2510_v50 = vmul.f32 %v6247_v16, %v6247_v16 }
 0x3b3   :  { %7870 = vst [vmem:[#allocation33_spill] sm:$0xff] %v6251_v59  ;;  %v2547_v61 = vmul.f32 %v6251_v59, %v6251_v59  ;;  %v6257_v14 = vpop.f32.mrb[89].mxu0  ;;  %v2643_v49 = vadd.f32 %v2642_v37, %v2509_v1  ;;  %v6260_v29 = vadd.f32 %v2354_v51, %v6247_v16 }
 0x3b4   :  { %7871 = vst [vmem:[#allocation34_spill] sm:$0xff] %v6257_v14  ;;  %v6264_v13 = vadd.f32 %v6257_v14, %v6251_v59  ;;  %v2548_v41 = vmul.f32 %v6257_v14, %v6257_v14  ;;  %v6268_v12 = vpop.f32.mrb[80].mxu1 }
 0x3b5   :  { %7872 = vst [vmem:[#allocation35_spill] sm:$0xff] %v6268_v12  ;;  %v6270_v28 = vadd.f32 %v2643_v49, %v2510_v50  ;;  %v2363_v42 = vadd.f32 %v2362_v0, %v6268_v12  ;;  %v2517_v26 = vmul.f32 %v6268_v12, %v6268_v12  ;;  %v6275_v1 = vpop.f32.mrb[81].mxu1 }
 0x3b6   :  { %7873 = vst [vmem:[#allocation36_spill] sm:$0xff] %v6275_v1  ;;  %v6277_v37 = vadd.f32 %v2548_v41, %v2547_v61  ;;  %v6279_v51 = vpop.f32.mrb[90].mxu0  ;;  %v2518_v59 = vmul.f32 %v6275_v1, %v6275_v1 }
 0x3b7   :  { %7874 = vst [vmem:[#allocation37_spill] sm:$0xff] %v6279_v51  ;;  %v2555_v14 = vmul.f32 %v6279_v51, %v6279_v51  ;;  %v6285_v16 = vpop.f32.mrb[91].mxu0  ;;  %v2652_v50 = vadd.f32 %v2651_v27, %v2517_v26  ;;  %v6288_v0 = vadd.f32 %v2363_v42, %v6275_v1 }
 0x3b8   :  { %7875 = vst [vmem:[#allocation38_spill] sm:$0xff] %v6285_v16  ;;  %v6292_v49 = vadd.f32 %v6285_v16, %v6279_v51  ;;  %v2556_v61 = vmul.f32 %v6285_v16, %v6285_v16 }
 0x3b9   :  { %v6296_v41 = vadd.f32 %v2652_v50, %v2518_v59  ;;  %v6298_v12 = vpop.f32.mrb[82].mxu1 }
 0x3ba   :  { %7876 = vst [vmem:[#allocation39_spill] sm:$0xff] %v6298_v12  ;;  %v6300_v21 = vadd.f32 %v2556_v61, %v2555_v14  ;;  %v6302_v54 = vpop.f32.mrb[92].mxu0  ;;  %v2372_v27 = vadd.f32 %v2371_v60, %v6298_v12  ;;  %v2525_v42 = vmul.f32 %v6298_v12, %v6298_v12  ;;  %v6307_v26 = vpop.f32.mrb[83].mxu1 }
 0x3bb   :  { %7877 = vst [vmem:[#allocation40_spill] sm:$0xff] %v6302_v54  ;;  %7878 = vst [vmem:[#allocation41_spill] sm:$0xff] %v6307_v26  ;;  %v2563_v51 = vmul.f32 %v6302_v54, %v6302_v54  ;;  %v6311_v1 = vpop.f32.mrb[93].mxu0  ;;  %v2526_v59 = vmul.f32 %v6307_v26, %v6307_v26 }
 0x3bc   :  { %7879 = vst [vmem:[#allocation42_spill] sm:$0xff] %v6311_v1  ;;  %v6317_v14 = vadd.f32 %v6311_v1, %v6302_v54  ;;  %v2564_v60 = vmul.f32 %v6311_v1, %v6311_v1  ;;  %v2661_v50 = vadd.f32 %v6197_v55, %v2525_v42  ;;  %v6323_v61 = vadd.f32 %v2372_v27, %v6307_v26 }
 0x3bd   :  { %v6325_v16 = vpop.f32.mrb[84].mxu1 }
 0x3be   :  { %7880 = vst [vmem:[#allocation43_spill] sm:$0xff] %v6325_v16  ;;  %v6327_v12 = vadd.f32 %v2564_v60, %v2563_v51  ;;  %v6329_v30 = vpop.f32.mrb[94].mxu0  ;;  %v6331_v34 = vadd.f32 %v2661_v50, %v2526_v59  ;;  %v2381_v9 = vadd.f32 %v2380_v63, %v6325_v16  ;;  %v2533_v54 = vmul.f32 %v6325_v16, %v6325_v16  ;;  %v6336_v2 = vpop.f32.mrb[85].mxu1 }
 0x3bf   :  { %7881 = vst [vmem:[#allocation44_spill] sm:$0xff] %v6329_v30  ;;  %7882 = vst [vmem:[#allocation45_spill] sm:$0xff] %v6336_v2  ;;  %v2571_v55 = vmul.f32 %v6329_v30, %v6329_v30  ;;  %v6340_v27 = vpop.f32.mrb[95].mxu0  ;;  %v2534_v51 = vmul.f32 %v6336_v2, %v6336_v2 }
 0x3c0   :  { %7883 = vst [vmem:[#allocation46_spill] sm:$0xff] %v6340_v27  ;;  %v6346_v42 = vadd.f32 %v6340_v27, %v6329_v30  ;;  %v2572_v63 = vmul.f32 %v6340_v27, %v6340_v27  ;;  %v2670_v59 = vadd.f32 %v6223_v36, %v2533_v54  ;;  %v6352_v60 = vadd.f32 %v2381_v9, %v6336_v2 }
 0x3c1   :  { %v6354_v50 = vpop.f32.mrb[86].mxu1 }
 0x3c2   :  { %7884 = vst [vmem:[#allocation47_spill] sm:$0xff] %v6354_v50  ;;  %v6356_v1 = vadd.f32 %v2572_v63, %v2571_v55  ;;  %v6358_v26 = vpop.f32.mrb[96].mxu0  ;;  %v6360_v16 = vadd.f32 %v2670_v59, %v2534_v51  ;;  %v2390_v24 = vadd.f32 %v2389_v19, %v6354_v50  ;;  %v2541_v30 = vmul.f32 %v6354_v50, %v6354_v50  ;;  %v6365_v20 = vpop.f32.mrb[87].mxu1 }
 0x3c3   :  { %7885 = vst [vmem:[#allocation48_spill] sm:$0xff] %v6365_v20  ;;  %v2293_v54 = vadd.f32 %v6086_v8, %v6358_v26  ;;  %v2455_v9 = vmul.f32 %v6358_v26, %v6358_v26  ;;  %v6371_v36 = vpop.f32.mrb[97].mxu0  ;;  %v2542_v55 = vmul.f32 %v6365_v20, %v6365_v20 }
 0x3c4   :  { %v2456_v51 = vmul.f32 %v6371_v36, %v6371_v36  ;;  %v2679_v19 = vadd.f32 %v6249_v22, %v2541_v30  ;;  %v6379_v63 = vadd.f32 %v2390_v24, %v6365_v20 }
 0x3c5   :  { %v2582_v59 = vadd.f32 %v6094_v32, %v2455_v9  ;;  %v6383_v8 = vadd.f32 %v2293_v54, %v6371_v36  ;;  %v6385_v27 = vpop.f32.mrb[88].mxu1 }
 0x3c6   :  { %7886 = vst [vmem:[#allocation49_spill] sm:$0xff] %v6385_v27  ;;  %v6387_v50 = vpop.f32.mrb[98].mxu0  ;;  %v6389_v2 = vadd.f32 %v2679_v19, %v2542_v55  ;;  %v2399_v45 = vadd.f32 %v6264_v13, %v6385_v27  ;;  %v2549_v30 = vmul.f32 %v6385_v27, %v6385_v27  ;;  %v6395_v22 = vpop.f32.mrb[89].mxu1 }
 0x3c7   :  { %7887 = vst [vmem:[#allocation50_spill] sm:$0xff] %v6395_v22  ;;  %v2302_v32 = vadd.f32 %v6110_v57, %v6387_v50  ;;  %v2463_v24 = vmul.f32 %v6387_v50, %v6387_v50  ;;  %v6401_v54 = vpop.f32.mrb[99].mxu0  ;;  %v2550_v9 = vmul.f32 %v6395_v22, %v6395_v22  ;;  %v6405_v55 = vadd.f32 %v2582_v59, %v2456_v51 }
 0x3c8   :  { %v2464_v13 = vmul.f32 %v6401_v54, %v6401_v54  ;;  %v2688_v19 = vadd.f32 %v6277_v37, %v2549_v30  ;;  %v6411_v20 = vadd.f32 %v2399_v45, %v6395_v22 }
 0x3c9   :  { %v2591_v57 = vadd.f32 %v6118_v17, %v2463_v24  ;;  %v6415_v27 = vadd.f32 %v2302_v32, %v6401_v54  ;;  %v6417_v44 = vpop.f32.mrb[90].mxu1 }
 0x3ca   :  { %7888 = vst [vmem:[#allocation51_spill] sm:$0xff] %v6417_v44  ;;  %v6419_v62 = vpop.f32.mrb[100].mxu0  ;;  %v6421_v52 = vadd.f32 %v2688_v19, %v2550_v9  ;;  %v2408_v51 = vadd.f32 %v6292_v49, %v6417_v44  ;;  %v2557_v37 = vmul.f32 %v6417_v44, %v6417_v44  ;;  %v6427_v59 = vpop.f32.mrb[91].mxu1 }
 0x3cb   :  { %7889 = vst [vmem:[#allocation52_spill] sm:$0xff] %v6419_v62  ;;  %7890 = vst [vmem:[#allocation53_spill] sm:$0xff] %v6427_v59  ;;  %v2311_v45 = vadd.f32 %v6134_v15, %v6419_v62  ;;  %v2471_v17 = vmul.f32 %v6419_v62, %v6419_v62  ;;  %v6433_v30 = vpop.f32.mrb[101].mxu0  ;;  %v2558_v32 = vmul.f32 %v6427_v59, %v6427_v59 }
 0x3cc   :  { %7891 = vst [vmem:[#allocation54_spill] sm:$0xff] %v6433_v30  ;;  %v6437_v24 = vadd.f32 %v2591_v57, %v2464_v13  ;;  %v2472_v49 = vmul.f32 %v6433_v30, %v6433_v30  ;;  %v2697_v9 = vadd.f32 %v6300_v21, %v2557_v37  ;;  %v6443_v19 = vadd.f32 %v2408_v51, %v6427_v59 }
 0x3cd   :  { %v2600_v15 = vadd.f32 %v6142_v3, %v2471_v17  ;;  %v6447_v44 = vadd.f32 %v2311_v45, %v6433_v30  ;;  %v6449_v22 = vpop.f32.mrb[92].mxu1 }
 0x3ce   :  { %7892 = vst [vmem:[#allocation55_spill] sm:$0xff] %v6449_v22  ;;  %v6451_v58 = vpop.f32.mrb[102].mxu0  ;;  %v6453_v10 = vadd.f32 %v2697_v9, %v2558_v32  ;;  %v2417_v13 = vadd.f32 %v6317_v14, %v6449_v22  ;;  %v2565_v21 = vmul.f32 %v6449_v22, %v6449_v22  ;;  %v6459_v57 = vpop.f32.mrb[93].mxu1 }
 0x3cf   :  { %7893 = vst [vmem:[#allocation56_spill] sm:$0xff] %v6451_v58  ;;  %7894 = vst [vmem:[#allocation57_spill] sm:$0xff] %v6459_v57  ;;  %v2320_v3 = vadd.f32 %v6158_v43, %v6451_v58  ;;  %v2479_v51 = vmul.f32 %v6451_v58, %v6451_v58  ;;  %v6465_v37 = vpop.f32.mrb[103].mxu0  ;;  %v2566_v45 = vmul.f32 %v6459_v57, %v6459_v57 }
 0x3d0   :  { %7895 = vst [vmem:[#allocation58_spill] sm:$0xff] %v6465_v37  ;;  %v6469_v17 = vadd.f32 %v2600_v15, %v2472_v49  ;;  %v2480_v14 = vmul.f32 %v6465_v37, %v6465_v37  ;;  %v2706_v32 = vadd.f32 %v6327_v12, %v2565_v21  ;;  %v6475_v9 = vadd.f32 %v2417_v13, %v6459_v57 }
 0x3d1   :  { %v2609_v43 = vadd.f32 %v6166_v48, %v2479_v51  ;;  %v6479_v59 = vadd.f32 %v2320_v3, %v6465_v37  ;;  %v6481_v22 = vpop.f32.mrb[94].mxu1 }
 0x3d2   :  { %7896 = vst [vmem:[#allocation59_spill] sm:$0xff] %v6481_v22  ;;  %v6483_v58 = vadd.f32 %v2706_v32, %v2566_v45  ;;  %v6485_v30 = vpop.f32.mrb[104].mxu0  ;;  %v2426_v49 = vadd.f32 %v6346_v42, %v6481_v22  ;;  %v2573_v12 = vmul.f32 %v6481_v22, %v6481_v22  ;;  %v6491_v15 = vpop.f32.mrb[95].mxu1 }
 0x3d3   :  { %7897 = vst [vmem:[#allocation60_spill] sm:$0xff] %v6485_v30  ;;  %7898 = vst [vmem:[#allocation61_spill] sm:$0xff] %v6491_v15  ;;  %v2329_v48 = vadd.f32 %v6182_v33, %v6485_v30  ;;  %v2487_v13 = vmul.f32 %v6485_v30, %v6485_v30  ;;  %v2574_v21 = vmul.f32 %v6491_v15, %v6491_v15  ;;  %v6499_v3 = vpop.f32.mrb[105].mxu0 }
 0x3d4   :  { %7899 = vst [vmem:[#allocation62_spill] sm:$0xff] %v6499_v3  ;;  %v6501_v51 = vadd.f32 %v2609_v43, %v2480_v14  ;;  %v2715_v42 = vadd.f32 %v6356_v1, %v2573_v12  ;;  %v6505_v45 = vadd.f32 %v2426_v49, %v6491_v15  ;;  %v2488_v32 = vmul.f32 %v6499_v3, %v6499_v3 }
 0x3d5   :  { %v2618_v33 = vadd.f32 %v6190_v5, %v2487_v13  ;;  %v6511_v22 = vadd.f32 %v2329_v48, %v6499_v3  ;;  %v6513_v57 = vpop.f32.mrb[96].mxu1 }
 0x3d6   :  { %v6515_v30 = vadd.f32 %v2715_v42, %v2574_v21  ;;  %v2457_v14 = vmul.f32 %v6513_v57, %v6513_v57  ;;  %v6519_v43 = vpop.f32.mrb[106].mxu0  ;;  %v6521_v1 = vpop.f32.mrb[97].mxu1  ;;  %v2295_v49 = vadd.f32 %v6383_v8, %v6513_v57 }
 0x3d7   :  { %7900 = vst [vmem:[#allocation63_spill] sm:$0xff] %v6519_v43  ;;  %v2338_v5 = vadd.f32 %v6208_v11, %v6519_v43  ;;  %v2495_v12 = vmul.f32 %v6519_v43, %v6519_v43  ;;  %v6529_v48 = vpop.f32.mrb[107].mxu0  ;;  %v2458_v13 = vmul.f32 %v6521_v1, %v6521_v1  ;;  %v6533_v21 = vadd.f32 %v2618_v33, %v2488_v32 }
 0x3d8   :  { %7901 = vst [vmem:[#allocation64_spill] sm:$0xff] %v6529_v48  ;;  %v2496_v42 = vmul.f32 %v6529_v48, %v6529_v48  ;;  %v2296_v15 = vadd.f32 %v2295_v49, %v6521_v1  ;;  %v2584_v8 = vadd.f32 %v6405_v55, %v2457_v14 }
 0x3d9   :  { %v2627_v3 = vadd.f32 %v6216_v18, %v2495_v12  ;;  %v6541_v11 = vadd.f32 %v2338_v5, %v6529_v48  ;;  %v6543_v43 = vpop.f32.mrb[98].mxu1 }
 0x3da   :  { %v2465_v37 = vmul.f32 %v6543_v43, %v6543_v43  ;;  %2297 = vadd.xlane.f32.xlu0 %v2296_v15  ;;  %v6547_v32 = vpop.f32.mrb[108].mxu0  ;;  %v6549_v33 = vpop.f32.mrb[99].mxu1  ;;  %v2585_v62 = vadd.f32 %v2584_v8, %v2458_v13  ;;  %v2304_v49 = vadd.f32 %v6415_v27, %v6543_v43 }
 0x3db   :  { %7902 = vst [vmem:[#allocation65_spill] sm:$0xff] %v6547_v32  ;;  %v2347_v18 = vadd.f32 %v6234_v47, %v6547_v32  ;;  %v2503_v55 = vmul.f32 %v6547_v32, %v6547_v32  ;;  %v6557_v14 = vpop.f32.mrb[109].mxu0  ;;  %v2466_v5 = vmul.f32 %v6549_v33, %v6549_v33  ;;  %v6561_v15 = vadd.f32 %v2627_v3, %v2496_v42 }
 0x3dc   :  { %7903 = vst [vmem:[#allocation66_spill] sm:$0xff] %v6557_v14  ;;  %2586 = vadd.xlane.f32.xlu1 %v2585_v62  ;;  %v2504_v12 = vmul.f32 %v6557_v14, %v6557_v14  ;;  %v2593_v13 = vadd.f32 %v6437_v24, %v2465_v37  ;;  %v2305_v27 = vadd.f32 %v2304_v49, %v6549_v33 }
 0x3dd   :  { %v2636_v47 = vadd.f32 %v6242_v6, %v2503_v55  ;;  %v6569_v8 = vadd.f32 %v2347_v18, %v6557_v14  ;;  %v6571_v32 = vpop.f32.mrb[100].mxu1 }
 0x3de   :  { %v2473_v48 = vmul.f32 %v6571_v32, %v6571_v32  ;;  %v6575_v3 = vpop.f32.mrb[110].mxu0  ;;  %v6577_v62 = vpop.f32.mrb[101].mxu1  ;;  %v2594_v42 = vadd.f32 %v2593_v13, %v2466_v5  ;;  %v2313_v24 = vadd.f32 %v6447_v44, %v6571_v32 }
 0x3df   :  { %7904 = vst [vmem:[#allocation67_spill] sm:$0xff] %v6575_v3  ;;  %v2356_v37 = vadd.f32 %v6260_v29, %v6575_v3  ;;  %v2511_v6 = vmul.f32 %v6575_v3, %v6575_v3  ;;  %v6585_v49 = vpop.f32.mrb[111].mxu0  ;;  %v2474_v18 = vmul.f32 %v6577_v62, %v6577_v62  ;;  %v6589_v55 = vadd.f32 %v2636_v47, %v2504_v12 }
 0x3e0   :  { %7905 = vst [vmem:[#allocation68_spill] sm:$0xff] %v6585_v49  ;;  %2595 = vadd.xlane.f32.xlu0 %v2594_v42  ;;  %2306 = vadd.xlane.f32.xlu1 %v2305_v27  ;;  %v2512_v5 = vmul.f32 %v6585_v49, %v6585_v49  ;;  %v2602_v44 = vadd.f32 %v6469_v17, %v2473_v48 }
 0x3e1   :  { %v2314_v13 = vadd.f32 %v2313_v24, %v6577_v62  ;;  %v2645_v29 = vadd.f32 %v6270_v28, %v2511_v6  ;;  %v6597_v3 = vadd.f32 %v2356_v37, %v6585_v49  ;;  %v6599_v14 = vpop.f32.mrb[102].mxu1 }
 0x3e2   :  { %v2481_v12 = vmul.f32 %v6599_v14, %v6599_v14  ;;  %v6603_v47 = vpop.f32.mrb[112].mxu0  ;;  %v6605_v27 = vpop.f32.mrb[103].mxu1  ;;  %v2603_v42 = vadd.f32 %v2602_v44, %v2474_v18  ;;  %v2322_v17 = vadd.f32 %v6479_v59, %v6599_v14 }
 0x3e3   :  { %7906 = vst [vmem:[#allocation69_spill] sm:$0xff] %v6603_v47  ;;  %v2365_v48 = vadd.f32 %v6288_v0, %v6603_v47  ;;  %v2519_v28 = vmul.f32 %v6603_v47, %v6603_v47  ;;  %v6613_v24 = vpop.f32.mrb[113].mxu0  ;;  %v2482_v37 = vmul.f32 %v6605_v27, %v6605_v27  ;;  %v6617_v6 = vadd.f32 %v2645_v29, %v2512_v5 }
 0x3e4   :  { %7907 = vst [vmem:[#allocation70_spill] sm:$0xff] %v6613_v24  ;;  %2604 = vadd.xlane.f32.xlu1 %v2603_v42  ;;  %2315 = vadd.xlane.f32.xlu0 %v2314_v13  ;;  %v2520_v18 = vmul.f32 %v6613_v24, %v6613_v24  ;;  %v2323_v59 = vadd.f32 %v2322_v17, %v6605_v27 }
 0x3e5   :  { %v2611_v44 = vadd.f32 %v6501_v51, %v2481_v12  ;;  %v2654_v0 = vadd.f32 %v6296_v41, %v2519_v28  ;;  %v6625_v47 = vadd.f32 %v2365_v48, %v6613_v24  ;;  %v6627_v49 = vpop.f32.mrb[104].mxu1 }
 0x3e6   :  { %7908 = vst [vmem:[#allocation71_spill] sm:$0xff] %v6627_v49  ;;  %v2489_v5 = vmul.f32 %v6627_v49, %v6627_v49  ;;  %v6631_v29 = vpop.f32.mrb[114].mxu0  ;;  %v6633_v13 = vpop.f32.mrb[105].mxu1  ;;  %v2331_v42 = vadd.f32 %v6511_v22, %v6627_v49 }
 0x3e7   :  { %7909 = vst [vmem:[#allocation72_spill] sm:$0xff] %v6631_v29  ;;  %v2612_v17 = vadd.f32 %v2611_v44, %v2482_v37  ;;  %v2374_v51 = vadd.f32 %v6323_v61, %v6631_v29  ;;  %v2527_v41 = vmul.f32 %v6631_v29, %v6631_v29  ;;  %v6641_v12 = vpop.f32.mrb[115].mxu0  ;;  %v2490_v48 = vmul.f32 %v6633_v13, %v6633_v13 }
 0x3e8   :  { %7910 = vst [vmem:[#allocation73_spill] sm:$0xff] %v6641_v12  ;;  %v6645_v28 = vadd.f32 %v2654_v0, %v2520_v18  ;;  %2324 = vadd.xlane.f32.xlu0 %v2323_v59  ;;  %v2528_v24 = vmul.f32 %v6641_v12, %v6641_v12  ;;  %v2332_v22 = vadd.f32 %v2331_v42, %v6633_v13 }
 0x3e9   :  { %v2620_v37 = vadd.f32 %v6533_v21, %v2489_v5  ;;  %v2663_v61 = vadd.f32 %v6331_v34, %v2527_v41  ;;  %v6653_v44 = vadd.f32 %v2374_v51, %v6641_v12  ;;  %v6655_v29 = vpop.f32.mrb[106].mxu1 }
 0x3ea   :  { %v2497_v49 = vmul.f32 %v6655_v29, %v6655_v29  ;;  %2333 = vadd.xlane.f32.xlu1 %v2332_v22  ;;  %v6659_v18 = vpop.f32.mrb[116].mxu0  ;;  %v6661_v59 = vpop.f32.mrb[107].mxu1  ;;  %v2340_v42 = vadd.f32 %v6541_v11, %v6655_v29 }
 0x3eb   :  { %7911 = vst [vmem:[#allocation74_spill] sm:$0xff] %v6659_v18  ;;  %v2621_v0 = vadd.f32 %v2620_v37, %v2490_v48  ;;  %v2383_v34 = vadd.f32 %v6352_v60, %v6659_v18  ;;  %v2535_v21 = vmul.f32 %v6659_v18, %v6659_v18  ;;  %v6669_v5 = vpop.f32.mrb[117].mxu0  ;;  %v2498_v51 = vmul.f32 %v6661_v59, %v6661_v59 }
 0x3ec   :  { %7912 = vst [vmem:[#allocation75_spill] sm:$0xff] %v6669_v5  ;;  %v6673_v41 = vadd.f32 %v2663_v61, %v2528_v24  ;;  %2613 = vadd.xlane.f32.xlu0 %v2612_v17  ;;  %v2536_v48 = vmul.f32 %v6669_v5, %v6669_v5  ;;  %v2341_v22 = vadd.f32 %v2340_v42, %v6661_v59 }
 0x3ed   :  { %v2629_v11 = vadd.f32 %v6561_v15, %v2497_v49  ;;  %v2672_v60 = vadd.f32 %v6360_v16, %v2535_v21  ;;  %v6681_v37 = vadd.f32 %v2383_v34, %v6669_v5  ;;  %v6683_v12 = vpop.f32.mrb[108].mxu1 }
 0x3ee   :  { %v2505_v18 = vmul.f32 %v6683_v12, %v6683_v12  ;;  %2622 = vadd.xlane.f32.xlu1 %v2621_v0  ;;  %v6687_v24 = vpop.f32.mrb[118].mxu0  ;;  %v6689_v17 = vpop.f32.mrb[109].mxu1  ;;  %v2349_v61 = vadd.f32 %v6569_v8, %v6683_v12 }
 0x3ef   :  { %7913 = vst [vmem:[#allocation76_spill] sm:$0xff] %v6687_v24  ;;  %v2630_v42 = vadd.f32 %v2629_v11, %v2498_v51  ;;  %v2392_v16 = vadd.f32 %v6379_v63, %v6687_v24  ;;  %v2543_v15 = vmul.f32 %v6687_v24, %v6687_v24  ;;  %v6697_v49 = vpop.f32.mrb[119].mxu0  ;;  %v2506_v34 = vmul.f32 %v6689_v17, %v6689_v17 }
 0x3f0   :  { %7914 = vst [vmem:[#allocation77_spill] sm:$0xff] %v6697_v49  ;;  %v6701_v0 = vadd.f32 %v2672_v60, %v2536_v48  ;;  %2342 = vadd.xlane.f32.xlu0 %v2341_v22  ;;  %v2544_v21 = vmul.f32 %v6697_v49, %v6697_v49  ;;  %v2350_v8 = vadd.f32 %v2349_v61, %v6689_v17 }
 0x3f1   :  { %v2638_v51 = vadd.f32 %v6589_v55, %v2505_v18  ;;  %v2681_v63 = vadd.f32 %v6389_v2, %v2543_v15  ;;  %v6709_v11 = vadd.f32 %v2392_v16, %v6697_v49  ;;  %v6711_v24 = vpop.f32.mrb[110].mxu1 }
 0x3f2   :  { %v2513_v5 = vmul.f32 %v6711_v24, %v6711_v24  ;;  %2351 = vadd.xlane.f32.xlu1 %v2350_v8  ;;  %v6715_v48 = vpop.f32.mrb[120].mxu0  ;;  %v6717_v22 = vpop.f32.mrb[111].mxu1  ;;  %v2358_v61 = vadd.f32 %v6597_v3, %v6711_v24 }
 0x3f3   :  { %7915 = vst [vmem:[#allocation78_spill] sm:$0xff] %v6715_v48  ;;  %v2639_v60 = vadd.f32 %v2638_v51, %v2506_v34  ;;  %v2401_v2 = vadd.f32 %v6411_v20, %v6715_v48  ;;  %v2551_v55 = vmul.f32 %v6715_v48, %v6715_v48  ;;  %v6725_v18 = vpop.f32.mrb[121].mxu0  ;;  %v2514_v16 = vmul.f32 %v6717_v22, %v6717_v22 }
 0x3f4   :  { %7916 = vst [vmem:[#allocation79_spill] sm:$0xff] %v6725_v18  ;;  %v6729_v15 = vadd.f32 %v2681_v63, %v2544_v21  ;;  %2631 = vadd.xlane.f32.xlu0 %v2630_v42  ;;  %v2552_v34 = vmul.f32 %v6725_v18, %v6725_v18  ;;  %v2359_v8 = vadd.f32 %v2358_v61, %v6717_v22 }
 0x3f5   :  { %v2647_v3 = vadd.f32 %v6617_v6, %v2513_v5  ;;  %v2690_v20 = vadd.f32 %v6421_v52, %v2551_v55  ;;  %v6737_v51 = vadd.f32 %v2401_v2, %v6725_v18  ;;  %v6739_v49 = vpop.f32.mrb[112].mxu1 }
 0x3f6   :  { %v2521_v48 = vmul.f32 %v6739_v49, %v6739_v49  ;;  %2640 = vadd.xlane.f32.xlu1 %v2639_v60  ;;  %v6743_v21 = vpop.f32.mrb[122].mxu0  ;;  %v6745_v42 = vpop.f32.mrb[113].mxu1  ;;  %v2367_v63 = vadd.f32 %v6625_v47, %v6739_v49 }
 0x3f7   :  { %7917 = vst [vmem:[#allocation80_spill] sm:$0xff] %v6743_v21  ;;  %7918 = vst [vmem:[#allocation81_spill] sm:$0xff] %v6745_v42  ;;  %v2648_v61 = vadd.f32 %v2647_v3, %v2514_v16  ;;  %v2410_v52 = vadd.f32 %v6443_v19, %v6743_v21  ;;  %v2559_v6 = vmul.f32 %v6743_v21, %v6743_v21  ;;  %v6753_v5 = vpop.f32.mrb[123].mxu0 }
 0x3f8   :  { %7919 = vst [vmem:[#allocation82_spill] sm:$0xff] %v6753_v5  ;;  %v2522_v2 = vmul.f32 %v6745_v42, %v6745_v42  ;;  %v6757_v60 = vadd.f32 %v2690_v20, %v2552_v34  ;;  %2360 = vadd.xlane.f32.xlu0 %v2359_v8  ;;  %v2560_v55 = vmul.f32 %v6753_v5, %v6753_v5 }
 0x3f9   :  { %v2368_v47 = vadd.f32 %v2367_v63, %v6745_v42  ;;  %v2656_v16 = vadd.f32 %v6645_v28, %v2521_v48  ;;  %v2699_v19 = vadd.f32 %v6453_v10, %v2559_v6  ;;  %v6765_v3 = vadd.f32 %v2410_v52, %v6753_v5  ;;  %v6767_v21 = vpop.f32.mrb[114].mxu1 }
 0x3fa   :  { %7920 = vst [vmem:[#allocation83_spill] sm:$0xff] %v6767_v21  ;;  %v2529_v18 = vmul.f32 %v6767_v21, %v6767_v21  ;;  %v6771_v34 = vpop.f32.mrb[124].mxu0  ;;  %v6773_v8 = vpop.f32.mrb[115].mxu1  ;;  %v2376_v63 = vadd.f32 %v6653_v44, %v6767_v21 }
 0x3fb   :  { %2369 = vadd.xlane.f32.xlu1 %v2368_v47  ;;  %7921 = vst [vmem:[#allocation84_spill] sm:$0xff] %v6771_v34  ;;  %7922 = vst [vmem:[#allocation85_spill] sm:$0xff] %v6773_v8  ;;  %v2657_v20 = vadd.f32 %v2656_v16, %v2522_v2  ;;  %v2419_v10 = vadd.f32 %v6475_v9, %v6771_v34  ;;  %v2567_v28 = vmul.f32 %v6771_v34, %v6771_v34  ;;  %v6781_v48 = vpop.f32.mrb[125].mxu0 }
 0x3fc   :  { %7923 = vst [vmem:[#allocation86_spill] sm:$0xff] %v6781_v48  ;;  %v2530_v52 = vmul.f32 %v6773_v8, %v6773_v8  ;;  %v2700_v6 = vadd.f32 %v2699_v19, %v2560_v55  ;;  %2649 = vadd.xlane.f32.xlu0 %v2648_v61  ;;  %v2568_v47 = vmul.f32 %v6781_v48, %v6781_v48 }
 0x3fd   :  { %v2377_v2 = vadd.f32 %v2376_v63, %v6773_v8  ;;  %v2665_v44 = vadd.f32 %v6673_v41, %v2529_v18  ;;  %v2708_v16 = vadd.f32 %v6483_v58, %v2567_v28  ;;  %v2420_v9 = vadd.f32 %v2419_v10, %v6781_v48  ;;  %v6791_v5 = vpop.f32.mrb[116].mxu1  ;;  %v2855_v8 = vld [vmem:[%s7729_s5 + $0x20] sm:$0xff] }
 0x3fe   :  { %v2537_v34 = vmul.f32 %v6791_v5, %v6791_v5  ;;  %v6795_v21 = vpop.f32.mrb[126].mxu0  ;;  %v6797_v61 = vpop.f32.mrb[117].mxu1  ;;  %v2385_v55 = vadd.f32 %v6681_v37, %v6791_v5 }
 0x3ff   :  { %2658 = vadd.xlane.f32.xlu1 %v2657_v20  ;;  %7924 = vst [vmem:[#allocation87_spill] sm:$0xff] %v6795_v21  ;;  %v2666_v19 = vadd.f32 %v2665_v44, %v2530_v52  ;;  %v2428_v41 = vadd.f32 %v6505_v45, %v6795_v21  ;;  %v2575_v58 = vmul.f32 %v6795_v21, %v6795_v21  ;;  %v6805_v18 = vpop.f32.mrb[127].mxu0 }
 0x400   :  { %7925 = vst [vmem:[#allocation88_spill] sm:$0xff] %v6805_v18  ;;  %v2538_v63 = vmul.f32 %v6797_v61, %v6797_v61  ;;  %v2709_v20 = vadd.f32 %v2708_v16, %v2568_v47  ;;  %2378 = vadd.xlane.f32.xlu0 %v2377_v2  ;;  %v2576_v10 = vmul.f32 %v6805_v18, %v6805_v18 }
 0x401   :  { %v2386_v28 = vadd.f32 %v2385_v55, %v6797_v61  ;;  %v2674_v37 = vadd.f32 %v6701_v0, %v2537_v34  ;;  %v2717_v52 = vadd.f32 %v6515_v30, %v2575_v58  ;;  %v2429_v45 = vadd.f32 %v2428_v41, %v6805_v18  ;;  %v6815_v44 = vpop.f32.mrb[118].mxu1 }
 0x402   :  { %7926 = vst [vmem:[#allocation89_spill] sm:$0xff] %v6815_v44  ;;  %v2545_v21 = vmul.f32 %v6815_v44, %v6815_v44  ;;  %v6819_v48 = vpop.f32.mrb[119].mxu1  ;;  %v2394_v2 = vadd.f32 %v6709_v11, %v6815_v44 }
 0x403   :  { %2387 = vadd.xlane.f32.xlu1 %v2386_v28  ;;  %7927 = vst [vmem:[#allocation90_spill] sm:$0xff] %v6819_v48  ;;  %v2675_v47 = vadd.f32 %v2674_v37, %v2538_v63  ;;  %v2718_v16 = vadd.f32 %v2717_v52, %v2576_v10  ;;  %v2546_v0 = vmul.f32 %v6819_v48, %v6819_v48 }
 0x404   :  { %2667 = vadd.xlane.f32.xlu0 %v2666_v19  ;;  %v2395_v30 = vadd.f32 %v2394_v2, %v6819_v48  ;;  %v2683_v34 = vadd.f32 %v6729_v15, %v2545_v21 }
 0x405   :  { %v6827_v55 = vpop.f32.mrb[120].mxu1 }
 0x406   :  { %7928 = vst [vmem:[#allocation91_spill] sm:$0xff] %v6827_v55  ;;  %v2553_v41 = vmul.f32 %v6827_v55, %v6827_v55  ;;  %v6831_v58 = vpop.f32.mrb[121].mxu1  ;;  %v2403_v11 = vadd.f32 %v6737_v51, %v6827_v55  ;;  %v2684_v63 = vadd.f32 %v2683_v34, %v2546_v0  ;;  %v2792_v55 = vld [vmem:[%s7728_s4 + $0x28] sm:$0xff] }
 0x407   :  { %2676 = vadd.xlane.f32.xlu1 %v2675_v47  ;;  %7929 = vst [vmem:[#allocation92_spill] sm:$0xff] %v6831_v58  ;;  %v2554_v10 = vmul.f32 %v6831_v58, %v6831_v58 }
 0x408   :  { %2396 = vadd.xlane.f32.xlu0 %v2395_v30  ;;  %v2404_v19 = vadd.f32 %v2403_v11, %v6831_v58  ;;  %v2692_v15 = vadd.f32 %v6757_v60, %v2553_v41 }
 0x409   :  { %v6839_v21 = vpop.f32.mrb[122].mxu1 }
 0x40a   :  { %7930 = vst [vmem:[#allocation93_spill] sm:$0xff] %v6839_v21  ;;  %v2561_v28 = vmul.f32 %v6839_v21, %v6839_v21  ;;  %v6843_v37 = vpop.f32.mrb[123].mxu1  ;;  %v2693_v52 = vadd.f32 %v2692_v15, %v2554_v10  ;;  %v2412_v51 = vadd.f32 %v6765_v3, %v6839_v21 }
 0x40b   :  { %2405 = vadd.xlane.f32.xlu1 %v2404_v19  ;;  %7931 = vst [vmem:[#allocation94_spill] sm:$0xff] %v6843_v37  ;;  %v2562_v47 = vmul.f32 %v6843_v37, %v6843_v37 }
 0x40c   :  { %2685 = vadd.xlane.f32.xlu0 %v2684_v63  ;;  %v2413_v2 = vadd.f32 %v2412_v51, %v6843_v37  ;;  %v2701_v0 = vadd.f32 %v2700_v6, %v2561_v28 }
 0x40d   :  { %v6850_v60 = vpop.f32.mrb[124].mxu1 }
 0x40e   :  { %7932 = vst [vmem:[#allocation95_spill] sm:$0xff] %v6850_v60  ;;  %v2569_v30 = vmul.f32 %v6850_v60, %v6850_v60  ;;  %v6854_v34 = vpop.f32.mrb[125].mxu1  ;;  %v2421_v41 = vadd.f32 %v2420_v9, %v6850_v60  ;;  %v2702_v11 = vadd.f32 %v2701_v0, %v2562_v47 }
 0x40f   :  { %2694 = vadd.xlane.f32.xlu1 %v2693_v52  ;;  %7933 = vst [vmem:[#allocation96_spill] sm:$0xff] %v6854_v34  ;;  %v2570_v3 = vmul.f32 %v6854_v34, %v6854_v34 }
 0x410   :  { %2414 = vadd.xlane.f32.xlu0 %v2413_v2  ;;  %v2422_v63 = vadd.f32 %v2421_v41, %v6854_v34  ;;  %v2710_v10 = vadd.f32 %v2709_v20, %v2569_v30 }
 0x411   :  { %v6860_v19 = vpop.f32.mrb[126].mxu1 }
 0x412   :  { %7934 = vst [vmem:[#allocation97_spill] sm:$0xff] %v6860_v19  ;;  %v2577_v6 = vmul.f32 %v6860_v19, %v6860_v19  ;;  %v6864_v15 = vpop.f32.mrb[127].mxu1  ;;  %v2711_v28 = vadd.f32 %v2710_v10, %v2570_v3  ;;  %v2430_v52 = vadd.f32 %v2429_v45, %v6860_v19 }
 0x413   :  { %2423 = vadd.xlane.f32.xlu1 %v2422_v63  ;;  %7935 = vst [vmem:[#allocation98_spill] sm:$0xff] %v6864_v15  ;;  %v2578_v9 = vmul.f32 %v6864_v15, %v6864_v15 }
 0x414   :  { %2703 = vadd.xlane.f32.xlu0 %v2702_v11  ;;  %v2431_v51 = vadd.f32 %v2430_v52, %v6864_v15  ;;  %v2719_v47 = vadd.f32 %v2718_v16, %v2577_v6 }
 0x416   :  { %v2720_v20 = vadd.f32 %v2719_v47, %v2578_v9 }
 0x417   :  { %2712 = vadd.xlane.f32.xlu1 %v2711_v28 }
 0x418   :  { %2432 = vadd.xlane.f32.xlu0 %v2431_v51 }
 0x41c   :  { %2721 = vadd.xlane.f32.xlu0 %v2720_v20 }
 0x467   :  { %v2298_v2 = vpop.xlane.xlu0 %2297 }
 0x468   :  { %v2435_v0 = vmul.f32 0.0009765625, %v2298_v2 }
 0x469   :  { %v2587_v30 = vpop.xlane.xlu1 %2586 }
 0x46a   :  { %v2739_v41 = vmul.f32 %v2435_v0, %v2435_v0  ;;  %v2723_v63 = vmul.f32 0.0009765625, %v2587_v30 }
 0x46c   :  { %v2755_v18 = vsub.f32 %v2723_v63, %v2739_v41 }
 0x46d   :  { %v2596_v3 = vpop.xlane.xlu0 %2595  ;;  %v2307_v10 = vpop.xlane.xlu1 %2306 }
 0x46e   :  { %v2771_v45 = vmax.f32 %v2755_v18, 0.0  ;;  %v2436_v19 = vmul.f32 0.0009765625, %v2307_v10  ;;  %v2724_v21 = vmul.f32 0.0009765625, %v2596_v3 }
 0x470   :  { %v2803_v37 = vadd.f32 1e-05, %v2771_v45  ;;  %v2740_v11 = vmul.f32 %v2436_v19, %v2436_v19 }
 0x471   :  { %v2605_v34 = vpop.xlane.xlu1 %2604  ;;  %v2316_v52 = vpop.xlane.xlu0 %2315 }
 0x472   :  { %4275 = vrsqrt.f32 %v2803_v37  ;;  %v2756_v16 = vsub.f32 %v2724_v21, %v2740_v11  ;;  %v6870_v6 = vmul.f32 0.0009765625, %v2316_v52  ;;  %v2725_v9 = vmul.f32 0.0009765625, %v2605_v34  ;;  %v2787_v34 = vld [vmem:[%s7728_s4] sm:$0xff] }
 0x474   :  { %v2772_v28 = vmax.f32 %v2756_v16, 0.0  ;;  %v2741_v51 = vmul.f32 %v6870_v6, %v6870_v6 }
 0x475   :  { %v2325_v47 = vpop.xlane.xlu0 %2324 }
 0x476   :  { %v2804_v20 = vadd.f32 1e-05, %v2772_v28  ;;  %v2757_v2 = vsub.f32 %v2725_v9, %v2741_v51  ;;  %v6874_v30 = vmul.f32 0.0009765625, %v2325_v47 }
 0x477   :  { %v2334_v18 = vpop.xlane.xlu1 %2333 }
 0x478   :  { %4277 = vrsqrt.f32 %v2804_v20  ;;  %v2773_v41 = vmax.f32 %v2757_v2, 0.0  ;;  %v6876_v63 = vmul.f32 0.0009765625, %v2334_v18  ;;  %v2742_v21 = vmul.f32 %v6874_v30, %v6874_v30 }
 0x479   :  { %v2614_v3 = vpop.xlane.xlu0 %2613 }
 0x47a   :  { %v2805_v37 = vadd.f32 1e-05, %v2773_v41  ;;  %v2726_v10 = vmul.f32 0.0009765625, %v2614_v3  ;;  %v2743_v52 = vmul.f32 %v6876_v63, %v6876_v63  ;;  %v2788_v41 = vld [vmem:[%s7728_s4 + $0x8] sm:$0xff] }
 0x47b   :  { %v2623_v45 = vpop.xlane.xlu1 %2622 }
 0x47c   :  { %v4276_v11 = vpop.eup %4275  ;;  %4279 = vrsqrt.f32 %v2805_v37  ;;  %v2758_v16 = vsub.f32 %v2726_v10, %v2742_v21  ;;  %v2727_v28 = vmul.f32 0.0009765625, %v2623_v45 }
 0x47d   :  { %v2343_v9 = vpop.xlane.xlu0 %2342  ;;  %v2835_v51 = vmul.f32 %v4276_v11, %v2787_v34 }
 0x47e   :  { %v2774_v47 = vmax.f32 %v2758_v16, 0.0  ;;  %v2759_v20 = vsub.f32 %v2727_v28, %v2743_v52  ;;  %v6885_v2 = vmul.f32 0.0009765625, %v2343_v9  ;;  %v2789_v16 = vld [vmem:[%s7728_s4 + $0x10] sm:$0xff] }
 0x47f   :  { %v2352_v18 = vpop.xlane.xlu1 %2351  ;;  %2901 = vperm.xlu1 %4273, %v2835_v51   ;;  %v2867_v11 = vmul.f32 %v2835_v51, %v2435_v0 }
 0x480   :  { %v2806_v3 = vadd.f32 1e-05, %v2774_v47  ;;  %v2775_v15 = vmax.f32 %v2759_v20, 0.0  ;;  %v6890_v37 = vmul.f32 0.0009765625, %v2352_v18  ;;  %v2744_v10 = vmul.f32 %v6885_v2, %v6885_v2 }
 0x481   :  { %v2632_v60 = vpop.xlane.xlu0 %2631 }
 0x482   :  { %v4278_v48 = vpop.eup %4277  ;;  %4281 = vrsqrt.f32 %v2806_v3  ;;  %v2807_v21 = vadd.f32 1e-05, %v2775_v15  ;;  %v2728_v34 = vmul.f32 0.0009765625, %v2632_v60  ;;  %v2745_v28 = vmul.f32 %v6890_v37, %v6890_v37  ;;  %v2851_v15 = vld [vmem:[%s7729_s5] sm:$0xff] }
 0x483   :  { %v2836_v45 = vmul.f32 %v4278_v48, %v2788_v41  ;;  %v2641_v52 = vpop.xlane.xlu1 %2640  ;;  %v2883_v3 = vsub.f32 %v2851_v15, %v2867_v11 }
 0x484   :  { %4283 = vrsqrt.f32 %v2807_v21  ;;  %v2760_v9 = vsub.f32 %v2728_v34, %v2744_v10  ;;  %v2729_v47 = vmul.f32 0.0009765625, %v2641_v52  ;;  %v2852_v21 = vld [vmem:[%s7729_s5 + $0x8] sm:$0xff]  ;;  %v2853_v10 = vld [vmem:[%s7729_s5 + $0x10] sm:$0xff] }
 0x485   :  { %v2361_v20 = vpop.xlane.xlu0 %2360  ;;  %2906 = vperm.xlu0 %4274, %v2836_v45   ;;  %v2868_v51 = vmul.f32 %v2836_v45, %v2436_v19 }
 0x486   :  { %v4280_v60 = vpop.eup %4279  ;;  %v2776_v48 = vmax.f32 %v2760_v9, 0.0  ;;  %v2761_v0 = vsub.f32 %v2729_v47, %v2745_v28  ;;  %v6908_v52 = vmul.f32 0.0009765625, %v2361_v20 }
 0x487   :  { %v2837_v18 = vmul.f32 %v4280_v60, %v2789_v16  ;;  %v2884_v16 = vsub.f32 %v2852_v21, %v2868_v51 }
 0x488   :  { %v2370_v41 = vpop.xlane.xlu1 %2369  ;;  %v2777_v34 = vmax.f32 %v2761_v0, 0.0  ;;  %v2808_v19 = vadd.f32 1e-05, %v2776_v48  ;;  %v2746_v0 = vmul.f32 %v6908_v52, %v6908_v52  ;;  %v2791_v48 = vld [vmem:[%s7728_s4 + $0x20] sm:$0xff] }
 0x489   :  { %v6910_v44 = vmul.f32 0.0009765625, %v2370_v41  ;;  %v2869_v9 = vmul.f32 %v2837_v18, %v6870_v6  ;;  %v2650_v28 = vpop.xlane.xlu0 %2649  ;;  %2911 = vperm.xlu1 %4273, %v2837_v18   ;;  %3109 = vperm.xlu0 %4274, %v2883_v3   ;;  %v2790_v6 = vld [vmem:[%s7728_s4 + $0x18] sm:$0xff] }
 0x48a   :  { %v2809_v45 = vadd.f32 1e-05, %v2777_v34  ;;  %v2730_v11 = vmul.f32 0.0009765625, %v2650_v28 }
 0x48b   :  { %v2885_v47 = vsub.f32 %v2853_v10, %v2869_v9  ;;  %v2747_v20 = vmul.f32 %v6910_v44, %v6910_v44 }
 0x48c   :  { %v2659_v15 = vpop.xlane.xlu1 %2658  ;;  %v4282_v60 = vpop.eup %4281  ;;  %4285 = vrsqrt.f32 %v2809_v45  ;;  %v2762_v3 = vsub.f32 %v2730_v11, %v2746_v0 }
 0x48d   :  { %v2731_v41 = vmul.f32 0.0009765625, %v2659_v15  ;;  %v2379_v51 = vpop.xlane.xlu0 %2378  ;;  %3114 = vperm.xlu1 %4273, %v2884_v16   ;;  %3119 = vperm.xlu0 %4274, %v2885_v47   ;;  %4287 = vrsqrt.f32 %v2808_v19  ;;  %v2838_v34 = vmul.f32 %v4282_v60, %v2790_v6 }
 0x48e   :  { %v4284_v18 = vpop.eup %4283  ;;  %v6923_v45 = vmul.f32 0.0009765625, %v2379_v51  ;;  %v2778_v47 = vmax.f32 %v2762_v3, 0.0  ;;  %v2854_v51 = vld [vmem:[%s7729_s5 + $0x18] sm:$0xff] }
 0x48f   :  { %v2763_v21 = vsub.f32 %v2731_v41, %v2747_v20  ;;  %v2839_v9 = vmul.f32 %v4284_v18, %v2791_v48  ;;  %v2870_v60 = vmul.f32 %v2838_v34, %v6874_v30 }
 0x490   :  { %v2388_v10 = vpop.xlane.xlu1 %2387  ;;  %v2748_v41 = vmul.f32 %v6923_v45, %v6923_v45  ;;  %v2810_v30 = vadd.f32 1e-05, %v2778_v47 }
 0x491   :  { %v2779_v28 = vmax.f32 %v2763_v21, 0.0  ;;  %v6925_v15 = vmul.f32 0.0009765625, %v2388_v10  ;;  %v2668_v58 = vpop.xlane.xlu0 %2667  ;;  %2916 = vperm.xlu1 %4273, %v2838_v34   ;;  %v2871_v16 = vmul.f32 %v2839_v9, %v6876_v63  ;;  %v2886_v10 = vsub.f32 %v2854_v51, %v2870_v60 }
 0x492   :  { %v2732_v11 = vmul.f32 0.0009765625, %v2668_v58  ;;  %v2793_v58 = vld [vmem:[%s7728_s4 + $0x30] sm:$0xff] }
 0x493   :  { %v2811_v19 = vadd.f32 1e-05, %v2779_v28  ;;  %v2887_v20 = vsub.f32 %v2855_v8, %v2871_v16  ;;  %v2749_v6 = vmul.f32 %v6925_v15, %v6925_v15 }
 0x494   :  { %v2677_v0 = vpop.xlane.xlu1 %2676  ;;  %v2764_v18 = vsub.f32 %v2732_v11, %v2748_v41 }
 0x495   :  { %4289 = vrsqrt.f32 %v2811_v19  ;;  %v2733_v48 = vmul.f32 0.0009765625, %v2677_v0  ;;  %v2397_v63 = vpop.xlane.xlu0 %2396  ;;  %2921 = vperm.xlu1 %4273, %v2839_v9   ;;  %3129 = vperm.xlu0 %4274, %v2887_v20   ;;  %v2857_v9 = vld [vmem:[%s7729_s5 + $0x30] sm:$0xff] }
 0x496   :  { %v4286_v8 = vpop.eup %4285  ;;  %v6942_v19 = vmul.f32 0.0009765625, %v2397_v63  ;;  %4291 = vrsqrt.f32 %v2810_v30  ;;  %v2780_v20 = vmax.f32 %v2764_v18, 0.0 }
 0x497   :  { %v2765_v3 = vsub.f32 %v2733_v48, %v2749_v6  ;;  %v2841_v34 = vmul.f32 %v4286_v8, %v2793_v58  ;;  %v4288_v28 = vpop.eup %4287 }
 0x498   :  { %v2406_v21 = vpop.xlane.xlu1 %2405  ;;  %v2840_v48 = vmul.f32 %v4288_v28, %v2792_v55  ;;  %v2750_v58 = vmul.f32 %v6942_v19, %v6942_v19  ;;  %v2812_v18 = vadd.f32 1e-05, %v2780_v20 }
 0x499   :  { %v2781_v16 = vmax.f32 %v2765_v3, 0.0  ;;  %v6944_v0 = vmul.f32 0.0009765625, %v2406_v21  ;;  %v2686_v47 = vpop.xlane.xlu0 %2685  ;;  %3124 = vperm.xlu1 %4273, %v2886_v10   ;;  %v2873_v11 = vmul.f32 %v2841_v34, %v6890_v37  ;;  %v2795_v3 = vld [vmem:[%s7728_s4 + $0x40] sm:$0xff] }
 0x49a   :  { %v2734_v41 = vmul.f32 0.0009765625, %v2686_v47  ;;  %v2872_v28 = vmul.f32 %v2840_v48, %v6885_v2 }
 0x49b   :  { %v2813_v60 = vadd.f32 1e-05, %v2781_v16  ;;  %v2889_v51 = vsub.f32 %v2857_v9, %v2873_v11  ;;  %v2751_v63 = vmul.f32 %v6944_v0, %v6944_v0 }
 0x49c   :  { %v2695_v6 = vpop.xlane.xlu1 %2694  ;;  %v2766_v21 = vsub.f32 %v2734_v41, %v2750_v58 }
 0x49d   :  { %4293 = vrsqrt.f32 %v2813_v60  ;;  %v2735_v8 = vmul.f32 0.0009765625, %v2695_v6  ;;  %v2415_v37 = vpop.xlane.xlu0 %2414  ;;  %2926 = vperm.xlu1 %4273, %v2840_v48   ;;  %3139 = vperm.xlu0 %4274, %v2889_v51   ;;  %v2856_v60 = vld [vmem:[%s7729_s5 + $0x28] sm:$0xff]  ;;  %v2859_v6 = vld [vmem:[%s7729_s5 + $0x40] sm:$0xff] }
 0x49e   :  { %v6961_v47 = vmul.f32 0.0009765625, %v2415_v37  ;;  %4295 = vrsqrt.f32 %v2812_v18  ;;  %v2782_v2 = vmax.f32 %v2766_v21, 0.0 }
 0x49f   :  { %v4290_v30 = vpop.eup %4289  ;;  %v2767_v55 = vsub.f32 %v2735_v8, %v2751_v63  ;;  %v2888_v63 = vsub.f32 %v2856_v60, %v2872_v28 }
 0x4a0   :  { %v2424_v10 = vpop.xlane.xlu1 %2423  ;;  %v2843_v16 = vmul.f32 %v4290_v30, %v2795_v3  ;;  %v4292_v3 = vpop.eup %4291  ;;  %v2752_v37 = vmul.f32 %v6961_v47, %v6961_v47 }
 0x4a1   :  { %v2783_v9 = vmax.f32 %v2767_v55, 0.0  ;;  %v6963_v11 = vmul.f32 0.0009765625, %v2424_v10  ;;  %v2704_v20 = vpop.xlane.xlu0 %2703  ;;  %2931 = vperm.xlu1 %4273, %v2841_v34   ;;  %v2797_v34 = vld [vmem:[%s7728_s4 + $0x50] sm:$0xff]  ;;  %v2814_v10 = vadd.f32 1e-05, %v2782_v2 }
 0x4a2   :  { %v2875_v41 = vmul.f32 %v2843_v16, %v6910_v44  ;;  %v2736_v51 = vmul.f32 0.0009765625, %v2704_v20  ;;  %v2794_v44 = vld [vmem:[%s7728_s4 + $0x38] sm:$0xff] }
 0x4a3   :  { %v2815_v48 = vadd.f32 1e-05, %v2783_v9  ;;  %v2753_v30 = vmul.f32 %v6963_v11, %v6963_v11  ;;  %v2842_v60 = vmul.f32 %v4292_v3, %v2794_v44  ;;  %v2796_v44 = vld [vmem:[%s7728_s4 + $0x48] sm:$0xff] }
 0x4a4   :  { %v2713_v58 = vpop.xlane.xlu1 %2712  ;;  %v2891_v8 = vsub.f32 %v2859_v6, %v2875_v41  ;;  %v2768_v28 = vsub.f32 %v2736_v51, %v2752_v37 }
 0x4a5   :  { %4297 = vrsqrt.f32 %v2815_v48  ;;  %v2737_v55 = vmul.f32 0.0009765625, %v2713_v58  ;;  %3134 = vperm.xlu1 %4273, %v2888_v63   ;;  %v2433_v18 = vpop.xlane.xlu0 %2432  ;;  %v2861_v48 = vld [vmem:[%s7729_s5 + $0x50] sm:$0xff]  ;;  %v2874_v3 = vmul.f32 %v2842_v60, %v6908_v52 }
 0x4a6   :  { %3149 = vperm.xlu0 %4274, %v2891_v8   ;;  %v6982_v41 = vmul.f32 0.0009765625, %v2433_v18  ;;  %4299 = vrsqrt.f32 %v2814_v10  ;;  %v2784_v8 = vmax.f32 %v2768_v28, 0.0  ;;  %v2863_v28 = vld [vmem:[%s7729_s5 + $0x60] sm:$0xff] }
 0x4a7   :  { %v4294_v21 = vpop.eup %4293  ;;  %v2769_v9 = vsub.f32 %v2737_v55, %v2753_v30  ;;  %v2858_v55 = vld [vmem:[%s7729_s5 + $0x38] sm:$0xff] }
 0x4a8   :  { %v2845_v6 = vmul.f32 %v4294_v21, %v2797_v34  ;;  %v4296_v37 = vpop.eup %4295  ;;  %v2754_v30 = vmul.f32 %v6982_v41, %v6982_v41  ;;  %v2816_v34 = vadd.f32 1e-05, %v2784_v8  ;;  %v2890_v18 = vsub.f32 %v2858_v55, %v2874_v3  ;;  %v2865_v3 = vld [vmem:[%s7729_s5 + $0x70] sm:$0xff] }
 0x4a9   :  { %v2785_v20 = vmax.f32 %v2769_v9, 0.0  ;;  %2936 = vperm.xlu1 %4273, %v2842_v60   ;;  %v2722_v58 = vpop.xlane.xlu0 %2721  ;;  %v2844_v10 = vmul.f32 %v4296_v37, %v2796_v44  ;;  %v2862_v44 = vld [vmem:[%s7729_s5 + $0x58] sm:$0xff] }
 0x4aa   :  { %2951 = vperm.xlu0 %4274, %v2845_v6   ;;  %v2877_v63 = vmul.f32 %v2845_v6, %v6925_v15  ;;  %v2738_v2 = vmul.f32 0.0009765625, %v2722_v58  ;;  %v2799_v15 = vld [vmem:[%s7728_s4 + $0x60] sm:$0xff]  ;;  %v2801_v58 = vld [vmem:[%s7728_s4 + $0x70] sm:$0xff] }
 0x4ab   :  { %v2817_v42 = vadd.f32 1e-05, %v2785_v20 }
 0x4ac   :  { %v2893_v51 = vsub.f32 %v2861_v48, %v2877_v63  ;;  %v2860_v48 = vld [vmem:[%s7729_s5 + $0x48] sm:$0xff]  ;;  %v2798_v63 = vld [vmem:[%s7728_s4 + $0x58] sm:$0xff] }
 0x4ad   :  { %4301 = vrsqrt.f32 %v2817_v42  ;;  %2941 = vperm.xlu1 %4273, %v2843_v16   ;;  %v2770_v42 = vsub.f32 %v2738_v2, %v2754_v30  ;;  %v2876_v16 = vmul.f32 %v2844_v10, %v6923_v45 }
 0x4ae   :  { %3159 = vperm.xlu0 %4274, %v2893_v51   ;;  %4303 = vrsqrt.f32 %v2816_v34 }
 0x4af   :  { %v4298_v52 = vpop.eup %4297  ;;  %v2786_v60 = vmax.f32 %v2770_v42, 0.0  ;;  %v2892_v2 = vsub.f32 %v2860_v48, %v2876_v16 }
 0x4b0   :  { %v2847_v21 = vmul.f32 %v4298_v52, %v2799_v15  ;;  %v4300_v20 = vpop.eup %4299  ;;  %v2800_v52 = vld [vmem:[%s7728_s4 + $0x68] sm:$0xff] }
 0x4b1   :  { %3144 = vperm.xlu1 %4273, %v2890_v18   ;;  %v2818_v8 = vadd.f32 1e-05, %v2786_v60  ;;  %v2846_v45 = vmul.f32 %v4300_v20, %v2798_v63  ;;  %v2866_v60 = vld [vmem:[%s7729_s5 + $0x78] sm:$0xff] }
 0x4b2   :  { %2961 = vperm.xlu0 %4274, %v2847_v21   ;;  %v2879_v9 = vmul.f32 %v2847_v21, %v6944_v0  ;;  %v2802_v21 = vld [vmem:[%s7728_s4 + $0x78] sm:$0xff] }
 0x4b3   :  { %4305 = vrsqrt.f32 %v2818_v8  ;;  %v2878_v55 = vmul.f32 %v2846_v45, %v6942_v19  ;;  %v2864_v19 = vld [vmem:[%s7729_s5 + $0x68] sm:$0xff] }
 0x4b4   :  { %v2895_v6 = vsub.f32 %v2863_v28, %v2879_v9 }
 0x4b5   :  { %2946 = vperm.xlu1 %4273, %v2844_v10   ;;  %v2894_v34 = vsub.f32 %v2862_v44, %v2878_v55 }
 0x4b6   :  { %3169 = vperm.xlu0 %4274, %v2895_v6  }
 0x4b7   :  { %v4302_v0 = vpop.eup %4301 }
 0x4b8   :  { %v2849_v51 = vmul.f32 %v4302_v0, %v2801_v58  ;;  %v4304_v15 = vpop.eup %4303 }
 0x4b9   :  { %3154 = vperm.xlu1 %4273, %v2892_v2   ;;  %v2848_v42 = vmul.f32 %v4304_v15, %v2800_v52 }
 0x4ba   :  { %2971 = vperm.xlu0 %4274, %v2849_v51   ;;  %v2881_v37 = vmul.f32 %v2849_v51, %v6963_v11 }
 0x4bb   :  { %v2880_v11 = vmul.f32 %v2848_v42, %v6961_v47 }
 0x4bc   :  { %v2897_v30 = vsub.f32 %v2865_v3, %v2881_v37 }
 0x4bd   :  { %2956 = vperm.xlu1 %4273, %v2846_v45   ;;  %v4306_v18 = vpop.eup %4305  ;;  %v2896_v10 = vsub.f32 %v2864_v19, %v2880_v11  ;;  %v4309_v11 = vld [vmem:[%s7724_s0 + $0x100] sm:$0xff] }
 0x4be   :  { %3179 = vperm.xlu0 %4274, %v2897_v30   ;;  %v2850_v28 = vmul.f32 %v4306_v18, %v2802_v21  ;;  %v4310_v19 = vld [vmem:[%s7724_s0 + $0x180] sm:$0xff] }
 0x4c0   :  { %v2882_v9 = vmul.f32 %v2850_v28, %v6982_v41 }
 0x4c1   :  { %3164 = vperm.xlu1 %4273, %v2894_v34   ;;  %v4307_v34 = vld [vmem:[%s7724_s0] sm:$0xff] }
 0x4c2   :  { %v2898_v47 = vsub.f32 %v2866_v60, %v2882_v9  ;;  %v4312_v9 = vld [vmem:[%s7724_s0 + $0x280] sm:$0xff] }
 0x4c5   :  { %2966 = vperm.xlu1 %4273, %v2848_v42  }
 0x4c9   :  { %3174 = vperm.xlu1 %4273, %v2896_v10   ;;  %v4311_v10 = vld [vmem:[%s7724_s0 + $0x200] sm:$0xff] }
 0x4cd   :  { %2976 = vperm.xlu1 %4273, %v2850_v28  }
 0x4d1   :  { %3184 = vperm.xlu1 %4273, %v2898_v47   ;;  %v4313_v47 = vld [vmem:[%s7724_s0 + $0x300] sm:$0xff] }
 0x4fe   :  { %v2902_v6 = vpop.permute.xlu1 %2901 }
 0x4ff   :  { %v2979_v20 = vmul.f32 %v2902_v6, %v6020_v4  ;;  %v2980_v48 = vmul.f32 %v2902_v6, %v6024_v35  ;;  %v2981_v58 = vmul.f32 %v2902_v6, %v6070_v40  ;;  %v2982_v63 = vmul.f32 %v2902_v6, %v6075_v56 }
 0x500   :  { %v2983_v0 = vmul.f32 %v2902_v6, %v6358_v26  ;;  %v2984_v41 = vmul.f32 %v2902_v6, %v6371_v36  ;;  %v2985_v8 = vmul.f32 %v2902_v6, %v6513_v57  ;;  %v2986_v2 = vmul.f32 %v2902_v6, %v6521_v1  ;;  %v7937_v1 = vld [vmem:[#allocation54_spill] sm:$0xff] }
 0x504   :  { %v2907_v16 = vpop.permute.xlu0 %2906 }
 0x505   :  { %v2987_v51 = vmul.f32 %v2907_v16, %v6030_v46  ;;  %v2988_v45 = vmul.f32 %v2907_v16, %v6034_v23  ;;  %v2989_v4 = vmul.f32 %v2907_v16, %v6092_v38  ;;  %v2990_v35 = vmul.f32 %v2907_v16, %v6099_v7 }
 0x506   :  { %v7049_v40 = vmul.f32 %v2907_v16, %v6387_v50  ;;  %v7052_v56 = vmul.f32 %v2907_v16, %v6401_v54  ;;  %v7055_v26 = vmul.f32 %v2907_v16, %v6543_v43  ;;  %v7058_v36 = vmul.f32 %v2907_v16, %v6549_v33  ;;  %v7936_v54 = vld [vmem:[#allocation52_spill] sm:$0xff]  ;;  %v4314_v16 = vld [vmem:[%s7724_s0 + $0x380] sm:$0xff] }
 0x508   :  { %v2912_v57 = vpop.permute.xlu1 %2911  ;;  %v3110_v46 = vpop.permute.xlu0 %3109 }
 0x509   :  { %v7061_v23 = vmul.f32 %v2912_v57, %v6040_v31  ;;  %v7064_v38 = vmul.f32 %v2912_v57, %v6044_v39  ;;  %v7067_v7 = vmul.f32 %v2912_v57, %v6116_v53  ;;  %v7070_v50 = vmul.f32 %v2912_v57, %v6123_v25 }
 0x50a   :  { %v7073_v43 = vmul.f32 %v2912_v57, %v7936_v54  ;;  %v7076_v33 = vmul.f32 %v2912_v57, %v7937_v1  ;;  %v7079_v3 = vmul.f32 %v2912_v57, %v6571_v32  ;;  %v7082_v31 = vmul.f32 %v2912_v57, %v6577_v62  ;;  %v4308_v32 = vld [vmem:[%s7724_s0 + $0x80] sm:$0xff] }
 0x50b   :  { %v3187_v39 = vadd.f32 %v3110_v46, %v2979_v20  ;;  %v3188_v37 = vadd.f32 %v3110_v46, %v2980_v48  ;;  %v3189_v30 = vadd.f32 %v3110_v46, %v2981_v58  ;;  %v3190_v53 = vadd.f32 %v3110_v46, %v2982_v63 }
 0x50c   :  { %v3191_v55 = vadd.f32 %v3110_v46, %v2983_v0  ;;  %v3192_v15 = vadd.f32 %v3110_v46, %v2984_v41  ;;  %v3193_v25 = vadd.f32 %v3110_v46, %v2985_v8  ;;  %v3194_v44 = vadd.f32 %v3110_v46, %v2986_v2  ;;  %v3115_v52 = vpop.permute.xlu1 %3114 }
 0x50d   :  { %v3315_v42 = vadd.f32 %v4307_v34, %v3187_v39  ;;  %v3316_v62 = vadd.f32 %v4308_v32, %v3188_v37  ;;  %v3317_v18 = vadd.f32 %v4309_v11, %v3189_v30  ;;  %v3318_v21 = vadd.f32 %v4310_v19, %v3190_v53  ;;  %v4316_v11 = vld [vmem:[%s7724_s0 + $0x88] sm:$0xff] }
 0x50e   :  { %v3319_v28 = vadd.f32 %v4311_v10, %v3191_v55  ;;  %v3320_v60 = vadd.f32 %v4312_v9, %v3192_v15  ;;  %v3321_v6 = vadd.f32 %v4313_v47, %v3193_v25  ;;  %v3322_v20 = vadd.f32 %v4314_v16, %v3194_v44 }
 0x50f   :  { %v3443_v48 = vmul.f32 0.2, %v3315_v42  ;;  %v3444_v58 = vmul.f32 0.2, %v3316_v62  ;;  %v3445_v63 = vmul.f32 0.2, %v3317_v18  ;;  %v3195_v0 = vadd.f32 %v3115_v52, %v2987_v51 }
 0x510   :  { %v3446_v41 = vmul.f32 0.2, %v3318_v21  ;;  %v3447_v8 = vmul.f32 0.2, %v3319_v28  ;;  %v3448_v2 = vmul.f32 0.2, %v3320_v60  ;;  %v3196_v57 = vadd.f32 %v3115_v52, %v2988_v45 }
 0x511   :  { %v3449_v46 = vmul.f32 0.2, %v3321_v6  ;;  %v3450_v54 = vmul.f32 0.2, %v3322_v20  ;;  %v3571_v1 = vmax.f32 %v3315_v42, %v3443_v48  ;;  %v3572_v39 = vmax.f32 %v3316_v62, %v3444_v58  ;;  %v3120_v62 = vpop.permute.xlu0 %3119 }
 0x512   :  { %v3573_v37 = vmax.f32 %v3317_v18, %v3445_v63  ;;  %v3574_v30 = vmax.f32 %v3318_v21, %v3446_v41  ;;  %v3575_v53 = vmax.f32 %v3319_v28, %v3447_v8  ;;  %v3576_v55 = vmax.f32 %v3320_v60, %v3448_v2  ;;  %v4320_v21 = vld [vmem:[%s7724_s0 + $0x288] sm:$0xff] }
 0x513   :  { %v3577_v15 = vmax.f32 %v3321_v6, %v3449_v46  ;;  %v3578_v25 = vmax.f32 %v3322_v20, %v3450_v54  ;;  %3699 = vst [vmem:[#allocation2] sm:$0xff] %v3571_v1  ;;  %3716 = vst [vmem:[#allocation2 + $0x80] sm:$0xff] %v3572_v39  ;;  %v3197_v44 = vadd.f32 %v3115_v52, %v2989_v4  ;;  %v4315_v4 = vld [vmem:[%s7724_s0 + $0x8] sm:$0xff] }
 0x514   :  { %v3198_v34 = vadd.f32 %v3115_v52, %v2990_v35  ;;  %3733 = vst [vmem:[#allocation2 + $0x100] sm:$0xff] %v3573_v37  ;;  %3750 = vst [vmem:[#allocation2 + $0x180] sm:$0xff] %v3574_v30  ;;  %v3199_v51 = vadd.f32 %v3115_v52, %v7049_v40  ;;  %v3200_v45 = vadd.f32 %v3115_v52, %v7052_v56  ;;  %v4317_v40 = vld [vmem:[%s7724_s0 + $0x108] sm:$0xff] }
 0x515   :  { %3767 = vst [vmem:[#allocation2 + $0x200] sm:$0xff] %v3575_v53  ;;  %3784 = vst [vmem:[#allocation2 + $0x280] sm:$0xff] %v3576_v55  ;;  %v3201_v42 = vadd.f32 %v3115_v52, %v7055_v26  ;;  %v3202_v32 = vadd.f32 %v3115_v52, %v7058_v36  ;;  %v3323_v35 = vadd.f32 %v4315_v4, %v3195_v0  ;;  %v4318_v26 = vld [vmem:[%s7724_s0 + $0x188] sm:$0xff] }
 0x516   :  { %3801 = vst [vmem:[#allocation2 + $0x300] sm:$0xff] %v3577_v15  ;;  %3818 = vst [vmem:[#allocation2 + $0x380] sm:$0xff] %v3578_v25  ;;  %v3324_v18 = vadd.f32 %v4316_v11, %v3196_v57  ;;  %v3325_v56 = vadd.f32 %v4317_v40, %v3197_v44  ;;  %v3326_v36 = vadd.f32 %v4318_v26, %v3198_v34  ;;  %v4319_v52 = vld [vmem:[%s7724_s0 + $0x208] sm:$0xff]  ;;  %v2917_v34 = vpop.permute.xlu1 %2916 }
 0x517   :  { %v3327_v19 = vadd.f32 %v4319_v52, %v3199_v51  ;;  %v3328_v10 = vadd.f32 %v4320_v21, %v3200_v45  ;;  %v4321_v28 = vld [vmem:[%s7724_s0 + $0x308] sm:$0xff]  ;;  %v3451_v6 = vmul.f32 0.2, %v3323_v35  ;;  %v3203_v48 = vadd.f32 %v3120_v62, %v7061_v23  ;;  %v4324_v51 = vld [vmem:[%s7724_s0 + $0x90] sm:$0xff]  ;;  %v7938_v52 = vld [vmem:[#allocation5_spill] sm:$0xff] }
 0x518   :  { %v3329_v9 = vadd.f32 %v4321_v28, %v3201_v42  ;;  %v4322_v60 = vld [vmem:[%s7724_s0 + $0x388] sm:$0xff]  ;;  %v3452_v16 = vmul.f32 0.2, %v3324_v18  ;;  %v3453_v20 = vmul.f32 0.2, %v3325_v56  ;;  %v3204_v41 = vadd.f32 %v3120_v62, %v7064_v38  ;;  %v4327_v42 = vld [vmem:[%s7724_s0 + $0x210] sm:$0xff] }
 0x519   :  { %v3330_v47 = vadd.f32 %v4322_v60, %v3202_v32  ;;  %v3454_v58 = vmul.f32 0.2, %v3326_v36  ;;  %v3455_v63 = vmul.f32 0.2, %v3327_v19  ;;  %v3456_v0 = vmul.f32 0.2, %v3328_v10 }
 0x51a   :  { %v3457_v8 = vmul.f32 0.2, %v3329_v9  ;;  %v3579_v57 = vmax.f32 %v3323_v35, %v3451_v6  ;;  %v3580_v46 = vmax.f32 %v3324_v18, %v3452_v16  ;;  %v3581_v54 = vmax.f32 %v3325_v56, %v3453_v20  ;;  %v4329_v35 = vld [vmem:[%s7724_s0 + $0x310] sm:$0xff] }
 0x51b   :  { %v3458_v2 = vmul.f32 0.2, %v3330_v47  ;;  %v3582_v1 = vmax.f32 %v3326_v36, %v3454_v58  ;;  %v3583_v39 = vmax.f32 %v3327_v19, %v3455_v63  ;;  %v3584_v37 = vmax.f32 %v3328_v10, %v3456_v0  ;;  %v4330_v18 = vld [vmem:[%s7724_s0 + $0x390] sm:$0xff] }
 0x51c   :  { %v3585_v30 = vmax.f32 %v3329_v9, %v3457_v8  ;;  %3700 = vst [vmem:[#allocation2 + $0x8] sm:$0xff] %v3579_v57  ;;  %3717 = vst [vmem:[#allocation2 + $0x88] sm:$0xff] %v3580_v46  ;;  %v3205_v55 = vadd.f32 %v3120_v62, %v7067_v7  ;;  %v3206_v23 = vadd.f32 %v3120_v62, %v7070_v50  ;;  %v4323_v7 = vld [vmem:[%s7724_s0 + $0x10] sm:$0xff]  ;;  %v7939_v9 = vld [vmem:[#allocation8_spill] sm:$0xff] }
 0x51d   :  { %v3586_v53 = vmax.f32 %v3330_v47, %v3458_v2  ;;  %3734 = vst [vmem:[#allocation2 + $0x108] sm:$0xff] %v3581_v54  ;;  %3751 = vst [vmem:[#allocation2 + $0x188] sm:$0xff] %v3582_v1  ;;  %v3207_v38 = vadd.f32 %v3120_v62, %v7073_v43  ;;  %v3208_v15 = vadd.f32 %v3120_v62, %v7076_v33  ;;  %v4325_v43 = vld [vmem:[%s7724_s0 + $0x110] sm:$0xff]  ;;  %v7941_v54 = vld [vmem:[#allocation16_spill] sm:$0xff] }
 0x51e   :  { %3768 = vst [vmem:[#allocation2 + $0x208] sm:$0xff] %v3583_v39  ;;  %3785 = vst [vmem:[#allocation2 + $0x288] sm:$0xff] %v3584_v37  ;;  %v3209_v25 = vadd.f32 %v3120_v62, %v7079_v3  ;;  %v3210_v44 = vadd.f32 %v3120_v62, %v7082_v31  ;;  %v3331_v50 = vadd.f32 %v4323_v7, %v3203_v48  ;;  %v4326_v3 = vld [vmem:[%s7724_s0 + $0x190] sm:$0xff]  ;;  %v7942_v39 = vld [vmem:[#allocation56_spill] sm:$0xff] }
 0x51f   :  { %3802 = vst [vmem:[#allocation2 + $0x308] sm:$0xff] %v3585_v30  ;;  %3819 = vst [vmem:[#allocation2 + $0x388] sm:$0xff] %v3586_v53  ;;  %v3332_v45 = vadd.f32 %v4324_v51, %v3204_v41  ;;  %v3333_v33 = vadd.f32 %v4325_v43, %v3205_v55  ;;  %v3334_v31 = vadd.f32 %v4326_v3, %v3206_v23  ;;  %v4328_v62 = vld [vmem:[%s7724_s0 + $0x290] sm:$0xff]  ;;  %v2922_v41 = vpop.permute.xlu1 %2921  ;;  %v7943_v30 = vld [vmem:[#allocation58_spill] sm:$0xff] }
 0x520   :  { %v3335_v32 = vadd.f32 %v4327_v42, %v3207_v38  ;;  %v3336_v4 = vadd.f32 %v4328_v62, %v3208_v15  ;;  %v3337_v11 = vadd.f32 %v4329_v35, %v3209_v25  ;;  %v3338_v40 = vadd.f32 %v4330_v18, %v3210_v44  ;;  %v7940_v57 = vld [vmem:[#allocation15_spill] sm:$0xff]  ;;  %v7944_v38 = vld [vmem:[#allocation9_spill] sm:$0xff]  ;;  %v7947_v51 = vld [vmem:[#allocation20_spill] sm:$0xff] }
 0x521   :  { %v3459_v56 = vmul.f32 0.2, %v3331_v50  ;;  %v3460_v26 = vmul.f32 0.2, %v3332_v45  ;;  %v3461_v36 = vmul.f32 0.2, %v3333_v33  ;;  %v7169_v19 = vmul.f32 %v2917_v34, %v7938_v52 }
 0x522   :  { %v3462_v21 = vmul.f32 0.2, %v3334_v31  ;;  %v3463_v10 = vmul.f32 0.2, %v3335_v32  ;;  %v3464_v28 = vmul.f32 0.2, %v3336_v4  ;;  %v7172_v60 = vmul.f32 %v2917_v34, %v7939_v9 }
 0x523   :  { %v3465_v47 = vmul.f32 0.2, %v3337_v11  ;;  %v3466_v6 = vmul.f32 0.2, %v3338_v40  ;;  %v3587_v16 = vmax.f32 %v3331_v50, %v3459_v56  ;;  %v3588_v20 = vmax.f32 %v3332_v45, %v3460_v26  ;;  %v7945_v25 = vld [vmem:[#allocation7_spill] sm:$0xff]  ;;  %v7948_v43 = vld [vmem:[#allocation60_spill] sm:$0xff]  ;;  %v3125_v26 = vpop.permute.xlu1 %3124 }
 0x524   :  { %v3589_v48 = vmax.f32 %v3333_v33, %v3461_v36  ;;  %v3590_v58 = vmax.f32 %v3334_v31, %v3462_v21  ;;  %v3591_v63 = vmax.f32 %v3335_v32, %v3463_v10  ;;  %v3592_v0 = vmax.f32 %v3336_v4, %v3464_v28  ;;  %v7946_v7 = vld [vmem:[#allocation19_spill] sm:$0xff]  ;;  %v7949_v3 = vld [vmem:[#allocation62_spill] sm:$0xff]  ;;  %v4331_v36 = vld [vmem:[%s7724_s0 + $0x20] sm:$0xff] }
 0x525   :  { %v3593_v8 = vmax.f32 %v3337_v11, %v3465_v47  ;;  %v3594_v2 = vmax.f32 %v3338_v40, %v3466_v6  ;;  %3701 = vst [vmem:[#allocation2 + $0x10] sm:$0xff] %v3587_v16  ;;  %3718 = vst [vmem:[#allocation2 + $0x90] sm:$0xff] %v3588_v20  ;;  %v7175_v46 = vmul.f32 %v2917_v34, %v7940_v57  ;;  %v7950_v42 = vld [vmem:[#allocation71_spill] sm:$0xff]  ;;  %v4332_v21 = vld [vmem:[%s7724_s0 + $0xa0] sm:$0xff] }
 0x526   :  { %v7178_v1 = vmul.f32 %v2917_v34, %v7941_v54  ;;  %3735 = vst [vmem:[#allocation2 + $0x110] sm:$0xff] %v3589_v48  ;;  %3752 = vst [vmem:[#allocation2 + $0x190] sm:$0xff] %v3590_v58  ;;  %v7181_v37 = vmul.f32 %v2917_v34, %v7942_v39  ;;  %v7184_v53 = vmul.f32 %v2917_v34, %v7943_v30  ;;  %v4333_v10 = vld [vmem:[%s7724_s0 + $0x120] sm:$0xff] }
 0x527   :  { %3769 = vst [vmem:[#allocation2 + $0x210] sm:$0xff] %v3591_v63  ;;  %3786 = vst [vmem:[#allocation2 + $0x290] sm:$0xff] %v3592_v0  ;;  %v7187_v55 = vmul.f32 %v2917_v34, %v6599_v14  ;;  %v7190_v23 = vmul.f32 %v2917_v34, %v6605_v27  ;;  %v3011_v15 = vmul.f32 %v2922_v41, %v7944_v38  ;;  %v3130_v27 = vpop.permute.xlu0 %3129  ;;  %v4334_v9 = vld [vmem:[%s7724_s0 + $0x1a0] sm:$0xff] }
 0x528   :  { %3803 = vst [vmem:[#allocation2 + $0x310] sm:$0xff] %v3593_v8  ;;  %3820 = vst [vmem:[#allocation2 + $0x390] sm:$0xff] %v3594_v2  ;;  %v3012_v44 = vmul.f32 %v2922_v41, %v7945_v25  ;;  %v3013_v50 = vmul.f32 %v2922_v41, %v7946_v7  ;;  %v3014_v45 = vmul.f32 %v2922_v41, %v7947_v51  ;;  %v4335_v6 = vld [vmem:[%s7724_s0 + $0x220] sm:$0xff] }
 0x529   :  { %v3015_v33 = vmul.f32 %v2922_v41, %v7948_v43  ;;  %v3016_v31 = vmul.f32 %v2922_v41, %v7949_v3  ;;  %v3017_v14 = vmul.f32 %v2922_v41, %v7950_v42  ;;  %v3018_v32 = vmul.f32 %v2922_v41, %v6633_v13  ;;  %v4336_v20 = vld [vmem:[%s7724_s0 + $0x2a0] sm:$0xff] }
 0x52a   :  { %v3219_v34 = vadd.f32 %v3130_v27, %v3011_v15  ;;  %v3220_v62 = vadd.f32 %v3130_v27, %v3012_v44  ;;  %v3221_v4 = vadd.f32 %v3130_v27, %v3013_v50  ;;  %v3222_v35 = vadd.f32 %v3130_v27, %v3014_v45  ;;  %v4337_v58 = vld [vmem:[%s7724_s0 + $0x320] sm:$0xff] }
 0x52b   :  { %v3223_v11 = vadd.f32 %v3130_v27, %v3015_v33  ;;  %v3224_v18 = vadd.f32 %v3130_v27, %v3016_v31  ;;  %v3225_v40 = vadd.f32 %v3130_v27, %v3017_v14  ;;  %v3226_v56 = vadd.f32 %v3130_v27, %v3018_v32  ;;  %v4338_v0 = vld [vmem:[%s7724_s0 + $0x3a0] sm:$0xff] }
 0x52c   :  { %v3347_v52 = vadd.f32 %v4331_v36, %v3219_v34  ;;  %v3348_v13 = vadd.f32 %v4332_v21, %v3220_v62  ;;  %v3349_v28 = vadd.f32 %v4333_v10, %v3221_v4  ;;  %v3350_v47 = vadd.f32 %v4334_v9, %v3222_v35  ;;  %v2927_v34 = vpop.permute.xlu1 %2926  ;;  %v4340_v62 = vld [vmem:[%s7724_s0 + $0x98] sm:$0xff] }
 0x52d   :  { %v3351_v16 = vadd.f32 %v4335_v6, %v3223_v11  ;;  %v3352_v48 = vadd.f32 %v4336_v20, %v3224_v18  ;;  %v3353_v63 = vadd.f32 %v4337_v58, %v3225_v40  ;;  %v3354_v41 = vadd.f32 %v4338_v0, %v3226_v56  ;;  %v4343_v35 = vld [vmem:[%s7724_s0 + $0x218] sm:$0xff]  ;;  %v7952_v20 = vld [vmem:[#allocation10_spill] sm:$0xff] }
 0x52e   :  { %v3475_v8 = vmul.f32 0.2, %v3347_v52  ;;  %v3476_v2 = vmul.f32 0.2, %v3348_v13  ;;  %v3477_v57 = vmul.f32 0.2, %v3349_v28  ;;  %v3211_v54 = vadd.f32 %v3125_v26, %v7169_v19 }
 0x52f   :  { %v3478_v39 = vmul.f32 0.2, %v3350_v47  ;;  %v3479_v30 = vmul.f32 0.2, %v3351_v16  ;;  %v3480_v38 = vmul.f32 0.2, %v3352_v48  ;;  %v3212_v15 = vadd.f32 %v3125_v26, %v7172_v60 }
 0x530   :  { %v3481_v25 = vmul.f32 0.2, %v3353_v63  ;;  %v3482_v44 = vmul.f32 0.2, %v3354_v41  ;;  %v3603_v7 = vmax.f32 %v3347_v52, %v3475_v8  ;;  %v3604_v50 = vmax.f32 %v3348_v13, %v3476_v2  ;;  %v4344_v18 = vld [vmem:[%s7724_s0 + $0x298] sm:$0xff] }
 0x531   :  { %v3605_v51 = vmax.f32 %v3349_v28, %v3477_v57  ;;  %v3606_v45 = vmax.f32 %v3350_v47, %v3478_v39  ;;  %v3607_v43 = vmax.f32 %v3351_v16, %v3479_v30  ;;  %v3608_v33 = vmax.f32 %v3352_v48, %v3480_v38  ;;  %v4345_v56 = vld [vmem:[%s7724_s0 + $0x318] sm:$0xff]  ;;  %v7951_v28 = vld [vmem:[#allocation6_spill] sm:$0xff]  ;;  %v2932_v39 = vpop.permute.xlu1 %2931 }
 0x532   :  { %v3609_v3 = vmax.f32 %v3353_v63, %v3481_v25  ;;  %v3610_v31 = vmax.f32 %v3354_v41, %v3482_v44  ;;  %3703 = vst [vmem:[#allocation2 + $0x20] sm:$0xff] %v3603_v7  ;;  %3720 = vst [vmem:[#allocation2 + $0xa0] sm:$0xff] %v3604_v50  ;;  %v3213_v42 = vadd.f32 %v3125_v26, %v7175_v46  ;;  %v4339_v46 = vld [vmem:[%s7724_s0 + $0x18] sm:$0xff]  ;;  %v7955_v50 = vld [vmem:[#allocation63_spill] sm:$0xff] }
 0x533   :  { %v3214_v19 = vadd.f32 %v3125_v26, %v7178_v1  ;;  %3737 = vst [vmem:[#allocation2 + $0x120] sm:$0xff] %v3605_v51  ;;  %3754 = vst [vmem:[#allocation2 + $0x1a0] sm:$0xff] %v3606_v45  ;;  %v3215_v60 = vadd.f32 %v3125_v26, %v7181_v37  ;;  %v3216_v14 = vadd.f32 %v3125_v26, %v7184_v53  ;;  %v4341_v37 = vld [vmem:[%s7724_s0 + $0x118] sm:$0xff] }
 0x534   :  { %3771 = vst [vmem:[#allocation2 + $0x220] sm:$0xff] %v3607_v43  ;;  %3788 = vst [vmem:[#allocation2 + $0x2a0] sm:$0xff] %v3608_v33  ;;  %v3217_v32 = vadd.f32 %v3125_v26, %v7187_v55  ;;  %v3218_v27 = vadd.f32 %v3125_v26, %v7190_v23  ;;  %v3339_v1 = vadd.f32 %v4339_v46, %v3211_v54  ;;  %v4342_v55 = vld [vmem:[%s7724_s0 + $0x198] sm:$0xff] }
 0x535   :  { %3805 = vst [vmem:[#allocation2 + $0x320] sm:$0xff] %v3609_v3  ;;  %3822 = vst [vmem:[#allocation2 + $0x3a0] sm:$0xff] %v3610_v31  ;;  %v3340_v4 = vadd.f32 %v4340_v62, %v3212_v15  ;;  %v3341_v53 = vadd.f32 %v4341_v37, %v3213_v42  ;;  %v3342_v23 = vadd.f32 %v4342_v55, %v3214_v19  ;;  %v4346_v36 = vld [vmem:[%s7724_s0 + $0x398] sm:$0xff]  ;;  %v7953_v15 = vld [vmem:[#allocation23_spill] sm:$0xff] }
 0x536   :  { %v3343_v11 = vadd.f32 %v4343_v35, %v3215_v60  ;;  %v3344_v40 = vadd.f32 %v4344_v18, %v3216_v14  ;;  %v3345_v26 = vadd.f32 %v4345_v56, %v3217_v32  ;;  %v3346_v52 = vadd.f32 %v4346_v36, %v3218_v27  ;;  %v7954_v44 = vld [vmem:[#allocation24_spill] sm:$0xff]  ;;  %v7957_v31 = vld [vmem:[#allocation11_spill] sm:$0xff]  ;;  %v7961_v62 = vld [vmem:[#allocation65_spill] sm:$0xff] }
 0x537   :  { %v3467_v21 = vmul.f32 0.2, %v3339_v1  ;;  %v3468_v13 = vmul.f32 0.2, %v3340_v4  ;;  %v3469_v10 = vmul.f32 0.2, %v3341_v53  ;;  %v7257_v9 = vmul.f32 %v2927_v34, %v7951_v28 }
 0x538   :  { %v3470_v47 = vmul.f32 0.2, %v3342_v23  ;;  %v3471_v6 = vmul.f32 0.2, %v3343_v11  ;;  %v3472_v16 = vmul.f32 0.2, %v3344_v40  ;;  %v7260_v48 = vmul.f32 %v2927_v34, %v7952_v20 }
 0x539   :  { %v3473_v58 = vmul.f32 0.2, %v3345_v26  ;;  %v3474_v63 = vmul.f32 0.2, %v3346_v52  ;;  %v3595_v0 = vmax.f32 %v3339_v1, %v3467_v21  ;;  %v3596_v41 = vmax.f32 %v3340_v4, %v3468_v13  ;;  %v7956_v45 = vld [vmem:[#allocation64_spill] sm:$0xff]  ;;  %v7959_v14 = vld [vmem:[#allocation27_spill] sm:$0xff]  ;;  %v3140_v1 = vpop.permute.xlu0 %3139 }
 0x53a   :  { %v3597_v8 = vmax.f32 %v3341_v53, %v3469_v10  ;;  %v3598_v2 = vmax.f32 %v3342_v23, %v3470_v47  ;;  %v3599_v57 = vmax.f32 %v3343_v11, %v3471_v6  ;;  %v3600_v54 = vmax.f32 %v3344_v40, %v3472_v16  ;;  %v7958_v19 = vld [vmem:[#allocation12_spill] sm:$0xff]  ;;  %v7962_v37 = vld [vmem:[#allocation66_spill] sm:$0xff]  ;;  %v4347_v36 = vld [vmem:[%s7724_s0 + $0x30] sm:$0xff] }
 0x53b   :  { %v3601_v30 = vmax.f32 %v3345_v26, %v3473_v58  ;;  %v3602_v38 = vmax.f32 %v3346_v52, %v3474_v63  ;;  %3702 = vst [vmem:[#allocation2 + $0x18] sm:$0xff] %v3595_v0  ;;  %3719 = vst [vmem:[#allocation2 + $0x98] sm:$0xff] %v3596_v41  ;;  %v7263_v25 = vmul.f32 %v2927_v34, %v7953_v15  ;;  %v7960_v27 = vld [vmem:[#allocation28_spill] sm:$0xff]  ;;  %v3135_v26 = vpop.permute.xlu1 %3134  ;;  %v4350_v10 = vld [vmem:[%s7724_s0 + $0x1b0] sm:$0xff] }
 0x53c   :  { %v7266_v7 = vmul.f32 %v2927_v34, %v7954_v44  ;;  %3736 = vst [vmem:[#allocation2 + $0x118] sm:$0xff] %v3597_v8  ;;  %3753 = vst [vmem:[#allocation2 + $0x198] sm:$0xff] %v3598_v2  ;;  %v7269_v51 = vmul.f32 %v2927_v34, %v7955_v50  ;;  %v7272_v43 = vmul.f32 %v2927_v34, %v7956_v45  ;;  %v4351_v47 = vld [vmem:[%s7724_s0 + $0x230] sm:$0xff] }
 0x53d   :  { %3770 = vst [vmem:[#allocation2 + $0x218] sm:$0xff] %v3599_v57  ;;  %3787 = vst [vmem:[#allocation2 + $0x298] sm:$0xff] %v3600_v54  ;;  %v7275_v33 = vmul.f32 %v2927_v34, %v6655_v29  ;;  %v7278_v3 = vmul.f32 %v2927_v34, %v6661_v59  ;;  %v3027_v42 = vmul.f32 %v2932_v39, %v7957_v31  ;;  %v4352_v16 = vld [vmem:[%s7724_s0 + $0x2b0] sm:$0xff] }
 0x53e   :  { %3804 = vst [vmem:[#allocation2 + $0x318] sm:$0xff] %v3601_v30  ;;  %3821 = vst [vmem:[#allocation2 + $0x398] sm:$0xff] %v3602_v38  ;;  %v3028_v60 = vmul.f32 %v2932_v39, %v7958_v19  ;;  %v3029_v32 = vmul.f32 %v2932_v39, %v7959_v14  ;;  %v3030_v46 = vmul.f32 %v2932_v39, %v7960_v27  ;;  %v4353_v58 = vld [vmem:[%s7724_s0 + $0x330] sm:$0xff] }
 0x53f   :  { %v3031_v4 = vmul.f32 %v2932_v39, %v7961_v62  ;;  %v3032_v53 = vmul.f32 %v2932_v39, %v7962_v37  ;;  %v3033_v29 = vmul.f32 %v2932_v39, %v6683_v12  ;;  %v3034_v59 = vmul.f32 %v2932_v39, %v6689_v17  ;;  %v4348_v12 = vld [vmem:[%s7724_s0 + $0xb0] sm:$0xff]  ;;  %v7320_v37 = vpop.permute.xlu0 %3149 }
 0x540   :  { %v3235_v34 = vadd.f32 %v3140_v1, %v3027_v42  ;;  %v3236_v55 = vadd.f32 %v3140_v1, %v3028_v60  ;;  %v3237_v23 = vadd.f32 %v3140_v1, %v3029_v32  ;;  %v3238_v35 = vadd.f32 %v3140_v1, %v3030_v46  ;;  %v4349_v17 = vld [vmem:[%s7724_s0 + $0x130] sm:$0xff] }
 0x541   :  { %v3239_v11 = vadd.f32 %v3140_v1, %v3031_v4  ;;  %v3240_v18 = vadd.f32 %v3140_v1, %v3032_v53  ;;  %v3241_v40 = vadd.f32 %v3140_v1, %v3033_v29  ;;  %v3242_v56 = vadd.f32 %v3140_v1, %v3034_v59  ;;  %v4354_v0 = vld [vmem:[%s7724_s0 + $0x3b0] sm:$0xff]  ;;  %v2937_v53 = vpop.permute.xlu1 %2936 }
 0x542   :  { %v3363_v52 = vadd.f32 %v4347_v36, %v3235_v34  ;;  %v3364_v21 = vadd.f32 %v4348_v12, %v3236_v55  ;;  %v3365_v13 = vadd.f32 %v4349_v17, %v3237_v23  ;;  %v3366_v28 = vadd.f32 %v4350_v10, %v3238_v35  ;;  %v4359_v34 = vld [vmem:[%s7724_s0 + $0x228] sm:$0xff]  ;;  %v7963_v12 = vld [vmem:[#allocation13_spill] sm:$0xff] }
 0x543   :  { %v3367_v6 = vadd.f32 %v4351_v47, %v3239_v11  ;;  %v3368_v20 = vadd.f32 %v4352_v16, %v3240_v18  ;;  %v3369_v63 = vadd.f32 %v4353_v58, %v3241_v40  ;;  %v3370_v41 = vadd.f32 %v4354_v0, %v3242_v56  ;;  %v4360_v23 = vld [vmem:[%s7724_s0 + $0x2a8] sm:$0xff] }
 0x544   :  { %v3491_v8 = vmul.f32 0.2, %v3363_v52  ;;  %v3492_v2 = vmul.f32 0.2, %v3364_v21  ;;  %v3493_v57 = vmul.f32 0.2, %v3365_v13  ;;  %v3227_v54 = vadd.f32 %v3135_v26, %v7257_v9 }
 0x545   :  { %v3494_v39 = vmul.f32 0.2, %v3366_v28  ;;  %v3495_v30 = vmul.f32 0.2, %v3367_v6  ;;  %v3496_v38 = vmul.f32 0.2, %v3368_v20  ;;  %v3228_v15 = vadd.f32 %v3135_v26, %v7260_v48 }
 0x546   :  { %v3497_v44 = vmul.f32 0.2, %v3369_v63  ;;  %v3498_v50 = vmul.f32 0.2, %v3370_v41  ;;  %v3619_v45 = vmax.f32 %v3363_v52, %v3491_v8  ;;  %v3620_v31 = vmax.f32 %v3364_v21, %v3492_v2  ;;  %v4361_v11 = vld [vmem:[%s7724_s0 + $0x328] sm:$0xff]  ;;  %v2952_v2 = vpop.permute.xlu0 %2951 }
 0x547   :  { %v3621_v42 = vmax.f32 %v3365_v13, %v3493_v57  ;;  %v3622_v19 = vmax.f32 %v3366_v28, %v3494_v39  ;;  %v3623_v60 = vmax.f32 %v3367_v6, %v3495_v30  ;;  %v3624_v14 = vmax.f32 %v3368_v20, %v3496_v38  ;;  %v4362_v40 = vld [vmem:[%s7724_s0 + $0x3a8] sm:$0xff]  ;;  %v7965_v39 = vld [vmem:[#allocation31_spill] sm:$0xff]  ;;  %v7966_v38 = vld [vmem:[#allocation32_spill] sm:$0xff] }
 0x548   :  { %v3625_v32 = vmax.f32 %v3369_v63, %v3497_v44  ;;  %v3626_v27 = vmax.f32 %v3370_v41, %v3498_v50  ;;  %3705 = vst [vmem:[#allocation2 + $0x30] sm:$0xff] %v3619_v45  ;;  %3722 = vst [vmem:[#allocation2 + $0xb0] sm:$0xff] %v3620_v31  ;;  %v3229_v46 = vadd.f32 %v3135_v26, %v7263_v25  ;;  %v4355_v25 = vld [vmem:[%s7724_s0 + $0x28] sm:$0xff]  ;;  %v7967_v44 = vld [vmem:[#allocation67_spill] sm:$0xff] }
 0x549   :  { %v3230_v9 = vadd.f32 %v3135_v26, %v7266_v7  ;;  %3739 = vst [vmem:[#allocation2 + $0x130] sm:$0xff] %v3621_v42  ;;  %3756 = vst [vmem:[#allocation2 + $0x1b0] sm:$0xff] %v3622_v19  ;;  %v3231_v48 = vadd.f32 %v3135_v26, %v7269_v51  ;;  %v3232_v1 = vadd.f32 %v3135_v26, %v7272_v43  ;;  %v4356_v51 = vld [vmem:[%s7724_s0 + $0xa8] sm:$0xff]  ;;  %v7968_v45 = vld [vmem:[#allocation68_spill] sm:$0xff] }
 0x54a   :  { %3773 = vst [vmem:[#allocation2 + $0x230] sm:$0xff] %v3623_v60  ;;  %3790 = vst [vmem:[#allocation2 + $0x2b0] sm:$0xff] %v3624_v14  ;;  %v3233_v62 = vadd.f32 %v3135_v26, %v7275_v33  ;;  %v3234_v4 = vadd.f32 %v3135_v26, %v7278_v3  ;;  %v3355_v7 = vadd.f32 %v4355_v25, %v3227_v54  ;;  %v4357_v43 = vld [vmem:[%s7724_s0 + $0x128] sm:$0xff]  ;;  %v2942_v60 = vpop.permute.xlu1 %2941  ;;  %v7969_v14 = vld [vmem:[#allocation25_spill] sm:$0xff] }
 0x54b   :  { %3807 = vst [vmem:[#allocation2 + $0x330] sm:$0xff] %v3625_v32  ;;  %3824 = vst [vmem:[#allocation2 + $0x3b0] sm:$0xff] %v3626_v27  ;;  %v3356_v29 = vadd.f32 %v4356_v51, %v3228_v15  ;;  %v3357_v33 = vadd.f32 %v4357_v43, %v3229_v46  ;;  %v4358_v3 = vld [vmem:[%s7724_s0 + $0x1a8] sm:$0xff]  ;;  %v3359_v55 = vadd.f32 %v4359_v34, %v3231_v48  ;;  %v7975_v51 = vld [vmem:[#allocation17_spill] sm:$0xff] }
 0x54c   :  { %v3358_v59 = vadd.f32 %v4358_v3, %v3230_v9  ;;  %v3360_v35 = vadd.f32 %v4360_v23, %v3232_v1  ;;  %v3361_v18 = vadd.f32 %v4361_v11, %v3233_v62  ;;  %v3362_v56 = vadd.f32 %v4362_v40, %v3234_v4  ;;  %v7964_v28 = vld [vmem:[#allocation14_spill] sm:$0xff]  ;;  %v7971_v9 = vld [vmem:[#allocation43_spill] sm:$0xff]  ;;  %v7972_v1 = vld [vmem:[#allocation45_spill] sm:$0xff] }
 0x54d   :  { %v3483_v26 = vmul.f32 0.2, %v3355_v7  ;;  %v3484_v36 = vmul.f32 0.2, %v3356_v29  ;;  %v3485_v52 = vmul.f32 0.2, %v3357_v33  ;;  %v7347_v21 = vmul.f32 %v2937_v53, %v7963_v12 }
 0x54e   :  { %v3486_v17 = vmul.f32 0.2, %v3358_v59  ;;  %v3487_v13 = vmul.f32 0.2, %v3359_v55  ;;  %v3488_v10 = vmul.f32 0.2, %v3360_v35  ;;  %v7350_v47 = vmul.f32 %v2937_v53, %v7964_v28  ;;  %v3160_v28 = vpop.permute.xlu0 %3159 }
 0x54f   :  { %v3489_v6 = vmul.f32 0.2, %v3361_v18  ;;  %v3490_v16 = vmul.f32 0.2, %v3362_v56  ;;  %v3611_v20 = vmax.f32 %v3355_v7, %v3483_v26  ;;  %v3612_v58 = vmax.f32 %v3356_v29, %v3484_v36  ;;  %v7970_v27 = vld [vmem:[#allocation26_spill] sm:$0xff]  ;;  %v7974_v7 = vld [vmem:[#allocation75_spill] sm:$0xff] }
 0x550   :  { %v3613_v63 = vmax.f32 %v3357_v33, %v3485_v52  ;;  %v3614_v0 = vmax.f32 %v3358_v59, %v3486_v17  ;;  %v3615_v41 = vmax.f32 %v3359_v55, %v3487_v13  ;;  %v3616_v8 = vmax.f32 %v3360_v35, %v3488_v10  ;;  %v7973_v4 = vld [vmem:[#allocation74_spill] sm:$0xff]  ;;  %v7977_v3 = vld [vmem:[#allocation35_spill] sm:$0xff]  ;;  %v7978_v34 = vld [vmem:[#allocation36_spill] sm:$0xff] }
 0x551   :  { %v3617_v57 = vmax.f32 %v3361_v18, %v3489_v6  ;;  %v3618_v54 = vmax.f32 %v3362_v56, %v3490_v16  ;;  %3704 = vst [vmem:[#allocation2 + $0x28] sm:$0xff] %v3611_v20  ;;  %3721 = vst [vmem:[#allocation2 + $0xa8] sm:$0xff] %v3612_v58  ;;  %v7353_v30 = vmul.f32 %v2937_v53, %v7965_v39  ;;  %v7976_v43 = vld [vmem:[#allocation18_spill] sm:$0xff]  ;;  %v7979_v23 = vld [vmem:[#allocation69_spill] sm:$0xff] }
 0x552   :  { %v7356_v15 = vmul.f32 %v2937_v53, %v7966_v38  ;;  %3738 = vst [vmem:[#allocation2 + $0x128] sm:$0xff] %v3613_v63  ;;  %3755 = vst [vmem:[#allocation2 + $0x1a8] sm:$0xff] %v3614_v0  ;;  %v7359_v50 = vmul.f32 %v2937_v53, %v7967_v44  ;;  %v7362_v31 = vmul.f32 %v2937_v53, %v7968_v45  ;;  %v7980_v11 = vld [vmem:[#allocation70_spill] sm:$0xff]  ;;  %v7981_v56 = vld [vmem:[#allocation81_spill] sm:$0xff] }
 0x553   :  { %3772 = vst [vmem:[#allocation2 + $0x228] sm:$0xff] %v3615_v41  ;;  %3789 = vst [vmem:[#allocation2 + $0x2a8] sm:$0xff] %v3616_v8  ;;  %v7365_v42 = vmul.f32 %v2937_v53, %v6711_v24  ;;  %v7368_v19 = vmul.f32 %v2937_v53, %v6717_v22  ;;  %v3059_v32 = vmul.f32 %v2952_v2, %v7969_v14  ;;  %v4364_v16 = vld [vmem:[%s7724_s0 + $0xc0] sm:$0xff] }
 0x554   :  { %3806 = vst [vmem:[#allocation2 + $0x328] sm:$0xff] %v3617_v57  ;;  %3823 = vst [vmem:[#allocation2 + $0x3a8] sm:$0xff] %v3618_v54  ;;  %v3060_v46 = vmul.f32 %v2952_v2, %v7970_v27  ;;  %v3061_v48 = vmul.f32 %v2952_v2, %v7971_v9  ;;  %v3062_v62 = vmul.f32 %v2952_v2, %v7972_v1  ;;  %v4365_v58 = vld [vmem:[%s7724_s0 + $0x140] sm:$0xff] }
 0x555   :  { %v7375_v25 = vmul.f32 %v2952_v2, %v7973_v4  ;;  %v7378_v24 = vmul.f32 %v2952_v2, %v7974_v7  ;;  %v7381_v22 = vmul.f32 %v2952_v2, %v6791_v5  ;;  %v7384_v53 = vmul.f32 %v2952_v2, %v6797_v61  ;;  %v4367_v41 = vld [vmem:[%s7724_s0 + $0x240] sm:$0xff] }
 0x556   :  { %v3043_v29 = vmul.f32 %v2942_v60, %v7975_v51  ;;  %v3044_v33 = vmul.f32 %v2942_v60, %v7976_v43  ;;  %v3045_v59 = vmul.f32 %v2942_v60, %v7977_v3  ;;  %v3046_v55 = vmul.f32 %v2942_v60, %v7978_v34  ;;  %v4368_v2 = vld [vmem:[%s7724_s0 + $0x2c0] sm:$0xff] }
 0x557   :  { %v3047_v35 = vmul.f32 %v2942_v60, %v7979_v23  ;;  %v3048_v18 = vmul.f32 %v2942_v60, %v7980_v11  ;;  %v3049_v40 = vmul.f32 %v2942_v60, %v6739_v49  ;;  %v3050_v5 = vmul.f32 %v2942_v60, %v7981_v56  ;;  %v4363_v49 = vld [vmem:[%s7724_s0 + $0x40] sm:$0xff] }
 0x558   :  { %v3251_v26 = vadd.f32 %v7320_v37, %v3043_v29  ;;  %v3252_v61 = vadd.f32 %v7320_v37, %v3044_v33  ;;  %v3253_v36 = vadd.f32 %v7320_v37, %v3045_v59  ;;  %v3254_v52 = vadd.f32 %v7320_v37, %v3046_v55  ;;  %v4369_v54 = vld [vmem:[%s7724_s0 + $0x340] sm:$0xff] }
 0x559   :  { %v3255_v12 = vadd.f32 %v7320_v37, %v3047_v35  ;;  %v3256_v17 = vadd.f32 %v7320_v37, %v3048_v18  ;;  %v3257_v13 = vadd.f32 %v7320_v37, %v3049_v40  ;;  %v3258_v10 = vadd.f32 %v7320_v37, %v3050_v5  ;;  %v4366_v37 = vld [vmem:[%s7724_s0 + $0x1c0] sm:$0xff]  ;;  %v3145_v5 = vpop.permute.xlu1 %3144 }
 0x55a   :  { %v3379_v6 = vadd.f32 %v4363_v49, %v3251_v26  ;;  %v3380_v20 = vadd.f32 %v4364_v16, %v3252_v61  ;;  %v3381_v63 = vadd.f32 %v4365_v58, %v3253_v36  ;;  %v3382_v0 = vadd.f32 %v4366_v37, %v3254_v52  ;;  %v4370_v38 = vld [vmem:[%s7724_s0 + $0x3c0] sm:$0xff]  ;;  %v4372_v26 = vld [vmem:[%s7724_s0 + $0xd0] sm:$0xff] }
 0x55b   :  { %v3383_v8 = vadd.f32 %v4367_v41, %v3255_v12  ;;  %v3384_v57 = vadd.f32 %v4368_v2, %v3256_v17  ;;  %v3385_v39 = vadd.f32 %v4369_v54, %v3257_v13  ;;  %v3386_v44 = vadd.f32 %v4370_v38, %v3258_v10  ;;  %v4375_v36 = vld [vmem:[%s7724_s0 + $0x250] sm:$0xff] }
 0x55c   :  { %v3507_v45 = vmul.f32 0.2, %v3379_v6  ;;  %v3508_v60 = vmul.f32 0.2, %v3380_v20  ;;  %v3509_v14 = vmul.f32 0.2, %v3381_v63  ;;  %v3267_v27 = vadd.f32 %v3160_v28, %v3059_v32 }
 0x55d   :  { %v3510_v9 = vmul.f32 0.2, %v3382_v0  ;;  %v3511_v1 = vmul.f32 0.2, %v3383_v8  ;;  %v3512_v4 = vmul.f32 0.2, %v3384_v57  ;;  %v3268_v7 = vadd.f32 %v3160_v28, %v3060_v46 }
 0x55e   :  { %v3513_v51 = vmul.f32 0.2, %v3385_v39  ;;  %v3514_v29 = vmul.f32 0.2, %v3386_v44  ;;  %v3635_v43 = vmax.f32 %v3379_v6, %v3507_v45  ;;  %v3636_v33 = vmax.f32 %v3380_v20, %v3508_v60  ;;  %v4376_v12 = vld [vmem:[%s7724_s0 + $0x2d0] sm:$0xff] }
 0x55f   :  { %v3637_v3 = vmax.f32 %v3381_v63, %v3509_v14  ;;  %v3638_v59 = vmax.f32 %v3382_v0, %v3510_v9  ;;  %v3639_v34 = vmax.f32 %v3383_v8, %v3511_v1  ;;  %v3640_v55 = vmax.f32 %v3384_v57, %v3512_v4  ;;  %v4377_v13 = vld [vmem:[%s7724_s0 + $0x350] sm:$0xff] }
 0x560   :  { %v3641_v23 = vmax.f32 %v3385_v39, %v3513_v51  ;;  %v3642_v35 = vmax.f32 %v3386_v44, %v3514_v29  ;;  %3707 = vst [vmem:[#allocation2 + $0x40] sm:$0xff] %v3635_v43  ;;  %3724 = vst [vmem:[#allocation2 + $0xc0] sm:$0xff] %v3636_v33  ;;  %v3269_v11 = vadd.f32 %v3160_v28, %v3061_v48  ;;  %v4371_v48 = vld [vmem:[%s7724_s0 + $0x50] sm:$0xff]  ;;  %v4380_v51 = vld [vmem:[%s7724_s0 + $0xb8] sm:$0xff] }
 0x561   :  { %v3270_v18 = vadd.f32 %v3160_v28, %v3062_v62  ;;  %3741 = vst [vmem:[#allocation2 + $0x140] sm:$0xff] %v3637_v3  ;;  %3758 = vst [vmem:[#allocation2 + $0x1c0] sm:$0xff] %v3638_v59  ;;  %v3271_v32 = vadd.f32 %v3160_v28, %v7375_v25  ;;  %v3272_v46 = vadd.f32 %v3160_v28, %v7378_v24  ;;  %v4373_v25 = vld [vmem:[%s7724_s0 + $0x150] sm:$0xff]  ;;  %v4383_v43 = vld [vmem:[%s7724_s0 + $0x238] sm:$0xff] }
 0x562   :  { %3775 = vst [vmem:[#allocation2 + $0x240] sm:$0xff] %v3639_v34  ;;  %3792 = vst [vmem:[#allocation2 + $0x2c0] sm:$0xff] %v3640_v55  ;;  %v3273_v40 = vadd.f32 %v3160_v28, %v7381_v22  ;;  %v3274_v56 = vadd.f32 %v3160_v28, %v7384_v53  ;;  %v3395_v62 = vadd.f32 %v4371_v48, %v3267_v27  ;;  %v4374_v22 = vld [vmem:[%s7724_s0 + $0x1d0] sm:$0xff]  ;;  %v4384_v3 = vld [vmem:[%s7724_s0 + $0x2b8] sm:$0xff] }
 0x563   :  { %3809 = vst [vmem:[#allocation2 + $0x340] sm:$0xff] %v3641_v23  ;;  %3826 = vst [vmem:[#allocation2 + $0x3c0] sm:$0xff] %v3642_v35  ;;  %v3396_v61 = vadd.f32 %v4372_v26, %v3268_v7  ;;  %v3397_v24 = vadd.f32 %v4373_v25, %v3269_v11  ;;  %v3398_v53 = vadd.f32 %v4374_v22, %v3270_v18  ;;  %v4378_v28 = vld [vmem:[%s7724_s0 + $0x3d0] sm:$0xff]  ;;  %v2962_v7 = vpop.permute.xlu0 %2961  ;;  %v4385_v34 = vld [vmem:[%s7724_s0 + $0x338] sm:$0xff] }
 0x564   :  { %v3399_v52 = vadd.f32 %v4375_v36, %v3271_v32  ;;  %v3400_v17 = vadd.f32 %v4376_v12, %v3272_v46  ;;  %v3401_v10 = vadd.f32 %v4377_v13, %v3273_v40  ;;  %v3402_v49 = vadd.f32 %v4378_v28, %v3274_v56  ;;  %v4386_v23 = vld [vmem:[%s7724_s0 + $0x3b8] sm:$0xff]  ;;  %v7982_v46 = vld [vmem:[#allocation33_spill] sm:$0xff] }
 0x565   :  { %v3523_v6 = vmul.f32 0.2, %v3395_v62  ;;  %v3524_v16 = vmul.f32 0.2, %v3396_v61  ;;  %v3525_v20 = vmul.f32 0.2, %v3397_v24  ;;  %v3243_v58 = vadd.f32 %v3145_v5, %v7347_v21 }
 0x566   :  { %v3526_v63 = vmul.f32 0.2, %v3398_v53  ;;  %v3527_v37 = vmul.f32 0.2, %v3399_v52  ;;  %v3528_v0 = vmul.f32 0.2, %v3400_v17  ;;  %v3244_v41 = vadd.f32 %v3145_v5, %v7350_v47 }
 0x567   :  { %v3529_v8 = vmul.f32 0.2, %v3401_v10  ;;  %v3530_v2 = vmul.f32 0.2, %v3402_v49  ;;  %v3651_v57 = vmax.f32 %v3395_v62, %v3523_v6  ;;  %v3652_v54 = vmax.f32 %v3396_v61, %v3524_v16  ;;  %v7983_v62 = vld [vmem:[#allocation34_spill] sm:$0xff]  ;;  %v7984_v28 = vld [vmem:[#allocation49_spill] sm:$0xff] }
 0x568   :  { %v3653_v39 = vmax.f32 %v3397_v24, %v3525_v20  ;;  %v3654_v38 = vmax.f32 %v3398_v53, %v3526_v63  ;;  %v3655_v44 = vmax.f32 %v3399_v52, %v3527_v37  ;;  %v3656_v45 = vmax.f32 %v3400_v17, %v3528_v0  ;;  %v2947_v17 = vpop.permute.xlu1 %2946  ;;  %v7985_v6 = vld [vmem:[#allocation50_spill] sm:$0xff]  ;;  %v7987_v63 = vld [vmem:[#allocation79_spill] sm:$0xff] }
 0x569   :  { %v3657_v60 = vmax.f32 %v3401_v10, %v3529_v8  ;;  %v3658_v14 = vmax.f32 %v3402_v49, %v3530_v2  ;;  %3709 = vst [vmem:[#allocation2 + $0x50] sm:$0xff] %v3651_v57  ;;  %3726 = vst [vmem:[#allocation2 + $0xd0] sm:$0xff] %v3652_v54  ;;  %v3245_v27 = vadd.f32 %v3145_v5, %v7353_v30  ;;  %v4379_v30 = vld [vmem:[%s7724_s0 + $0x38] sm:$0xff]  ;;  %v7986_v20 = vld [vmem:[#allocation78_spill] sm:$0xff]  ;;  %v3170_v57 = vpop.permute.xlu0 %3169 }
 0x56a   :  { %v3246_v21 = vadd.f32 %v3145_v5, %v7356_v15  ;;  %3743 = vst [vmem:[#allocation2 + $0x150] sm:$0xff] %v3653_v39  ;;  %3760 = vst [vmem:[#allocation2 + $0x1d0] sm:$0xff] %v3654_v38  ;;  %v3247_v47 = vadd.f32 %v3145_v5, %v7359_v50  ;;  %v3248_v9 = vadd.f32 %v3145_v5, %v7362_v31  ;;  %v4381_v50 = vld [vmem:[%s7724_s0 + $0x138] sm:$0xff]  ;;  %v7988_v0 = vld [vmem:[#allocation91_spill] sm:$0xff] }
 0x56b   :  { %3777 = vst [vmem:[#allocation2 + $0x250] sm:$0xff] %v3655_v44  ;;  %3794 = vst [vmem:[#allocation2 + $0x2d0] sm:$0xff] %v3656_v45  ;;  %v3249_v1 = vadd.f32 %v3145_v5, %v7365_v42  ;;  %v3250_v4 = vadd.f32 %v3145_v5, %v7368_v19  ;;  %v3371_v15 = vadd.f32 %v4379_v30, %v3243_v58  ;;  %v4382_v42 = vld [vmem:[%s7724_s0 + $0x1b8] sm:$0xff]  ;;  %v7990_v54 = vld [vmem:[#allocation21_spill] sm:$0xff] }
 0x56c   :  { %3811 = vst [vmem:[#allocation2 + $0x350] sm:$0xff] %v3657_v60  ;;  %3828 = vst [vmem:[#allocation2 + $0x3d0] sm:$0xff] %v3658_v14  ;;  %v3372_v29 = vadd.f32 %v4380_v51, %v3244_v41  ;;  %v3373_v31 = vadd.f32 %v4381_v50, %v3245_v27  ;;  %v3374_v19 = vadd.f32 %v4382_v42, %v3246_v21  ;;  %v7989_v8 = vld [vmem:[#allocation92_spill] sm:$0xff]  ;;  %v7991_v38 = vld [vmem:[#allocation22_spill] sm:$0xff] }
 0x56d   :  { %v3375_v33 = vadd.f32 %v4383_v43, %v3247_v47  ;;  %v3376_v59 = vadd.f32 %v4384_v3, %v3248_v9  ;;  %v3377_v55 = vadd.f32 %v4385_v34, %v3249_v1  ;;  %v3378_v35 = vadd.f32 %v4386_v23, %v3250_v4  ;;  %v7992_v45 = vld [vmem:[#allocation39_spill] sm:$0xff]  ;;  %v7993_v14 = vld [vmem:[#allocation41_spill] sm:$0xff]  ;;  %v7994_v21 = vld [vmem:[#allocation72_spill] sm:$0xff]  ;;  %v3155_v3 = vpop.permute.xlu1 %3154 }
 0x56e   :  { %v3499_v11 = vmul.f32 0.2, %v3371_v15  ;;  %v3500_v18 = vmul.f32 0.2, %v3372_v29  ;;  %v3501_v32 = vmul.f32 0.2, %v3373_v31  ;;  %v3075_v40 = vmul.f32 %v2962_v7, %v7982_v46 }
 0x56f   :  { %v3502_v56 = vmul.f32 0.2, %v3374_v19  ;;  %v3503_v5 = vmul.f32 0.2, %v3375_v33  ;;  %v3504_v48 = vmul.f32 0.2, %v3376_v59  ;;  %v3076_v26 = vmul.f32 %v2962_v7, %v7983_v62 }
 0x570   :  { %v3505_v61 = vmul.f32 0.2, %v3377_v55  ;;  %v3506_v25 = vmul.f32 0.2, %v3378_v35  ;;  %v3627_v24 = vmax.f32 %v3371_v15, %v3499_v11  ;;  %v3628_v22 = vmax.f32 %v3372_v29, %v3500_v18  ;;  %v7995_v9 = vld [vmem:[#allocation73_spill] sm:$0xff]  ;;  %v7996_v4 = vld [vmem:[#allocation83_spill] sm:$0xff] }
 0x571   :  { %v3629_v53 = vmax.f32 %v3373_v31, %v3501_v32  ;;  %v3630_v36 = vmax.f32 %v3374_v19, %v3502_v56  ;;  %v3631_v52 = vmax.f32 %v3375_v33, %v3503_v5  ;;  %v3632_v12 = vmax.f32 %v3376_v59, %v3504_v48  ;;  %v7997_v15 = vld [vmem:[#allocation85_spill] sm:$0xff] }
 0x572   :  { %v3633_v13 = vmax.f32 %v3377_v55, %v3505_v61  ;;  %v3634_v10 = vmax.f32 %v3378_v35, %v3506_v25  ;;  %3706 = vst [vmem:[#allocation2 + $0x38] sm:$0xff] %v3627_v24  ;;  %3723 = vst [vmem:[#allocation2 + $0xb8] sm:$0xff] %v3628_v22  ;;  %v3077_v49 = vmul.f32 %v2962_v7, %v7984_v28  ;;  %v4387_v59 = vld [vmem:[%s7724_s0 + $0x60] sm:$0xff] }
 0x573   :  { %v3078_v16 = vmul.f32 %v2962_v7, %v7985_v6  ;;  %3740 = vst [vmem:[#allocation2 + $0x138] sm:$0xff] %v3629_v53  ;;  %3757 = vst [vmem:[#allocation2 + $0x1b8] sm:$0xff] %v3630_v36  ;;  %v3079_v58 = vmul.f32 %v2962_v7, %v7986_v20  ;;  %v3080_v37 = vmul.f32 %v2962_v7, %v7987_v63  ;;  %v4388_v55 = vld [vmem:[%s7724_s0 + $0xe0] sm:$0xff] }
 0x574   :  { %3774 = vst [vmem:[#allocation2 + $0x238] sm:$0xff] %v3631_v52  ;;  %3791 = vst [vmem:[#allocation2 + $0x2b8] sm:$0xff] %v3632_v12  ;;  %v3081_v41 = vmul.f32 %v2962_v7, %v7988_v0  ;;  %v3082_v2 = vmul.f32 %v2962_v7, %v7989_v8  ;;  %v3051_v39 = vmul.f32 %v2947_v17, %v7990_v54  ;;  %v4389_v35 = vld [vmem:[%s7724_s0 + $0x160] sm:$0xff] }
 0x575   :  { %3808 = vst [vmem:[#allocation2 + $0x338] sm:$0xff] %v3633_v13  ;;  %3825 = vst [vmem:[#allocation2 + $0x3b8] sm:$0xff] %v3634_v10  ;;  %v3052_v44 = vmul.f32 %v2947_v17, %v7991_v38  ;;  %v3053_v60 = vmul.f32 %v2947_v17, %v7992_v45  ;;  %v3054_v27 = vmul.f32 %v2947_v17, %v7993_v14  ;;  %v4390_v18 = vld [vmem:[%s7724_s0 + $0x1e0] sm:$0xff]  ;;  %v4395_v38 = vld [vmem:[%s7724_s0 + $0x48] sm:$0xff] }
 0x576   :  { %v3055_v47 = vmul.f32 %v2947_v17, %v7994_v21  ;;  %v3056_v1 = vmul.f32 %v2947_v17, %v7995_v9  ;;  %v3057_v30 = vmul.f32 %v2947_v17, %v7996_v4  ;;  %v3058_v51 = vmul.f32 %v2947_v17, %v7997_v15  ;;  %v4391_v46 = vld [vmem:[%s7724_s0 + $0x260] sm:$0xff]  ;;  %v4396_v45 = vld [vmem:[%s7724_s0 + $0xc8] sm:$0xff] }
 0x577   :  { %v3283_v7 = vadd.f32 %v3170_v57, %v3075_v40  ;;  %v3284_v29 = vadd.f32 %v3170_v57, %v3076_v26  ;;  %v3285_v50 = vadd.f32 %v3170_v57, %v3077_v49  ;;  %v3286_v31 = vadd.f32 %v3170_v57, %v3078_v16  ;;  %v4392_v56 = vld [vmem:[%s7724_s0 + $0x2e0] sm:$0xff]  ;;  %v4397_v14 = vld [vmem:[%s7724_s0 + $0x148] sm:$0xff] }
 0x578   :  { %v3287_v42 = vadd.f32 %v3170_v57, %v3079_v58  ;;  %v3288_v19 = vadd.f32 %v3170_v57, %v3080_v37  ;;  %v3289_v43 = vadd.f32 %v3170_v57, %v3081_v41  ;;  %v3290_v33 = vadd.f32 %v3170_v57, %v3082_v2  ;;  %v4393_v48 = vld [vmem:[%s7724_s0 + $0x360] sm:$0xff]  ;;  %v4398_v21 = vld [vmem:[%s7724_s0 + $0x1c8] sm:$0xff] }
 0x579   :  { %v3411_v34 = vadd.f32 %v4387_v59, %v3283_v7  ;;  %v3412_v23 = vadd.f32 %v4388_v55, %v3284_v29  ;;  %v3413_v11 = vadd.f32 %v4389_v35, %v3285_v50  ;;  %v3414_v32 = vadd.f32 %v4390_v18, %v3286_v31  ;;  %v4394_v26 = vld [vmem:[%s7724_s0 + $0x3e0] sm:$0xff]  ;;  %v4399_v9 = vld [vmem:[%s7724_s0 + $0x248] sm:$0xff]  ;;  %v2972_v50 = vpop.permute.xlu0 %2971 }
 0x57a   :  { %v3415_v40 = vadd.f32 %v4391_v46, %v3287_v42  ;;  %v3416_v5 = vadd.f32 %v4392_v56, %v3288_v19  ;;  %v3417_v62 = vadd.f32 %v4393_v48, %v3289_v43  ;;  %v3418_v61 = vadd.f32 %v4394_v26, %v3290_v33  ;;  %v4400_v4 = vld [vmem:[%s7724_s0 + $0x2c8] sm:$0xff]  ;;  %v7998_v43 = vld [vmem:[#allocation29_spill] sm:$0xff]  ;;  %v8000_v26 = vld [vmem:[#allocation47_spill] sm:$0xff] }
 0x57b   :  { %v3539_v25 = vmul.f32 0.2, %v3411_v34  ;;  %v3540_v24 = vmul.f32 0.2, %v3412_v23  ;;  %v3541_v22 = vmul.f32 0.2, %v3413_v11  ;;  %v3259_v53 = vadd.f32 %v3155_v3, %v3051_v39  ;;  %v2957_v39 = vpop.permute.xlu1 %2956 }
 0x57c   :  { %v3542_v36 = vmul.f32 0.2, %v3414_v32  ;;  %v3543_v52 = vmul.f32 0.2, %v3415_v40  ;;  %v3544_v12 = vmul.f32 0.2, %v3416_v5  ;;  %v3260_v17 = vadd.f32 %v3155_v3, %v3052_v44 }
 0x57d   :  { %v3545_v13 = vmul.f32 0.2, %v3417_v62  ;;  %v3546_v10 = vmul.f32 0.2, %v3418_v61  ;;  %v3667_v28 = vmax.f32 %v3411_v34, %v3539_v25  ;;  %v3668_v49 = vmax.f32 %v3412_v23, %v3540_v24  ;;  %v4401_v15 = vld [vmem:[%s7724_s0 + $0x348] sm:$0xff]  ;;  %v8001_v25 = vld [vmem:[#allocation48_spill] sm:$0xff] }
 0x57e   :  { %v3669_v6 = vmax.f32 %v3413_v11, %v3541_v22  ;;  %v3670_v16 = vmax.f32 %v3414_v32, %v3542_v36  ;;  %v3671_v20 = vmax.f32 %v3415_v40, %v3543_v52  ;;  %v3672_v58 = vmax.f32 %v3416_v5, %v3544_v12  ;;  %v4402_v7 = vld [vmem:[%s7724_s0 + $0x3c8] sm:$0xff]  ;;  %v8002_v22 = vld [vmem:[#allocation76_spill] sm:$0xff]  ;;  %v8003_v36 = vld [vmem:[#allocation77_spill] sm:$0xff] }
 0x57f   :  { %v3673_v63 = vmax.f32 %v3417_v62, %v3545_v13  ;;  %v3674_v37 = vmax.f32 %v3418_v61, %v3546_v10  ;;  %3711 = vst [vmem:[#allocation2 + $0x60] sm:$0xff] %v3667_v28  ;;  %3728 = vst [vmem:[#allocation2 + $0xe0] sm:$0xff] %v3668_v49  ;;  %v3261_v0 = vadd.f32 %v3155_v3, %v3053_v60  ;;  %v7999_v55 = vld [vmem:[#allocation30_spill] sm:$0xff]  ;;  %v8004_v12 = vld [vmem:[#allocation89_spill] sm:$0xff]  ;;  %v3180_v28 = vpop.permute.xlu0 %3179 }
 0x580   :  { %v3262_v41 = vadd.f32 %v3155_v3, %v3054_v27  ;;  %3745 = vst [vmem:[#allocation2 + $0x160] sm:$0xff] %v3669_v6  ;;  %3762 = vst [vmem:[#allocation2 + $0x1e0] sm:$0xff] %v3670_v16  ;;  %v3263_v8 = vadd.f32 %v3155_v3, %v3055_v47  ;;  %v3264_v2 = vadd.f32 %v3155_v3, %v3056_v1  ;;  %v8005_v13 = vld [vmem:[#allocation90_spill] sm:$0xff]  ;;  %v8006_v49 = vld [vmem:[#allocation40_spill] sm:$0xff] }
 0x581   :  { %3779 = vst [vmem:[#allocation2 + $0x260] sm:$0xff] %v3671_v20  ;;  %3796 = vst [vmem:[#allocation2 + $0x2e0] sm:$0xff] %v3672_v58  ;;  %v3265_v57 = vadd.f32 %v3155_v3, %v3057_v30  ;;  %v3266_v54 = vadd.f32 %v3155_v3, %v3058_v51  ;;  %v3387_v44 = vadd.f32 %v4395_v38, %v3259_v53  ;;  %v8007_v16 = vld [vmem:[#allocation42_spill] sm:$0xff]  ;;  %v8008_v58 = vld [vmem:[#allocation55_spill] sm:$0xff] }
 0x582   :  { %3813 = vst [vmem:[#allocation2 + $0x360] sm:$0xff] %v3673_v63  ;;  %3830 = vst [vmem:[#allocation2 + $0x3e0] sm:$0xff] %v3674_v37  ;;  %v3388_v60 = vadd.f32 %v4396_v45, %v3260_v17  ;;  %v3389_v27 = vadd.f32 %v4397_v14, %v3261_v0  ;;  %v3390_v47 = vadd.f32 %v4398_v21, %v3262_v41  ;;  %v8009_v37 = vld [vmem:[#allocation57_spill] sm:$0xff]  ;;  %v8010_v41 = vld [vmem:[#allocation84_spill] sm:$0xff] }
 0x583   :  { %v3391_v1 = vadd.f32 %v4399_v9, %v3263_v8  ;;  %v3392_v30 = vadd.f32 %v4400_v4, %v3264_v2  ;;  %v3393_v51 = vadd.f32 %v4401_v15, %v3265_v57  ;;  %v3394_v29 = vadd.f32 %v4402_v7, %v3266_v54  ;;  %v8011_v2 = vld [vmem:[#allocation86_spill] sm:$0xff]  ;;  %v8012_v54 = vld [vmem:[#allocation95_spill] sm:$0xff]  ;;  %v3165_v4 = vpop.permute.xlu1 %3164 }
 0x584   :  { %v3515_v31 = vmul.f32 0.2, %v3387_v44  ;;  %v3516_v42 = vmul.f32 0.2, %v3388_v60  ;;  %v3517_v19 = vmul.f32 0.2, %v3389_v27  ;;  %v7551_v33 = vmul.f32 %v2957_v39, %v7998_v43 }
 0x585   :  { %v3518_v3 = vmul.f32 0.2, %v3390_v47  ;;  %v3519_v59 = vmul.f32 0.2, %v3391_v1  ;;  %v3520_v34 = vmul.f32 0.2, %v3392_v30  ;;  %v7554_v23 = vmul.f32 %v2957_v39, %v7999_v55 }
 0x586   :  { %v3521_v35 = vmul.f32 0.2, %v3393_v51  ;;  %v3522_v11 = vmul.f32 0.2, %v3394_v29  ;;  %v3643_v18 = vmax.f32 %v3387_v44, %v3515_v31  ;;  %v3644_v32 = vmax.f32 %v3388_v60, %v3516_v42  ;;  %v8013_v44 = vld [vmem:[#allocation96_spill] sm:$0xff]  ;;  %v4406_v31 = vld [vmem:[%s7724_s0 + $0x1f0] sm:$0xff] }
 0x587   :  { %v3645_v46 = vmax.f32 %v3389_v27, %v3517_v19  ;;  %v3646_v40 = vmax.f32 %v3390_v47, %v3518_v3  ;;  %v3647_v56 = vmax.f32 %v3391_v1, %v3519_v59  ;;  %v3648_v5 = vmax.f32 %v3392_v30, %v3520_v34  ;;  %v4403_v30 = vld [vmem:[%s7724_s0 + $0x70] sm:$0xff] }
 0x588   :  { %v3649_v48 = vmax.f32 %v3393_v51, %v3521_v35  ;;  %v3650_v62 = vmax.f32 %v3394_v29, %v3522_v11  ;;  %3708 = vst [vmem:[#allocation2 + $0x48] sm:$0xff] %v3643_v18  ;;  %3725 = vst [vmem:[#allocation2 + $0xc8] sm:$0xff] %v3644_v32  ;;  %v7557_v61 = vmul.f32 %v2957_v39, %v8000_v26  ;;  %v4404_v51 = vld [vmem:[%s7724_s0 + $0xf0] sm:$0xff] }
 0x589   :  { %v7560_v24 = vmul.f32 %v2957_v39, %v8001_v25  ;;  %3742 = vst [vmem:[#allocation2 + $0x148] sm:$0xff] %v3645_v46  ;;  %3759 = vst [vmem:[#allocation2 + $0x1c8] sm:$0xff] %v3646_v40  ;;  %v7563_v53 = vmul.f32 %v2957_v39, %v8002_v22  ;;  %v7566_v52 = vmul.f32 %v2957_v39, %v8003_v36  ;;  %v4405_v29 = vld [vmem:[%s7724_s0 + $0x170] sm:$0xff] }
 0x58a   :  { %3776 = vst [vmem:[#allocation2 + $0x248] sm:$0xff] %v3647_v56  ;;  %3793 = vst [vmem:[#allocation2 + $0x2c8] sm:$0xff] %v3648_v5  ;;  %v7569_v17 = vmul.f32 %v2957_v39, %v8004_v12  ;;  %v7572_v10 = vmul.f32 %v2957_v39, %v8005_v13  ;;  %v3091_v6 = vmul.f32 %v2972_v50, %v8006_v49  ;;  %v4407_v19 = vld [vmem:[%s7724_s0 + $0x270] sm:$0xff] }
 0x58b   :  { %3810 = vst [vmem:[#allocation2 + $0x348] sm:$0xff] %v3649_v48  ;;  %3827 = vst [vmem:[#allocation2 + $0x3c8] sm:$0xff] %v3650_v62  ;;  %v3092_v20 = vmul.f32 %v2972_v50, %v8007_v16  ;;  %v3093_v63 = vmul.f32 %v2972_v50, %v8008_v58  ;;  %v3094_v0 = vmul.f32 %v2972_v50, %v8009_v37  ;;  %v4408_v3 = vld [vmem:[%s7724_s0 + $0x2f0] sm:$0xff] }
 0x58c   :  { %v3095_v8 = vmul.f32 %v2972_v50, %v8010_v41  ;;  %v3096_v57 = vmul.f32 %v2972_v50, %v8011_v2  ;;  %v3097_v38 = vmul.f32 %v2972_v50, %v8012_v54  ;;  %v3098_v39 = vmul.f32 %v2972_v50, %v8013_v44  ;;  %v4409_v34 = vld [vmem:[%s7724_s0 + $0x370] sm:$0xff]  ;;  %v4415_v2 = vld [vmem:[%s7724_s0 + $0x258] sm:$0xff] }
 0x58d   :  { %v3299_v45 = vadd.f32 %v3180_v28, %v3091_v6  ;;  %v3300_v60 = vadd.f32 %v3180_v28, %v3092_v20  ;;  %v3301_v14 = vadd.f32 %v3180_v28, %v3093_v63  ;;  %v3302_v27 = vadd.f32 %v3180_v28, %v3094_v0  ;;  %v4410_v35 = vld [vmem:[%s7724_s0 + $0x3f0] sm:$0xff]  ;;  %v7608_v6 = vpop.permute.xlu1 %2966  ;;  %v4416_v54 = vld [vmem:[%s7724_s0 + $0x2d8] sm:$0xff] }
 0x58e   :  { %v3303_v21 = vadd.f32 %v3180_v28, %v3095_v8  ;;  %v3304_v47 = vadd.f32 %v3180_v28, %v3096_v57  ;;  %v3305_v9 = vadd.f32 %v3180_v28, %v3097_v38  ;;  %v3306_v1 = vadd.f32 %v3180_v28, %v3098_v39  ;;  %v4417_v44 = vld [vmem:[%s7724_s0 + $0x358] sm:$0xff] }
 0x58f   :  { %v3427_v15 = vadd.f32 %v4403_v30, %v3299_v45  ;;  %v3428_v7 = vadd.f32 %v4404_v51, %v3300_v60  ;;  %v3429_v50 = vadd.f32 %v4405_v29, %v3301_v14  ;;  %v3430_v42 = vadd.f32 %v4406_v31, %v3302_v27  ;;  %v4418_v45 = vld [vmem:[%s7724_s0 + $0x3d8] sm:$0xff] }
 0x590   :  { %v3431_v43 = vadd.f32 %v4407_v19, %v3303_v21  ;;  %v3432_v59 = vadd.f32 %v4408_v3, %v3304_v47  ;;  %v3433_v55 = vadd.f32 %v4409_v34, %v3305_v9  ;;  %v3434_v11 = vadd.f32 %v4410_v35, %v3306_v1  ;;  %v8014_v47 = vld [vmem:[#allocation37_spill] sm:$0xff]  ;;  %v8016_v35 = vld [vmem:[#allocation51_spill] sm:$0xff] }
 0x591   :  { %v3555_v18 = vmul.f32 0.2, %v3427_v15  ;;  %v3556_v32 = vmul.f32 0.2, %v3428_v7  ;;  %v3557_v46 = vmul.f32 0.2, %v3429_v50  ;;  %v3275_v40 = vadd.f32 %v3165_v4, %v7551_v33 }
 0x592   :  { %v3558_v56 = vmul.f32 0.2, %v3430_v42  ;;  %v3559_v5 = vmul.f32 0.2, %v3431_v43  ;;  %v3560_v48 = vmul.f32 0.2, %v3432_v59  ;;  %v3276_v62 = vadd.f32 %v3165_v4, %v7554_v23 }
 0x593   :  { %v3561_v26 = vmul.f32 0.2, %v3433_v55  ;;  %v3562_v25 = vmul.f32 0.2, %v3434_v11  ;;  %v3683_v22 = vmax.f32 %v3427_v15, %v3555_v18  ;;  %v3684_v36 = vmax.f32 %v3428_v7, %v3556_v32  ;;  %v8015_v15 = vld [vmem:[#allocation38_spill] sm:$0xff]  ;;  %v3175_v7 = vpop.permute.xlu1 %3174  ;;  %v8017_v18 = vld [vmem:[#allocation53_spill] sm:$0xff] }
 0x594   :  { %v3685_v12 = vmax.f32 %v3429_v50, %v3557_v46  ;;  %v3686_v13 = vmax.f32 %v3430_v42, %v3558_v56  ;;  %v3687_v28 = vmax.f32 %v3431_v43, %v3559_v5  ;;  %v3688_v49 = vmax.f32 %v3432_v59, %v3560_v48  ;;  %v8018_v46 = vld [vmem:[#allocation80_spill] sm:$0xff]  ;;  %v8019_v56 = vld [vmem:[#allocation82_spill] sm:$0xff]  ;;  %v8020_v48 = vld [vmem:[#allocation93_spill] sm:$0xff] }
 0x595   :  { %v3689_v16 = vmax.f32 %v3433_v55, %v3561_v26  ;;  %v3690_v20 = vmax.f32 %v3434_v11, %v3562_v25  ;;  %3713 = vst [vmem:[#allocation2 + $0x70] sm:$0xff] %v3683_v22  ;;  %3730 = vst [vmem:[#allocation2 + $0xf0] sm:$0xff] %v3684_v36  ;;  %v3277_v33 = vadd.f32 %v3165_v4, %v7557_v61  ;;  %v4411_v61 = vld [vmem:[%s7724_s0 + $0x58] sm:$0xff]  ;;  %v8021_v26 = vld [vmem:[#allocation94_spill] sm:$0xff] }
 0x596   :  { %v3278_v58 = vadd.f32 %v3165_v4, %v7560_v24  ;;  %3747 = vst [vmem:[#allocation2 + $0x170] sm:$0xff] %v3685_v12  ;;  %3764 = vst [vmem:[#allocation2 + $0x1f0] sm:$0xff] %v3686_v13  ;;  %v3279_v23 = vadd.f32 %v3165_v4, %v7563_v53  ;;  %v3280_v63 = vadd.f32 %v3165_v4, %v7566_v52  ;;  %v4412_v24 = vld [vmem:[%s7724_s0 + $0xd8] sm:$0xff] }
 0x597   :  { %3781 = vst [vmem:[#allocation2 + $0x270] sm:$0xff] %v3687_v28  ;;  %3798 = vst [vmem:[#allocation2 + $0x2f0] sm:$0xff] %v3688_v49  ;;  %v3281_v37 = vadd.f32 %v3165_v4, %v7569_v17  ;;  %v3282_v0 = vadd.f32 %v3165_v4, %v7572_v10  ;;  %v3403_v41 = vadd.f32 %v4411_v61, %v3275_v40  ;;  %v4413_v53 = vld [vmem:[%s7724_s0 + $0x158] sm:$0xff]  ;;  %v4422_v61 = vld [vmem:[%s7724_s0 + $0x1e8] sm:$0xff] }
 0x598   :  { %3815 = vst [vmem:[#allocation2 + $0x370] sm:$0xff] %v3689_v16  ;;  %3832 = vst [vmem:[#allocation2 + $0x3f0] sm:$0xff] %v3690_v20  ;;  %v3404_v8 = vadd.f32 %v4412_v24, %v3276_v62  ;;  %v3405_v52 = vadd.f32 %v4413_v53, %v3277_v33  ;;  %v4414_v17 = vld [vmem:[%s7724_s0 + $0x1d8] sm:$0xff]  ;;  %v3407_v57 = vadd.f32 %v4415_v2, %v3279_v23  ;;  %v2977_v33 = vpop.permute.xlu1 %2976  ;;  %v4423_v24 = vld [vmem:[%s7724_s0 + $0x268] sm:$0xff] }
 0x599   :  { %v3406_v10 = vadd.f32 %v4414_v17, %v3278_v58  ;;  %v3408_v38 = vadd.f32 %v4416_v54, %v3280_v63  ;;  %v3409_v39 = vadd.f32 %v4417_v44, %v3281_v37  ;;  %v3410_v60 = vadd.f32 %v4418_v45, %v3282_v0  ;;  %v4419_v58 = vld [vmem:[%s7724_s0 + $0x68] sm:$0xff] }
 0x59a   :  { %v3531_v14 = vmul.f32 0.2, %v3403_v41  ;;  %v3532_v27 = vmul.f32 0.2, %v3404_v8  ;;  %v3533_v21 = vmul.f32 0.2, %v3405_v52  ;;  %v3083_v9 = vmul.f32 %v7608_v6, %v8014_v47 }
 0x59b   :  { %v3534_v1 = vmul.f32 0.2, %v3406_v10  ;;  %v3535_v4 = vmul.f32 0.2, %v3407_v57  ;;  %v3536_v30 = vmul.f32 0.2, %v3408_v38  ;;  %v3084_v51 = vmul.f32 %v7608_v6, %v8015_v15 }
 0x59c   :  { %v3537_v29 = vmul.f32 0.2, %v3409_v39  ;;  %v3538_v50 = vmul.f32 0.2, %v3410_v60  ;;  %v3659_v31 = vmax.f32 %v3403_v41, %v3531_v14  ;;  %v3660_v42 = vmax.f32 %v3404_v8, %v3532_v27  ;;  %v4421_v37 = vld [vmem:[%s7724_s0 + $0x168] sm:$0xff] }
 0x59d   :  { %v3661_v19 = vmax.f32 %v3405_v52, %v3533_v21  ;;  %v3662_v43 = vmax.f32 %v3406_v10, %v3534_v1  ;;  %v3663_v3 = vmax.f32 %v3407_v57, %v3535_v4  ;;  %v3664_v59 = vmax.f32 %v3408_v38, %v3536_v30  ;;  %v4424_v53 = vld [vmem:[%s7724_s0 + $0x2e8] sm:$0xff] }
 0x59e   :  { %v3665_v34 = vmax.f32 %v3409_v39, %v3537_v29  ;;  %v3666_v55 = vmax.f32 %v3410_v60, %v3538_v50  ;;  %3710 = vst [vmem:[#allocation2 + $0x58] sm:$0xff] %v3659_v31  ;;  %3727 = vst [vmem:[#allocation2 + $0xd8] sm:$0xff] %v3660_v42  ;;  %v3085_v11 = vmul.f32 %v7608_v6, %v8016_v35  ;;  %v4425_v17 = vld [vmem:[%s7724_s0 + $0x368] sm:$0xff]  ;;  %v8022_v39 = vld [vmem:[#allocation44_spill] sm:$0xff]  ;;  %v3185_v50 = vpop.permute.xlu1 %3184 }
 0x59f   :  { %v3086_v32 = vmul.f32 %v7608_v6, %v8017_v18  ;;  %3744 = vst [vmem:[#allocation2 + $0x158] sm:$0xff] %v3661_v19  ;;  %3761 = vst [vmem:[#allocation2 + $0x1d8] sm:$0xff] %v3662_v43  ;;  %v3087_v40 = vmul.f32 %v7608_v6, %v8018_v46  ;;  %v3088_v5 = vmul.f32 %v7608_v6, %v8019_v56  ;;  %v4426_v2 = vld [vmem:[%s7724_s0 + $0x3e8] sm:$0xff]  ;;  %v8024_v19 = vld [vmem:[#allocation59_spill] sm:$0xff] }
 0x5a0   :  { %3778 = vst [vmem:[#allocation2 + $0x258] sm:$0xff] %v3663_v3  ;;  %3795 = vst [vmem:[#allocation2 + $0x2d8] sm:$0xff] %v3664_v59  ;;  %v3089_v62 = vmul.f32 %v7608_v6, %v8020_v48  ;;  %v3090_v25 = vmul.f32 %v7608_v6, %v8021_v26  ;;  %v3291_v22 = vadd.f32 %v3175_v7, %v3083_v9  ;;  %v4420_v6 = vld [vmem:[%s7724_s0 + $0xe8] sm:$0xff]  ;;  %v8025_v3 = vld [vmem:[#allocation61_spill] sm:$0xff] }
 0x5a1   :  { %3812 = vst [vmem:[#allocation2 + $0x358] sm:$0xff] %v3665_v34  ;;  %3829 = vst [vmem:[#allocation2 + $0x3d8] sm:$0xff] %v3666_v55  ;;  %v3292_v36 = vadd.f32 %v3175_v7, %v3084_v51  ;;  %v3293_v12 = vadd.f32 %v3175_v7, %v3085_v11  ;;  %v3294_v13 = vadd.f32 %v3175_v7, %v3086_v32  ;;  %v8023_v21 = vld [vmem:[#allocation46_spill] sm:$0xff]  ;;  %v8026_v34 = vld [vmem:[#allocation87_spill] sm:$0xff] }
 0x5a2   :  { %v3295_v28 = vadd.f32 %v3175_v7, %v3087_v40  ;;  %v3296_v49 = vadd.f32 %v3175_v7, %v3088_v5  ;;  %v3297_v16 = vadd.f32 %v3175_v7, %v3089_v62  ;;  %v3298_v20 = vadd.f32 %v3175_v7, %v3090_v25  ;;  %v8027_v35 = vld [vmem:[#allocation88_spill] sm:$0xff]  ;;  %v8028_v18 = vld [vmem:[#allocation97_spill] sm:$0xff]  ;;  %v8029_v46 = vld [vmem:[#allocation98_spill] sm:$0xff] }
 0x5a3   :  { %v3419_v23 = vadd.f32 %v4419_v58, %v3291_v22  ;;  %v3420_v63 = vadd.f32 %v4420_v6, %v3292_v36  ;;  %v3421_v0 = vadd.f32 %v4421_v37, %v3293_v12  ;;  %v3422_v41 = vadd.f32 %v4422_v61, %v3294_v13  ;;  %v4427_v12 = vld [vmem:[%s7724_s0 + $0x78] sm:$0xff] }
 0x5a4   :  { %v3423_v8 = vadd.f32 %v4423_v24, %v3295_v28  ;;  %v3424_v52 = vadd.f32 %v4424_v53, %v3296_v49  ;;  %v3425_v10 = vadd.f32 %v4425_v17, %v3297_v16  ;;  %v3426_v57 = vadd.f32 %v4426_v2, %v3298_v20  ;;  %v4428_v28 = vld [vmem:[%s7724_s0 + $0xf8] sm:$0xff] }
 0x5a5   :  { %v3547_v54 = vmul.f32 0.2, %v3419_v23  ;;  %v3548_v38 = vmul.f32 0.2, %v3420_v63  ;;  %v3549_v44 = vmul.f32 0.2, %v3421_v0  ;;  %v3099_v45 = vmul.f32 %v2977_v33, %v8022_v39 }
 0x5a6   :  { %v3550_v60 = vmul.f32 0.2, %v3422_v41  ;;  %v3551_v14 = vmul.f32 0.2, %v3423_v8  ;;  %v3552_v27 = vmul.f32 0.2, %v3424_v52  ;;  %v3100_v47 = vmul.f32 %v2977_v33, %v8023_v21 }
 0x5a7   :  { %v3553_v9 = vmul.f32 0.2, %v3425_v10  ;;  %v3554_v1 = vmul.f32 0.2, %v3426_v57  ;;  %v3675_v4 = vmax.f32 %v3419_v23, %v3547_v54  ;;  %v3676_v30 = vmax.f32 %v3420_v63, %v3548_v38  ;;  %v4429_v16 = vld [vmem:[%s7724_s0 + $0x178] sm:$0xff] }
 0x5a8   :  { %v3677_v15 = vmax.f32 %v3421_v0, %v3549_v44  ;;  %v3678_v51 = vmax.f32 %v3422_v41, %v3550_v60  ;;  %v3679_v7 = vmax.f32 %v3423_v8, %v3551_v14  ;;  %v3680_v29 = vmax.f32 %v3424_v52, %v3552_v27  ;;  %v4431_v23 = vld [vmem:[%s7724_s0 + $0x278] sm:$0xff] }
 0x5a9   :  { %v3681_v31 = vmax.f32 %v3425_v10, %v3553_v9  ;;  %v3682_v42 = vmax.f32 %v3426_v57, %v3554_v1  ;;  %3712 = vst [vmem:[#allocation2 + $0x68] sm:$0xff] %v3675_v4  ;;  %3729 = vst [vmem:[#allocation2 + $0xe8] sm:$0xff] %v3676_v30  ;;  %v3101_v43 = vmul.f32 %v2977_v33, %v8024_v19  ;;  %v4432_v63 = vld [vmem:[%s7724_s0 + $0x2f8] sm:$0xff] }
 0x5aa   :  { %v3102_v59 = vmul.f32 %v2977_v33, %v8025_v3  ;;  %3746 = vst [vmem:[#allocation2 + $0x168] sm:$0xff] %v3677_v15  ;;  %3763 = vst [vmem:[#allocation2 + $0x1e8] sm:$0xff] %v3678_v51  ;;  %v3103_v55 = vmul.f32 %v2977_v33, %v8026_v34  ;;  %v3104_v11 = vmul.f32 %v2977_v33, %v8027_v35  ;;  %v4433_v0 = vld [vmem:[%s7724_s0 + $0x378] sm:$0xff] }
 0x5ab   :  { %3780 = vst [vmem:[#allocation2 + $0x268] sm:$0xff] %v3679_v7  ;;  %3797 = vst [vmem:[#allocation2 + $0x2e8] sm:$0xff] %v3680_v29  ;;  %v3105_v32 = vmul.f32 %v2977_v33, %v8028_v18  ;;  %v3106_v40 = vmul.f32 %v2977_v33, %v8029_v46  ;;  %v3307_v56 = vadd.f32 %v3185_v50, %v3099_v45  ;;  %v4430_v33 = vld [vmem:[%s7724_s0 + $0x1f8] sm:$0xff] }
 0x5ac   :  { %3814 = vst [vmem:[#allocation2 + $0x368] sm:$0xff] %v3681_v31  ;;  %3831 = vst [vmem:[#allocation2 + $0x3e8] sm:$0xff] %v3682_v42  ;;  %v3308_v5 = vadd.f32 %v3185_v50, %v3100_v47  ;;  %v3309_v48 = vadd.f32 %v3185_v50, %v3101_v43  ;;  %v3310_v62 = vadd.f32 %v3185_v50, %v3102_v59  ;;  %v4434_v41 = vld [vmem:[%s7724_s0 + $0x3f8] sm:$0xff]  ;;  %s4435_s0 = scalar_lea.vmem %s3840_s28, 16384 }
 0x5ad   :  { %v3311_v26 = vadd.f32 %v3185_v50, %v3103_v55  ;;  %v3312_v25 = vadd.f32 %v3185_v50, %v3104_v11  ;;  %v3313_v22 = vadd.f32 %v3185_v50, %v3105_v32  ;;  %v3314_v36 = vadd.f32 %v3185_v50, %v3106_v40  ;;  %p4436_p0 = scmp.ne.s32.totalorder %s3840_s28, %s4435_s0  ;;  %p4441_p2 = scmp.lt.s32.totalorder %s4435_s0, %s4435_s0 }
 0x5ae   :  { %v3435_v13 = vadd.f32 %v4427_v12, %v3307_v56  ;;  %v3436_v49 = vadd.f32 %v4428_v28, %v3308_v5  ;;  %v3437_v20 = vadd.f32 %v4429_v16, %v3309_v48  ;;  %v3438_v58 = vadd.f32 %v4430_v33, %v3310_v62 }
 0x5af   :  { %v3439_v6 = vadd.f32 %v4431_v23, %v3311_v26  ;;  %v3440_v37 = vadd.f32 %v4432_v63, %v3312_v25  ;;  %v3441_v61 = vadd.f32 %v4433_v0, %v3313_v22  ;;  %v3442_v24 = vadd.f32 %v4434_v41, %v3314_v36  ;;  %p4442_p3 = por %p4441_p2, %p4440_p1 }
 0x5b0   :  { %v3563_v8 = vmul.f32 0.2, %v3435_v13  ;;  %v3564_v53 = vmul.f32 0.2, %v3436_v49  ;;  %v3565_v52 = vmul.f32 0.2, %v3437_v20 }
 0x5b1   :  { %v3566_v17 = vmul.f32 0.2, %v3438_v58  ;;  %v3567_v10 = vmul.f32 0.2, %v3439_v6  ;;  %v3568_v2 = vmul.f32 0.2, %v3440_v37  ;;  %p4443_p4 = pnand %p4442_p3, %p4436_p0 }
 0x5b2   :  { %v3569_v57 = vmul.f32 0.2, %v3441_v61  ;;  %v3570_v54 = vmul.f32 0.2, %v3442_v24  ;;  %v3691_v38 = vmax.f32 %v3435_v13, %v3563_v8  ;;  %v3692_v44 = vmax.f32 %v3436_v49, %v3564_v53 }
 0x5b3   :  { %v3693_v39 = vmax.f32 %v3437_v20, %v3565_v52  ;;  %v3694_v45 = vmax.f32 %v3438_v58, %v3566_v17  ;;  %v3695_v60 = vmax.f32 %v3439_v6, %v3567_v10  ;;  %v3696_v14 = vmax.f32 %v3440_v37, %v3568_v2 }
 0x5b4   :  { %v3697_v27 = vmax.f32 %v3441_v61, %v3569_v57  ;;  %v3698_v21 = vmax.f32 %v3442_v24, %v3570_v54  ;;  %3714 = vst [vmem:[#allocation2 + $0x78] sm:$0xff] %v3691_v38  ;;  %3731 = vst [vmem:[#allocation2 + $0xf8] sm:$0xff] %v3692_v44 }
 0x5b5   :  { %3748 = vst [vmem:[#allocation2 + $0x178] sm:$0xff] %v3693_v39  ;;  %3765 = vst [vmem:[#allocation2 + $0x1f8] sm:$0xff] %v3694_v45 }
 0x5b6   :  { %3782 = vst [vmem:[#allocation2 + $0x278] sm:$0xff] %v3695_v60  ;;  %3799 = vst [vmem:[#allocation2 + $0x2f8] sm:$0xff] %v3696_v14 }
 0x5b7   :  { %3816 = vst [vmem:[#allocation2 + $0x378] sm:$0xff] %v3697_v27  ;;  %3833 = vst [vmem:[#allocation2 + $0x3f8] sm:$0xff] %v3698_v21 }
 0x5b8   :  { %4446 = shalt.err (!%p4443_p4)
}
 0x5b9   :  { %s4447_s7 = scalar_lea.hbm %s7730_s6, 16384 }
 0x5ba   :  { %p4448_p5 = scmp.ne.s32.totalorder %s7730_s6, %s4447_s7  ;;  %p4451_p6 = scmp.lt.u32.totalorder %s4447_s7, %s7730_s6 }
 0x5bc   :  { %p4453_p7 = pnand %p4451_p6, %p4448_p5 }
 0x5be   :  { %4456 = shalt.err (!%p4453_p7)
}
 0x5bf   :  { %s4464_s10 = smov 128   ;;  %s4465_s11 = smov 8  }
 0x5c0   :  { %3845 = dma.vmem_to_hbm [thread:$0]  %s3840_s28, 16384, %s7730_s6, [#allocation3], %s4464_s10, %s4464_s10, %s4465_s11  }
 0x5c1   :  { %4457 = dma.done.wait [#allocation3], 16384  }
 0x5c2   :  { %4458 = vsyncadd [#allocation3], 4294950912 }
 0x5c3   :  { %3849 = vsyncpa [#allocation3], 1 }

</bundles_post_ra>
